<compile_context>
chip_gen: v7x
topology: tpu7x:2x2x1
jax: 0.10.0
libtpu: 0.0.40
codegen_flags: <defaults>
</compile_context>

<pallas_src>
import functools

import jax
import jax.numpy as jnp
import numpy as np
from jax import lax
from jax.experimental import pallas as pl
from jax.experimental.pallas import tpu as pltpu


# ---------------------------------------------------------------------------
# Pallas kernels
# ---------------------------------------------------------------------------

def _matmul_bias_relu_kernel(x_ref, w_ref, b_ref, o_ref, *, apply_relu):
    # bf16 x bf16 -> fp32 accumulate on the MXU; bias + ReLU in fp32 on the VPU.
    acc = jnp.dot(x_ref[...], w_ref[...], preferred_element_type=jnp.float32)
    acc = acc + b_ref[...]
    if apply_relu:
        acc = jnp.maximum(acc, 0.0)
    o_ref[...] = acc


def _fc_head_kernel(x_ref, w1_ref, b1_ref, w2_ref, b2_ref, fc1_ref, out_ref):
    # Fused fc1 (ReLU) + output head: the 512-wide fc1 tile stays in VMEM.
    h = jnp.dot(x_ref[...], w1_ref[...], preferred_element_type=jnp.float32)
    h = jnp.maximum(h + b1_ref[...], 0.0)
    fc1_ref[...] = h
    out_ref[...] = (
        jnp.dot(h.astype(jnp.bfloat16), w2_ref[...],
                preferred_element_type=jnp.float32) + b2_ref[...])


def _choose_tm(M, target):
    """Pick an M tile: full array if small, else a multiple-of-8 divisor of M
    (avoids edge blocks), else fall back to `target` (edge block is masked)."""
    if M <= target:
        return M
    for tm in range(target, 7, -8):
        if M % tm == 0:
            return tm
    return target


def pallas_matmul_bias_relu(x, w, b, *, relu, tm_target=512):
    """act(x @ w + b); x: (M, K) bf16, w: (K, N) bf16, b: (1, N) f32 -> (M, N) f32."""
    M, K = x.shape
    Kw, N = w.shape
    assert K == Kw
    tm = _choose_tm(M, tm_target)
    return pl.pallas_call(
        functools.partial(_matmul_bias_relu_kernel, apply_relu=relu),
        out_shape=jax.ShapeDtypeStruct((M, N), jnp.float32),
        grid=(pl.cdiv(M, tm),),
        in_specs=[
            pl.BlockSpec((tm, K), lambda i: (i, 0)),
            pl.BlockSpec((K, N), lambda i: (0, 0)),   # weights stay VMEM-resident
            pl.BlockSpec((1, N), lambda i: (0, 0)),
        ],
        out_specs=pl.BlockSpec((tm, N), lambda i: (i, 0)),
        compiler_params=pltpu.CompilerParams(dimension_semantics=("parallel",)),
    )(x, w, b)


def pallas_fc_head(x, w1, b1, w2, b2, *, tm_target=256):
    """(relu(x @ w1 + b1), relu(...) @ w2 + b2) in a single fused kernel."""
    M, K = x.shape
    _, N1 = w1.shape
    _, N2 = w2.shape
    tm = _choose_tm(M, tm_target)
    fc1, out = pl.pallas_call(
        _fc_head_kernel,
        out_shape=(jax.ShapeDtypeStruct((M, N1), jnp.float32),
                   jax.ShapeDtypeStruct((M, N2), jnp.float32)),
        grid=(pl.cdiv(M, tm),),
        in_specs=[
            pl.BlockSpec((tm, K), lambda i: (i, 0)),
            pl.BlockSpec((K, N1), lambda i: (0, 0)),
            pl.BlockSpec((1, N1), lambda i: (0, 0)),
            pl.BlockSpec((N1, N2), lambda i: (0, 0)),
            pl.BlockSpec((1, N2), lambda i: (0, 0)),
        ],
        out_specs=(pl.BlockSpec((tm, N1), lambda i: (i, 0)),
                   pl.BlockSpec((tm, N2), lambda i: (i, 0))),
        compiler_params=pltpu.CompilerParams(dimension_semantics=("parallel",)),
    )(x, w1, b1, w2, b2)
    return fc1, out


# ---------------------------------------------------------------------------
# NHWC conv = (jit-fused) patch gather + Pallas GEMM
# ---------------------------------------------------------------------------

def _im2col_nhwc(x, kh, kw, stride):
    """x: (B, H, W, C) -> (B*OH*OW, kh*kw*C); column order (kh, kw, C)."""
    B, H, W, C = x.shape
    OH = (H - kh) // stride + 1
    OW = (W - kw) // stride + 1
    cols = []
    for i in range(kh):
        for j in range(kw):
            cols.append(x[:, i:i + (OH - 1) * stride + 1:stride,
                          j:j + (OW - 1) * stride + 1:stride, :])
    col = jnp.concatenate(cols, axis=-1)            # (B, OH, OW, kh*kw*C)
    return col.reshape(B * OH * OW, kh * kw * C), OH, OW


def conv2d_relu(x_nhwc, w_kc, b_row, kh, kw, stride):
    """NHWC conv + bias + ReLU. w_kc: (kh*kw*Cin, Cout) bf16, b_row: (1, Cout) f32."""
    B = x_nhwc.shape[0]
    cout = w_kc.shape[1]
    col, OH, OW = _im2col_nhwc(x_nhwc.astype(jnp.bfloat16), kh, kw, stride)
    out = pallas_matmul_bias_relu(col, w_kc, b_row, relu=True)
    return out.reshape(B, OH, OW, cout)


# ---------------------------------------------------------------------------
# Parameters
# ---------------------------------------------------------------------------

def init_params(key, num_output_actions=6, hist_len=4):
    """Deterministic init, PyTorch-default-style uniform(-1/sqrt(fan_in), 1/sqrt(fan_in))."""
    def uniform(k, shape, fan_in):
        bound = 1.0 / np.sqrt(fan_in)
        return jax.random.uniform(k, shape, jnp.float32, -bound, bound)

    ks = jax.random.split(key, 10)
    p = {}
    p["conv1_w"] = uniform(ks[0], (32, hist_len, 8, 8), hist_len * 8 * 8)
    p["conv1_b"] = uniform(ks[1], (32,), hist_len * 8 * 8)
    p["conv2_w"] = uniform(ks[2], (64, 32, 4, 4), 32 * 4 * 4)
    p["conv2_b"] = uniform(ks[3], (64,), 32 * 4 * 4)
    p["conv3_w"] = uniform(ks[4], (64, 64, 3, 3), 64 * 3 * 3)
    p["conv3_b"] = uniform(ks[5], (64,), 64 * 3 * 3)
    p["fc1_w"] = uniform(ks[6], (512, 64 * 7 * 7), 64 * 7 * 7)
    p["fc1_b"] = uniform(ks[7], (512,), 64 * 7 * 7)
    p["out_w"] = uniform(ks[8], (num_output_actions, 512), 512)
    p["out_b"] = uniform(ks[9], (num_output_actions,), 512)
    return p


def preprocess_params(p):
    """One-time weight prep: (K, N) layout, NHWC column order, fc1's NCHW-flatten
    permutation folded into its weight, bf16 MXU operands, fp32 biases."""
    q = {}
    for name in ("conv1", "conv2", "conv3"):
        w = p[f"{name}_w"]                               # (Cout, Cin, KH, KW)
        Cout, Cin, KH, KW = w.shape
        q[f"{name}_w"] = (jnp.transpose(w, (2, 3, 1, 0))  # (KH, KW, Cin, Cout)
                          .reshape(KH * KW * Cin, Cout)
                          .astype(jnp.bfloat16))
        q[f"{name}_b"] = p[f"{name}_b"].reshape(1, Cout).astype(jnp.float32)

    # PyTorch fc1 consumes the NCHW flatten (C, H, W); our conv3 output is NHWC,
    # so permute fc1's columns to (H, W, C) once here instead of transposing
    # activations every forward.
    fc1_w = (p["fc1_w"].reshape(512, 64, 7, 7)
             .transpose(0, 2, 3, 1)
             .reshape(512, 7 * 7 * 64))
    q["fc1_w"] = fc1_w.T.astype(jnp.bfloat16)            # (3136, 512)
    q["fc1_b"] = p["fc1_b"].reshape(1, -1).astype(jnp.float32)
    q["out_w"] = p["out_w"].T.astype(jnp.bfloat16)       # (512, num_actions)
    q["out_b"] = p["out_b"].reshape(1, -1).astype(jnp.float32)
    return q


# ---------------------------------------------------------------------------
# Forward pass (matches PyTorch Network.forward outputs)
# ---------------------------------------------------------------------------

def network_forward(x_nchw, q):
    """Returns (conv1_out, conv2_out, conv3_out, fc1_out, output); convs in NCHW."""
    B = x_nchw.shape[0]
    x = jnp.transpose(x_nchw, (0, 2, 3, 1))              # single NCHW->NHWC at entry
    c1 = conv2d_relu(x,  q["conv1_w"], q["conv1_b"], 8, 8, 4)   # (B, 20, 20, 32)
    c2 = conv2d_relu(c1, q["conv2_w"], q["conv2_b"], 4, 4, 2)   # (B, 9, 9, 64)
    c3 = conv2d_relu(c2, q["conv3_w"], q["conv3_b"], 3, 3, 1)   # (B, 7, 7, 64)
    flat = c3.reshape(B, -1).astype(jnp.bfloat16)        # (H, W, C) order; fc1_w pre-permuted
    fc1, out = pallas_fc_head(flat, q["fc1_w"], q["fc1_b"], q["out_w"], q["out_b"])
    # Module interface is NCHW; only the *returned* feature maps are transposed.
    return (jnp.transpose(c1, (0, 3, 1, 2)),
            jnp.transpose(c2, (0, 3, 1, 2)),
            jnp.transpose(c3, (0, 3, 1, 2)),
            fc1, out)


def _reference_forward(x, p):
    def conv(x, w, b, stride):
        y = lax.conv_general_dilated(x, w, (stride, stride), "VALID",
                                     dimension_numbers=("NCHW", "OIHW", "NCHW"))
        return jax.nn.relu(y + b[None, :, None, None])

    c1 = conv(x, p["conv1_w"], p["conv1_b"], 4)
    c2 = conv(c1, p["conv2_w"], p["conv2_b"], 2)
    c3 = conv(c2, p["conv3_w"], p["conv3_b"], 1)
    flat = c3.reshape(x.shape[0], -1)
    fc1 = jax.nn.relu(flat @ p["fc1_w"].T + p["fc1_b"])
    out = fc1 @ p["out_w"].T + p["out_b"]
    return c1, c2, c3, fc1, out


if __name__ == "__main__":
    key = jax.random.PRNGKey(0)
    kx, kp = jax.random.split(key)
    # fc1 hard-codes 64*7*7 features, which forces 84x84 spatial input (standard DQN frames).
    x = jax.random.normal(kx, (2, 4, 84, 84), jnp.float32)
    raw_params = init_params(kp, num_output_actions=6, hist_len=4)
    params = preprocess_params(raw_params)          # one-time weight layout/bf16 prep

    fwd = jax.jit(network_forward)
    outs = jax.block_until_ready(fwd(x, params))

    refs = _reference_forward(x, raw_params)
    expected_shapes = [(2, 32, 20, 20), (2, 64, 9, 9), (2, 64, 7, 7), (2, 512), (2, 6)]
    for o, r, s in zip(outs, refs, expected_shapes):
        assert o.shape == s and r.shape == s, (o.shape, r.shape, s)
        np.testing.assert_allclose(np.asarray(o), np.asarray(r), rtol=2e-2, atol=2e-2)

    print("KERNEL_OK")
</pallas_src>

<mosaic_0001>
module attributes {stable_mosaic.version = 11 : i64} {
  func.func @_matmul_bias_relu_kernel(%arg0: i32, %arg1: memref<400x256xbf16, #tpu.memory_space<vmem>>, %arg2: memref<256x32xbf16, #tpu.memory_space<vmem>>, %arg3: memref<1x32xf32, #tpu.memory_space<vmem>>, %arg4: memref<400x32xf32, #tpu.memory_space<vmem>>) attributes {dimension_semantics = [#tpu.dimension_semantics<parallel>], iteration_bounds = array<i64: 2>, scalar_prefetch = 0 : i64, scratch_operands = 0 : i64, tpu.core_type = #tpu.core_type<tc>, window_params = [{transform_indices = @transform_0, window_bounds = array<i64: 400, 256>}, {pipeline_mode = #tpu.pipeline_mode<synchronous>, transform_indices = @transform_1, window_bounds = array<i64: 256, 32>}, {pipeline_mode = #tpu.pipeline_mode<synchronous>, transform_indices = @transform_2, window_bounds = array<i64: 1, 32>}, {transform_indices = @transform_3, window_bounds = array<i64: 400, 32>}]} {
    %c0 = arith.constant 0 : index
    %c0_0 = arith.constant 0 : index
    %0 = vector.load %arg1[%c0, %c0_0] : memref<400x256xbf16, #tpu.memory_space<vmem>>, vector<400x256xbf16>
    %c0_1 = arith.constant 0 : index
    %c0_2 = arith.constant 0 : index
    %1 = vector.load %arg2[%c0_1, %c0_2] : memref<256x32xbf16, #tpu.memory_space<vmem>>, vector<256x32xbf16>
    %cst = arith.constant dense<0.000000e+00> : vector<400x32xf32>
    %2 = tpu.matmul %0, %1, %cst {dimension_numbers = #tpu.dot_dimension_numbers<[1], [0], [0], [1], [0, 0, 1, 1], [], []>} : vector<400x256xbf16>, vector<256x32xbf16>, vector<400x32xf32> -> vector<400x32xf32>
    %c0_3 = arith.constant 0 : index
    %c0_4 = arith.constant 0 : index
    %3 = vector.load %arg3[%c0_3, %c0_4] : memref<1x32xf32, #tpu.memory_space<vmem>>, vector<1x32xf32>
    %4 = vector.broadcast %3 : vector<1x32xf32> to vector<400x32xf32>
    %5 = arith.addf %2, %4 : vector<400x32xf32>
    %cst_5 = arith.constant 0.000000e+00 : f32
    %6 = vector.broadcast %cst_5 : f32 to vector<400x32xf32>
    %7 = arith.maximumf %5, %6 : vector<400x32xf32>
    %c0_6 = arith.constant 0 : index
    %c0_7 = arith.constant 0 : index
    %8 = vector.load %arg4[%c0_6, %c0_7] : memref<400x32xf32, #tpu.memory_space<vmem>>, vector<400x32xf32>
    tpu.vector_store %arg4[%c0_6, %c0_7], %7 {strides = array<i32>} : memref<400x32xf32, #tpu.memory_space<vmem>>, vector<400x32xf32>,
    return
  }
  func.func @transform_0(%arg0: i32) -> (i32, i32) {
    %c0_i32 = arith.constant 0 : i32
    %c0_i32_0 = arith.constant 0 : i32
    return %arg0, %c0_i32 : i32, i32
  }
  func.func @transform_1(%arg0: i32) -> (i32, i32) {
    %c0_i32 = arith.constant 0 : i32
    %c0_i32_0 = arith.constant 0 : i32
    %c0_i32_1 = arith.constant 0 : i32
    return %c0_i32, %c0_i32_0 : i32, i32
  }
  func.func @transform_2(%arg0: i32) -> (i32, i32) {
    %c0_i32 = arith.constant 0 : i32
    %c0_i32_0 = arith.constant 0 : i32
    %c0_i32_1 = arith.constant 0 : i32
    return %c0_i32, %c0_i32_0 : i32, i32
  }
  func.func @transform_3(%arg0: i32) -> (i32, i32) {
    %c0_i32 = arith.constant 0 : i32
    %c0_i32_0 = arith.constant 0 : i32
    return %arg0, %c0_i32 : i32, i32
  }
}

module attributes {stable_mosaic.version = 11 : i64} {
  func.func @_matmul_bias_relu_kernel(%arg0: i32, %arg1: memref<162x512xbf16, #tpu.memory_space<vmem>>, %arg2: memref<512x64xbf16, #tpu.memory_space<vmem>>, %arg3: memref<1x64xf32, #tpu.memory_space<vmem>>, %arg4: memref<162x64xf32, #tpu.memory_space<vmem>>) attributes {dimension_semantics = [#tpu.dimension_semantics<parallel>], iteration_bounds = array<i64: 1>, scalar_prefetch = 0 : i64, scratch_operands = 0 : i64, tpu.core_type = #tpu.core_type<tc>, window_params = [{transform_indices = @transform_0, window_bounds = array<i64: 162, 512>}, {pipeline_mode = #tpu.pipeline_mode<synchronous>, transform_indices = @transform_1, window_bounds = array<i64: 512, 64>}, {pipeline_mode = #tpu.pipeline_mode<synchronous>, transform_indices = @transform_2, window_bounds = array<i64: 1, 64>}, {transform_indices = @transform_3, window_bounds = array<i64: 162, 64>}]} {
    %c0 = arith.constant 0 : index
    %c0_0 = arith.constant 0 : index
    %0 = vector.load %arg1[%c0, %c0_0] : memref<162x512xbf16, #tpu.memory_space<vmem>>, vector<162x512xbf16>
    %c0_1 = arith.constant 0 : index
    %c0_2 = arith.constant 0 : index
    %1 = vector.load %arg2[%c0_1, %c0_2] : memref<512x64xbf16, #tpu.memory_space<vmem>>, vector<512x64xbf16>
    %cst = arith.constant dense<0.000000e+00> : vector<162x64xf32>
    %2 = tpu.matmul %0, %1, %cst {dimension_numbers = #tpu.dot_dimension_numbers<[1], [0], [0], [1], [0, 0, 1, 1], [], []>} : vector<162x512xbf16>, vector<512x64xbf16>, vector<162x64xf32> -> vector<162x64xf32>
    %c0_3 = arith.constant 0 : index
    %c0_4 = arith.constant 0 : index
    %3 = vector.load %arg3[%c0_3, %c0_4] : memref<1x64xf32, #tpu.memory_space<vmem>>, vector<1x64xf32>
    %4 = vector.broadcast %3 : vector<1x64xf32> to vector<162x64xf32>
    %5 = arith.addf %2, %4 : vector<162x64xf32>
    %cst_5 = arith.constant 0.000000e+00 : f32
    %6 = vector.broadcast %cst_5 : f32 to vector<162x64xf32>
    %7 = arith.maximumf %5, %6 : vector<162x64xf32>
    %c0_6 = arith.constant 0 : index
    %c0_7 = arith.constant 0 : index
    %8 = vector.load %arg4[%c0_6, %c0_7] : memref<162x64xf32, #tpu.memory_space<vmem>>, vector<162x64xf32>
    tpu.vector_store %arg4[%c0_6, %c0_7], %7 {strides = array<i32>} : memref<162x64xf32, #tpu.memory_space<vmem>>, vector<162x64xf32>,
    return
  }
  func.func @transform_0(%arg0: i32) -> (i32, i32) {
    %c0_i32 = arith.constant 0 : i32
    %c0_i32_0 = arith.constant 0 : i32
    return %arg0, %c0_i32 : i32, i32
  }
  func.func @transform_1(%arg0: i32) -> (i32, i32) {
    %c0_i32 = arith.constant 0 : i32
    %c0_i32_0 = arith.constant 0 : i32
    %c0_i32_1 = arith.constant 0 : i32
    return %c0_i32, %c0_i32_0 : i32, i32
  }
  func.func @transform_2(%arg0: i32) -> (i32, i32) {
    %c0_i32 = arith.constant 0 : i32
    %c0_i32_0 = arith.constant 0 : i32
    %c0_i32_1 = arith.constant 0 : i32
    return %c0_i32, %c0_i32_0 : i32, i32
  }
  func.func @transform_3(%arg0: i32) -> (i32, i32) {
    %c0_i32 = arith.constant 0 : i32
    %c0_i32_0 = arith.constant 0 : i32
    return %arg0, %c0_i32 : i32, i32
  }
}

module attributes {stable_mosaic.version = 11 : i64} {
  func.func @_matmul_bias_relu_kernel(%arg0: i32, %arg1: memref<98x576xbf16, #tpu.memory_space<vmem>>, %arg2: memref<576x64xbf16, #tpu.memory_space<vmem>>, %arg3: memref<1x64xf32, #tpu.memory_space<vmem>>, %arg4: memref<98x64xf32, #tpu.memory_space<vmem>>) attributes {dimension_semantics = [#tpu.dimension_semantics<parallel>], iteration_bounds = array<i64: 1>, scalar_prefetch = 0 : i64, scratch_operands = 0 : i64, tpu.core_type = #tpu.core_type<tc>, window_params = [{transform_indices = @transform_0, window_bounds = array<i64: 98, 576>}, {pipeline_mode = #tpu.pipeline_mode<synchronous>, transform_indices = @transform_1, window_bounds = array<i64: 576, 64>}, {pipeline_mode = #tpu.pipeline_mode<synchronous>, transform_indices = @transform_2, window_bounds = array<i64: 1, 64>}, {transform_indices = @transform_3, window_bounds = array<i64: 98, 64>}]} {
    %c0 = arith.constant 0 : index
    %c0_0 = arith.constant 0 : index
    %0 = vector.load %arg1[%c0, %c0_0] : memref<98x576xbf16, #tpu.memory_space<vmem>>, vector<98x576xbf16>
    %c0_1 = arith.constant 0 : index
    %c0_2 = arith.constant 0 : index
    %1 = vector.load %arg2[%c0_1, %c0_2] : memref<576x64xbf16, #tpu.memory_space<vmem>>, vector<576x64xbf16>
    %cst = arith.constant dense<0.000000e+00> : vector<98x64xf32>
    %2 = tpu.matmul %0, %1, %cst {dimension_numbers = #tpu.dot_dimension_numbers<[1], [0], [0], [1], [0, 0, 1, 1], [], []>} : vector<98x576xbf16>, vector<576x64xbf16>, vector<98x64xf32> -> vector<98x64xf32>
    %c0_3 = arith.constant 0 : index
    %c0_4 = arith.constant 0 : index
    %3 = vector.load %arg3[%c0_3, %c0_4] : memref<1x64xf32, #tpu.memory_space<vmem>>, vector<1x64xf32>
    %4 = vector.broadcast %3 : vector<1x64xf32> to vector<98x64xf32>
    %5 = arith.addf %2, %4 : vector<98x64xf32>
    %cst_5 = arith.constant 0.000000e+00 : f32
    %6 = vector.broadcast %cst_5 : f32 to vector<98x64xf32>
    %7 = arith.maximumf %5, %6 : vector<98x64xf32>
    %c0_6 = arith.constant 0 : index
    %c0_7 = arith.constant 0 : index
    %8 = vector.load %arg4[%c0_6, %c0_7] : memref<98x64xf32, #tpu.memory_space<vmem>>, vector<98x64xf32>
    tpu.vector_store %arg4[%c0_6, %c0_7], %7 {strides = array<i32>} : memref<98x64xf32, #tpu.memory_space<vmem>>, vector<98x64xf32>,
    return
  }
  func.func @transform_0(%arg0: i32) -> (i32, i32) {
    %c0_i32 = arith.constant 0 : i32
    %c0_i32_0 = arith.constant 0 : i32
    return %arg0, %c0_i32 : i32, i32
  }
  func.func @transform_1(%arg0: i32) -> (i32, i32) {
    %c0_i32 = arith.constant 0 : i32
    %c0_i32_0 = arith.constant 0 : i32
    %c0_i32_1 = arith.constant 0 : i32
    return %c0_i32, %c0_i32_0 : i32, i32
  }
  func.func @transform_2(%arg0: i32) -> (i32, i32) {
    %c0_i32 = arith.constant 0 : i32
    %c0_i32_0 = arith.constant 0 : i32
    %c0_i32_1 = arith.constant 0 : i32
    return %c0_i32, %c0_i32_0 : i32, i32
  }
  func.func @transform_3(%arg0: i32) -> (i32, i32) {
    %c0_i32 = arith.constant 0 : i32
    %c0_i32_0 = arith.constant 0 : i32
    return %arg0, %c0_i32 : i32, i32
  }
}

module attributes {stable_mosaic.version = 11 : i64} {
  func.func @_fc_head_kernel(%arg0: i32, %arg1: memref<2x3136xbf16, #tpu.memory_space<vmem>>, %arg2: memref<3136x512xbf16, #tpu.memory_space<vmem>>, %arg3: memref<1x512xf32, #tpu.memory_space<vmem>>, %arg4: memref<512x6xbf16, #tpu.memory_space<vmem>>, %arg5: memref<1x6xf32, #tpu.memory_space<vmem>>, %arg6: memref<2x512xf32, #tpu.memory_space<vmem>>, %arg7: memref<2x6xf32, #tpu.memory_space<vmem>>) attributes {dimension_semantics = [#tpu.dimension_semantics<parallel>], iteration_bounds = array<i64: 1>, scalar_prefetch = 0 : i64, scratch_operands = 0 : i64, tpu.core_type = #tpu.core_type<tc>, window_params = [{transform_indices = @transform_0, window_bounds = array<i64: 2, 3136>}, {pipeline_mode = #tpu.pipeline_mode<synchronous>, transform_indices = @transform_1, window_bounds = array<i64: 3136, 512>}, {pipeline_mode = #tpu.pipeline_mode<synchronous>, transform_indices = @transform_2, window_bounds = array<i64: 1, 512>}, {pipeline_mode = #tpu.pipeline_mode<synchronous>, transform_indices = @transform_3, window_bounds = array<i64: 512, 6>}, {pipeline_mode = #tpu.pipeline_mode<synchronous>, transform_indices = @transform_4, window_bounds = array<i64: 1, 6>}, {transform_indices = @transform_5, window_bounds = array<i64: 2, 512>}, {transform_indices = @transform_6, window_bounds = array<i64: 2, 6>}]} {
    %c0 = arith.constant 0 : index
    %c0_0 = arith.constant 0 : index
    %0 = vector.load %arg1[%c0, %c0_0] : memref<2x3136xbf16, #tpu.memory_space<vmem>>, vector<2x3136xbf16>
    %c0_1 = arith.constant 0 : index
    %c0_2 = arith.constant 0 : index
    %1 = vector.load %arg2[%c0_1, %c0_2] : memref<3136x512xbf16, #tpu.memory_space<vmem>>, vector<3136x512xbf16>
    %cst = arith.constant dense<0.000000e+00> : vector<2x512xf32>
    %2 = tpu.matmul %0, %1, %cst {dimension_numbers = #tpu.dot_dimension_numbers<[1], [0], [0], [1], [0, 0, 1, 1], [], []>} : vector<2x3136xbf16>, vector<3136x512xbf16>, vector<2x512xf32> -> vector<2x512xf32>
    %c0_3 = arith.constant 0 : index
    %c0_4 = arith.constant 0 : index
    %3 = vector.load %arg3[%c0_3, %c0_4] : memref<1x512xf32, #tpu.memory_space<vmem>>, vector<1x512xf32>
    %4 = vector.broadcast %3 : vector<1x512xf32> to vector<2x512xf32>
    %5 = arith.addf %2, %4 : vector<2x512xf32>
    %cst_5 = arith.constant 0.000000e+00 : f32
    %6 = vector.broadcast %cst_5 : f32 to vector<2x512xf32>
    %7 = arith.maximumf %5, %6 : vector<2x512xf32>
    %c0_6 = arith.constant 0 : index
    %c0_7 = arith.constant 0 : index
    %8 = vector.load %arg6[%c0_6, %c0_7] : memref<2x512xf32, #tpu.memory_space<vmem>>, vector<2x512xf32>
    tpu.vector_store %arg6[%c0_6, %c0_7], %7 {strides = array<i32>} : memref<2x512xf32, #tpu.memory_space<vmem>>, vector<2x512xf32>,
    %9 = arith.truncf %7 : vector<2x512xf32> to vector<2x512xbf16>
    %c0_8 = arith.constant 0 : index
    %c0_9 = arith.constant 0 : index
    %10 = vector.load %arg4[%c0_8, %c0_9] : memref<512x6xbf16, #tpu.memory_space<vmem>>, vector<512x6xbf16>
    %cst_10 = arith.constant dense<0.000000e+00> : vector<2x6xf32>
    %11 = tpu.matmul %9, %10, %cst_10 {dimension_numbers = #tpu.dot_dimension_numbers<[1], [0], [0], [1], [0, 0, 1, 1], [], []>} : vector<2x512xbf16>, vector<512x6xbf16>, vector<2x6xf32> -> vector<2x6xf32>
    %c0_11 = arith.constant 0 : index
    %c0_12 = arith.constant 0 : index
    %12 = vector.load %arg5[%c0_11, %c0_12] : memref<1x6xf32, #tpu.memory_space<vmem>>, vector<1x6xf32>
    %13 = vector.broadcast %12 : vector<1x6xf32> to vector<2x6xf32>
    %14 = arith.addf %11, %13 : vector<2x6xf32>
    %c0_13 = arith.constant 0 : index
    %c0_14 = arith.constant 0 : index
    %15 = vector.load %arg7[%c0_13, %c0_14] : memref<2x6xf32, #tpu.memory_space<vmem>>, vector<2x6xf32>
    tpu.vector_store %arg7[%c0_13, %c0_14], %14 {strides = array<i32>} : memref<2x6xf32, #tpu.memory_space<vmem>>, vector<2x6xf32>,
    return
  }
  func.func @transform_0(%arg0: i32) -> (i32, i32) {
    %c0_i32 = arith.constant 0 : i32
    %c0_i32_0 = arith.constant 0 : i32
    return %arg0, %c0_i32 : i32, i32
  }
  func.func @transform_1(%arg0: i32) -> (i32, i32) {
    %c0_i32 = arith.constant 0 : i32
    %c0_i32_0 = arith.constant 0 : i32
    %c0_i32_1 = arith.constant 0 : i32
    return %c0_i32, %c0_i32_0 : i32, i32
  }
  func.func @transform_2(%arg0: i32) -> (i32, i32) {
    %c0_i32 = arith.constant 0 : i32
    %c0_i32_0 = arith.constant 0 : i32
    %c0_i32_1 = arith.constant 0 : i32
    return %c0_i32, %c0_i32_0 : i32, i32
  }
  func.func @transform_3(%arg0: i32) -> (i32, i32) {
    %c0_i32 = arith.constant 0 : i32
    %c0_i32_0 = arith.constant 0 : i32
    %c0_i32_1 = arith.constant 0 : i32
    return %c0_i32, %c0_i32_0 : i32, i32
  }
  func.func @transform_4(%arg0: i32) -> (i32, i32) {
    %c0_i32 = arith.constant 0 : i32
    %c0_i32_0 = arith.constant 0 : i32
    %c0_i32_1 = arith.constant 0 : i32
    return %c0_i32, %c0_i32_0 : i32, i32
  }
  func.func @transform_5(%arg0: i32) -> (i32, i32) {
    %c0_i32 = arith.constant 0 : i32
    %c0_i32_0 = arith.constant 0 : i32
    return %arg0, %c0_i32 : i32, i32
  }
  func.func @transform_6(%arg0: i32) -> (i32, i32) {
    %c0_i32 = arith.constant 0 : i32
    %c0_i32_0 = arith.constant 0 : i32
    return %arg0, %c0_i32 : i32, i32
  }
}

</mosaic_0001>

<bundles_post_ra>
// kernel: network_forward.4
= control target key start
LH: loop header
LB: loop body
LE: loop exit
PB: predicated region body
PF: predicated region fallthrough
CT: control target
= control target key end

     0   :  { %s1242_s12 = smov 0   ;;  %s1555_s0 = inlined_call_operand.vmem [shape: bf16[800,256], index: 0, kind: input, shape index: {}]   ;;  %s1556_s1 = inlined_call_operand.vmem [shape: bf16[256,32], index: 1, kind: input, shape index: {}]   ;;  %s1557_s2 = inlined_call_operand.vmem [shape: f32[1,32], index: 2, kind: input, shape index: {}]   ;;  %s1558_s3 = inlined_call_operand.vmem [shape: f32[800,32], index: 3, kind: output, shape index: {}]  }
   0x1 LB: > { %s1003_s13 = sadd.s32 4294967295, %s1219_s12   ;;  %p1007_p0 = scmp.ge.s32.totalorder %s1219_s12, 1  ;;  %s1219_s12 = sphi %s1242_s12, %s13_s12  }
   0x2   : > { %p139_p1 = scmp.lt.s32.totalorder %s1219_s12, 3 }
   0x4   : > { %p140_p2 = pnand %p1007_p0, %p139_p1 }
   0x5   : > { %v1122_v0 = vld [vmem:[%s1556_s1] sm:$0xff] (!%p140_p2)   ;;  %v1221_v1 = vmov (!%p140_p2), 0   ;;  %s164_s16 = smul.u32 (!%p140_p2), 50, %s1003_s13  ;;  %v1123_v2 = vld [vmem:[%s1556_s1 + $0x8] sm:$0xff] (!%p140_p2)   ;;  %v1124_v3 = vld [vmem:[%s1556_s1 + $0x10] sm:$0xff] (!%p140_p2)   ;;  %vm896_vm0 = vcmask (!%p140_p2), 261120  }
   0x6   : > { %143 = sbr.rel (%p140_p2) target bundleno = 385 (0x181), region = 32  ;;  %613 = vmatprep.subr.bf16.mxu0 (!%p140_p2), %v1221_v1  ;;  %1081 = vmatprep.subr.bf16.mxu1 (!%p140_p2), %v1221_v1  ;;  %v1125_v4 = vld [vmem:[%s1556_s1 + $0x18] sm:$0xff] (!%p140_p2)   ;;  %v1126_v5 = vld [vmem:[%s1556_s1 + $0x20] sm:$0xff] (!%p140_p2)   ;;  %v1127_v7 = vld [vmem:[%s1556_s1 + $0x28] sm:$0xff] (!%p140_p2)  }
   0x7   : > { %614 = vmatpush1.bf16.msra.mxu0 (!%p140_p2), %v1122_v0  ;;  %1097 = vmatpush1.bf16.msra.mxu1 (!%p140_p2), %v1122_v0  ;;  %p165_p3 = scmp.lt.s32.totalorder (!%p140_p2), %s164_s16, 99  ;;  %v1128_v9 = vld [vmem:[%s1556_s1 + $0x30] sm:$0xff] (!%p140_p2)   ;;  %v1129_v10 = vld [vmem:[%s1556_s1 + $0x38] sm:$0xff] (!%p140_p2)   ;;  %v1130_v11 = vld [vmem:[%s1556_s1 + $0x40] sm:$0xff] (!%p140_p2)  }
   0x8   : > { %615 = vmatprep.subr.bf16.mxu0 (!%p140_p2), %v1221_v1  ;;  %1082 = vmatprep.subr.bf16.mxu1 (!%p140_p2), %v1221_v1  ;;  %v1131_v12 = vld [vmem:[%s1556_s1 + $0x48] sm:$0xff] (!%p140_p2)   ;;  %v1132_v13 = vld [vmem:[%s1556_s1 + $0x50] sm:$0xff] (!%p140_p2)   ;;  %v1133_v14 = vld [vmem:[%s1556_s1 + $0x58] sm:$0xff] (!%p140_p2)  }
   0x9   : > { %v1134_v15 = vld [vmem:[%s1556_s1 + $0x60] sm:$0xff] (!%p140_p2)   ;;  %v1135_v16 = vld [vmem:[%s1556_s1 + $0x68] sm:$0xff] (!%p140_p2)   ;;  %v1136_v17 = vld [vmem:[%s1556_s1 + $0x70] sm:$0xff] (!%p140_p2)  }
   0xa   : > { %v1137_v18 = vld [vmem:[%s1556_s1 + $0x78] sm:$0xff] (!%p140_p2)  }
   0xb   : > { %616 = vmatpush1.bf16.msra.mxu0 (!%p140_p2), %v1123_v2  ;;  %1098 = vmatpush1.bf16.msra.mxu1 (!%p140_p2), %v1123_v2 }
   0xc   : > { %617 = vmatprep.subr.bf16.mxu0 (!%p140_p2), %v1221_v1  ;;  %1083 = vmatprep.subr.bf16.mxu1 (!%p140_p2), %v1221_v1 }
   0xd   : > { %s1560_s16 = smov (!%p165_p3, %s164_s16), 99 }
   0xe   : > { %s1080_s23 = sshll.u32 %s1560_s16, 3 }
   0xf   : > { %618 = vmatpush1.bf16.msra.mxu0 %v1124_v3  ;;  %1099 = vmatpush1.bf16.msra.mxu1 %v1124_v3  ;;  %s1281_s28 = scalar_lea.vmem %s1555_s0, %s1080_s23  ;;  %v1393_v3 = vld [vmem:[%s1557_s2] ss:$0 sm:$0xff]  ;;  %s1402_s5 = scalar_lea.vmem %s1558_s3, %s1080_s23 }
  0x10   : > { %619 = vmatprep.subr.bf16.mxu0 %v1221_v1  ;;  %1084 = vmatprep.subr.bf16.mxu1 %v1221_v1  ;;  %v1140_v6 = vld [vmem:[%s1281_s28 + $0x4] ss:$8 sps:$4 sm:$0xff]   ;;  %v1143_v8 = vld [vmem:[%s1281_s28 + $0xd4] ss:$8 sps:$4 sm:$0xff]   ;;  %v1138_v19 = vld [vmem:[%s1281_s28] ss:$8 sps:$4 sm:$0xff]  }
  0x11   : > { %645 = vmatprep.mubr.bf16.mxu0 %v1140_v6  ;;  %749 = vmatprep.mubr.bf16.mxu1 %v1143_v8  ;;  %v1141_v20 = vld [vmem:[%s1281_s28 + $0xd0] ss:$8 sps:$4 sm:$0xff]   ;;  %v1144_v21 = vld [vmem:[%s1281_s28 + $0x14] ss:$8 sps:$4 sm:$0xff]   ;;  %v1147_v22 = vld [vmem:[%s1281_s28 + $0xe4] ss:$8 sps:$4 sm:$0xff]  }
  0x12   : > { %v1146_v23 = vld [vmem:[%s1281_s28 + $0x10] ss:$8 sps:$4 sm:$0xff]   ;;  %v1149_v24 = vld [vmem:[%s1281_s28 + $0xe0] ss:$8 sps:$4 sm:$0xff]   ;;  %v1150_v25 = vld [vmem:[%s1281_s28 + $0x24] ss:$8 sps:$4 sm:$0xff]  }
  0x13   : > { %620 = vmatpush1.bf16.msra.mxu0 %v1125_v4  ;;  %1100 = vmatpush1.bf16.msra.mxu1 %v1125_v4  ;;  %v1153_v26 = vld [vmem:[%s1281_s28 + $0xf4] ss:$8 sps:$4 sm:$0xff]   ;;  %v1152_v27 = vld [vmem:[%s1281_s28 + $0x20] ss:$8 sps:$4 sm:$0xff]   ;;  %v1155_v28 = vld [vmem:[%s1281_s28 + $0xf0] ss:$8 sps:$4 sm:$0xff]  }
  0x14   : > { %621 = vmatprep.subr.bf16.mxu0 %v1221_v1  ;;  %1085 = vmatprep.subr.bf16.mxu1 %v1221_v1  ;;  %v1156_v29 = vld [vmem:[%s1281_s28 + $0x34] ss:$8 sps:$4 sm:$0xff]   ;;  %v1159_v30 = vld [vmem:[%s1281_s28 + $0x104] ss:$8 sps:$4 sm:$0xff]   ;;  %v1158_v31 = vld [vmem:[%s1281_s28 + $0x30] ss:$8 sps:$4 sm:$0xff]  }
  0x15   : > { %v1161_v32 = vld [vmem:[%s1281_s28 + $0x100] ss:$8 sps:$4 sm:$0xff]   ;;  %v1162_v33 = vld [vmem:[%s1281_s28 + $0x44] ss:$8 sps:$4 sm:$0xff]   ;;  %v1165_v34 = vld [vmem:[%s1281_s28 + $0x114] ss:$8 sps:$4 sm:$0xff]  }
  0x16   : > { %v1164_v35 = vld [vmem:[%s1281_s28 + $0x40] ss:$8 sps:$4 sm:$0xff]   ;;  %v1167_v36 = vld [vmem:[%s1281_s28 + $0x110] ss:$8 sps:$4 sm:$0xff]   ;;  %v1168_v37 = vld [vmem:[%s1281_s28 + $0x54] ss:$8 sps:$4 sm:$0xff]  }
  0x17   : > { %622 = vmatpush1.bf16.msra.mxu0 %v1126_v5  ;;  %1101 = vmatpush1.bf16.msra.mxu1 %v1126_v5  ;;  %v1171_v38 = vld [vmem:[%s1281_s28 + $0x124] ss:$8 sps:$4 sm:$0xff]   ;;  %v1170_v39 = vld [vmem:[%s1281_s28 + $0x50] ss:$8 sps:$4 sm:$0xff]   ;;  %v1173_v40 = vld [vmem:[%s1281_s28 + $0x120] ss:$8 sps:$4 sm:$0xff]  }
  0x18   : > { %623 = vmatprep.subr.bf16.mxu0 %v1221_v1  ;;  %1086 = vmatprep.subr.bf16.mxu1 %v1221_v1  ;;  %v1174_v41 = vld [vmem:[%s1281_s28 + $0x64] ss:$8 sps:$4 sm:$0xff]   ;;  %v1177_v42 = vld [vmem:[%s1281_s28 + $0x134] ss:$8 sps:$4 sm:$0xff]   ;;  %v1176_v43 = vld [vmem:[%s1281_s28 + $0x60] ss:$8 sps:$4 sm:$0xff]  }
  0x19   : > { %v1179_v44 = vld [vmem:[%s1281_s28 + $0x130] ss:$8 sps:$4 sm:$0xff]   ;;  %v1180_v45 = vld [vmem:[%s1281_s28 + $0x74] ss:$8 sps:$4 sm:$0xff]   ;;  %v1183_v46 = vld [vmem:[%s1281_s28 + $0x144] ss:$8 sps:$4 sm:$0xff]  }
  0x1a   : > { %v1182_v47 = vld [vmem:[%s1281_s28 + $0x70] ss:$8 sps:$4 sm:$0xff]   ;;  %v1185_v48 = vld [vmem:[%s1281_s28 + $0x140] ss:$8 sps:$4 sm:$0xff]   ;;  %v1186_v49 = vld [vmem:[%s1281_s28 + $0x84] ss:$8 sps:$4 sm:$0xff]  }
  0x1b   : > { %624 = vmatpush1.bf16.msra.mxu0 %v1127_v7  ;;  %1102 = vmatpush1.bf16.msra.mxu1 %v1127_v7  ;;  %v1189_v50 = vld [vmem:[%s1281_s28 + $0x154] ss:$8 sps:$4 sm:$0xff]   ;;  %v1188_v51 = vld [vmem:[%s1281_s28 + $0x80] ss:$8 sps:$4 sm:$0xff]   ;;  %v1191_v52 = vld [vmem:[%s1281_s28 + $0x150] ss:$8 sps:$4 sm:$0xff]  }
  0x1c   : > { %625 = vmatprep.subr.bf16.mxu0 %v1221_v1  ;;  %1087 = vmatprep.subr.bf16.mxu1 %v1221_v1  ;;  %v1192_v53 = vld [vmem:[%s1281_s28 + $0x94] ss:$8 sps:$4 sm:$0xff]   ;;  %v1195_v54 = vld [vmem:[%s1281_s28 + $0x164] ss:$8 sps:$4 sm:$0xff]   ;;  %v1194_v55 = vld [vmem:[%s1281_s28 + $0x90] ss:$8 sps:$4 sm:$0xff]  }
  0x1d   : > { %v1197_v56 = vld [vmem:[%s1281_s28 + $0x160] ss:$8 sps:$4 sm:$0xff]   ;;  %v1198_v57 = vld [vmem:[%s1281_s28 + $0xa4] ss:$8 sps:$4 sm:$0xff]   ;;  %v1201_v58 = vld [vmem:[%s1281_s28 + $0x174] ss:$8 sps:$4 sm:$0xff]  }
  0x1e   : > { %v1200_v59 = vld [vmem:[%s1281_s28 + $0xa0] ss:$8 sps:$4 sm:$0xff]   ;;  %v1203_v60 = vld [vmem:[%s1281_s28 + $0x170] ss:$8 sps:$4 sm:$0xff]   ;;  %v1204_v61 = vld [vmem:[%s1281_s28 + $0xb4] ss:$8 sps:$4 sm:$0xff]  }
  0x1f   : > { %626 = vmatpush1.bf16.msra.mxu0 %v1128_v9  ;;  %1103 = vmatpush1.bf16.msra.mxu1 %v1128_v9  ;;  %v1207_v62 = vld [vmem:[%s1281_s28 + $0x184] ss:$8 sps:$4 sm:$0xff]   ;;  %v1206_v63 = vld [vmem:[%s1281_s28 + $0xb0] ss:$8 sps:$4 sm:$0xff]   ;;  %v1209_v0 = vld [vmem:[%s1281_s28 + $0x180] ss:$8 sps:$4 sm:$0xff]  }
  0x20   : > { %627 = vmatprep.subr.bf16.mxu0 %v1221_v1  ;;  %1088 = vmatprep.subr.bf16.mxu1 %v1221_v1  ;;  %v1212_v2 = vld [vmem:[%s1281_s28 + $0xc0] ss:$8 sps:$4 sm:$0xff]  }
  0x23   : > { %628 = vmatpush1.bf16.msra.mxu0 %v1129_v10  ;;  %1104 = vmatpush1.bf16.msra.mxu1 %v1129_v10 }
  0x24   : > { %629 = vmatprep.subr.bf16.mxu0 %v1221_v1  ;;  %1089 = vmatprep.subr.bf16.mxu1 %v1221_v1 }
  0x27   : > { %630 = vmatpush1.bf16.msra.mxu0 %v1130_v11  ;;  %1105 = vmatpush1.bf16.msra.mxu1 %v1130_v11 }
  0x28   : > { %631 = vmatprep.subr.bf16.mxu0 %v1221_v1  ;;  %1090 = vmatprep.subr.bf16.mxu1 %v1221_v1 }
  0x2b   : > { %632 = vmatpush1.bf16.msra.mxu0 %v1131_v12  ;;  %1106 = vmatpush1.bf16.msra.mxu1 %v1131_v12 }
  0x2c   : > { %633 = vmatprep.subr.bf16.mxu0 %v1221_v1  ;;  %1091 = vmatprep.subr.bf16.mxu1 %v1221_v1 }
  0x2f   : > { %634 = vmatpush1.bf16.msra.mxu0 %v1132_v13  ;;  %1107 = vmatpush1.bf16.msra.mxu1 %v1132_v13 }
  0x30   : > { %635 = vmatprep.subr.bf16.mxu0 %v1221_v1  ;;  %1092 = vmatprep.subr.bf16.mxu1 %v1221_v1 }
  0x33   : > { %636 = vmatpush1.bf16.msra.mxu0 %v1133_v14  ;;  %1108 = vmatpush1.bf16.msra.mxu1 %v1133_v14 }
  0x34   : > { %637 = vmatprep.subr.bf16.mxu0 %v1221_v1  ;;  %1093 = vmatprep.subr.bf16.mxu1 %v1221_v1 }
  0x37   : > { %638 = vmatpush1.bf16.msra.mxu0 %v1134_v15  ;;  %1109 = vmatpush1.bf16.msra.mxu1 %v1134_v15 }
  0x38   : > { %639 = vmatprep.subr.bf16.mxu0 %v1221_v1  ;;  %1094 = vmatprep.subr.bf16.mxu1 %v1221_v1 }
  0x3b   : > { %640 = vmatpush1.bf16.msra.mxu0 %v1135_v16  ;;  %1110 = vmatpush1.bf16.msra.mxu1 %v1135_v16 }
  0x3c   : > { %641 = vmatprep.subr.bf16.mxu0 %v1221_v1  ;;  %1095 = vmatprep.subr.bf16.mxu1 %v1221_v1 }
  0x3f   : > { %642 = vmatpush1.bf16.msra.mxu0 %v1136_v17  ;;  %1111 = vmatpush1.bf16.msra.mxu1 %v1136_v17 }
  0x40   : > { %643 = vmatprep.subr.bf16.mxu0 %v1221_v1  ;;  %1096 = vmatprep.subr.bf16.mxu1 %v1221_v1  ;;  %v1210_v1 = vld [vmem:[%s1281_s28 + $0xc4] ss:$8 sps:$4 sm:$0xff]  }
  0x43   : > { %644 = vmatpush1.bf16.msra.mxu0 %v1137_v18  ;;  %1112 = vmatpush1.bf16.msra.mxu1 %v1137_v18 }
  0x46   : > { %646 = vmatmul.mubr.bf16.vlgmr.msra.gmra.mrb[0].mxu0 %v1138_v19  ;;  %750 = vmatmul.mubr.bf16.vlgmr.msra.gmra.mrb[0].mxu1 %v1141_v20 }
  0x47   : > { %653 = vmatprep.mubr.bf16.mxu0 %v1144_v21  ;;  %757 = vmatprep.mubr.bf16.mxu1 %v1147_v22 }
  0x4e   : > { %654 = vmatmul.mubr.bf16.gmra.mrb[4].mxu0 %v1146_v23  ;;  %758 = vmatmul.mubr.bf16.gmra.mrb[4].mxu1 %v1149_v24 }
  0x4f   : > { %661 = vmatprep.mubr.bf16.mxu0 %v1150_v25  ;;  %765 = vmatprep.mubr.bf16.mxu1 %v1153_v26 }
  0x56   : > { %662 = vmatmul.mubr.bf16.gmra.mrb[8].mxu0 %v1152_v27  ;;  %766 = vmatmul.mubr.bf16.gmra.mrb[8].mxu1 %v1155_v28 }
  0x57   : > { %669 = vmatprep.mubr.bf16.mxu0 %v1156_v29  ;;  %773 = vmatprep.mubr.bf16.mxu1 %v1159_v30 }
  0x5e   : > { %670 = vmatmul.mubr.bf16.gmra.mrb[12].mxu0 %v1158_v31  ;;  %774 = vmatmul.mubr.bf16.gmra.mrb[12].mxu1 %v1161_v32 }
  0x5f   : > { %677 = vmatprep.mubr.bf16.mxu0 %v1162_v33  ;;  %781 = vmatprep.mubr.bf16.mxu1 %v1165_v34 }
  0x66   : > { %678 = vmatmul.mubr.bf16.gmra.mrb[16].mxu0 %v1164_v35  ;;  %782 = vmatmul.mubr.bf16.gmra.mrb[16].mxu1 %v1167_v36 }
  0x67   : > { %685 = vmatprep.mubr.bf16.mxu0 %v1168_v37  ;;  %789 = vmatprep.mubr.bf16.mxu1 %v1171_v38 }
  0x6e   : > { %686 = vmatmul.mubr.bf16.gmra.mrb[20].mxu0 %v1170_v39  ;;  %790 = vmatmul.mubr.bf16.gmra.mrb[20].mxu1 %v1173_v40 }
  0x6f   : > { %693 = vmatprep.mubr.bf16.mxu0 %v1174_v41  ;;  %797 = vmatprep.mubr.bf16.mxu1 %v1177_v42 }
  0x76   : > { %694 = vmatmul.mubr.bf16.gmra.mrb[24].mxu0 %v1176_v43  ;;  %798 = vmatmul.mubr.bf16.gmra.mrb[24].mxu1 %v1179_v44 }
  0x77   : > { %701 = vmatprep.mubr.bf16.mxu0 %v1180_v45  ;;  %805 = vmatprep.mubr.bf16.mxu1 %v1183_v46 }
  0x7e   : > { %702 = vmatmul.mubr.bf16.gmra.mrb[28].mxu0 %v1182_v47  ;;  %806 = vmatmul.mubr.bf16.gmra.mrb[28].mxu1 %v1185_v48 }
  0x7f   : > { %709 = vmatprep.mubr.bf16.mxu0 %v1186_v49  ;;  %813 = vmatprep.mubr.bf16.mxu1 %v1189_v50 }
  0x86   : > { %710 = vmatmul.mubr.bf16.gmra.mrb[32].mxu0 %v1188_v51  ;;  %814 = vmatmul.mubr.bf16.gmra.mrb[32].mxu1 %v1191_v52 }
  0x87   : > { %717 = vmatprep.mubr.bf16.mxu0 %v1192_v53  ;;  %821 = vmatprep.mubr.bf16.mxu1 %v1195_v54 }
  0x8e   : > { %718 = vmatmul.mubr.bf16.gmra.mrb[36].mxu0 %v1194_v55  ;;  %822 = vmatmul.mubr.bf16.gmra.mrb[36].mxu1 %v1197_v56 }
  0x8f   : > { %725 = vmatprep.mubr.bf16.mxu0 %v1198_v57  ;;  %829 = vmatprep.mubr.bf16.mxu1 %v1201_v58 }
  0x96   : > { %726 = vmatmul.mubr.bf16.gmra.mrb[40].mxu0 %v1200_v59  ;;  %830 = vmatmul.mubr.bf16.gmra.mrb[40].mxu1 %v1203_v60 }
  0x97   : > { %733 = vmatprep.mubr.bf16.mxu0 %v1204_v61  ;;  %837 = vmatprep.mubr.bf16.mxu1 %v1207_v62 }
  0x9e   : > { %734 = vmatmul.mubr.bf16.gmra.mrb[44].mxu0 %v1206_v63  ;;  %838 = vmatmul.mubr.bf16.gmra.mrb[44].mxu1 %v1209_v0 }
  0x9f   : > { %741 = vmatprep.mubr.bf16.mxu0 %v1210_v1 }
  0xa6   : > { %742 = vmatmul.mubr.bf16.gmra.mrb[48].mxu0 %v1212_v2 }
 0x119   : > { %v647_v4 = vpop.f32.mrb[0].mxu0  ;;  %v751_v5 = vpop.f32.mrb[0].mxu1 }
 0x11a   : > { %v648_v6 = vadd.f32 %v1393_v3, %v647_v4  ;;  %v649_v7 = vpop.f32.mrb[1].mxu0  ;;  %v752_v8 = vadd.f32 %v1393_v3, %v751_v5  ;;  %v753_v9 = vpop.f32.mrb[1].mxu1 }
 0x11b   : > { %v650_v10 = vpop.f32.mrb[2].mxu0  ;;  %v754_v11 = vpop.f32.mrb[2].mxu1 }
 0x11c   : > { %v846_v12 = vmax.f32 %v648_v6, 0.0  ;;  %v651_v13 = vadd.f32 %v1393_v3, %v650_v10  ;;  %v652_v14 = vpop.f32.mrb[3].mxu0  ;;  %v872_v15 = vmax.f32 %v752_v8, 0.0  ;;  %v755_v16 = vadd.f32 %v1393_v3, %v754_v11  ;;  %v756_v17 = vpop.f32.mrb[3].mxu1 }
 0x11e   : > { %897 = vst.msk [vmem:[%s1402_s5] sm:$0xff] %vm896_vm0, %v846_v12  ;;  %v847_v18 = vmax.f32 %v651_v13, 0.0  ;;  %923 = vst.msk [vmem:[%s1402_s5 + $0xd0] sm:$0xff] %vm896_vm0, %v872_v15  ;;  %v873_v19 = vmax.f32 %v755_v16, 0.0 }
 0x120   : > { %898 = vst.msk [vmem:[%s1402_s5 + $0x8] sm:$0xff] %vm896_vm0, %v847_v18  ;;  %924 = vst.msk [vmem:[%s1402_s5 + $0xd8] sm:$0xff] %vm896_vm0, %v873_v19 }
 0x121   : > { %v655_v20 = vpop.f32.mrb[4].mxu0  ;;  %v759_v21 = vpop.f32.mrb[4].mxu1 }
 0x122   : > { %v656_v22 = vadd.f32 %v1393_v3, %v655_v20  ;;  %v657_v23 = vpop.f32.mrb[5].mxu0  ;;  %v760_v24 = vadd.f32 %v1393_v3, %v759_v21  ;;  %v761_v25 = vpop.f32.mrb[5].mxu1 }
 0x123   : > { %v658_v26 = vpop.f32.mrb[6].mxu0  ;;  %v762_v27 = vpop.f32.mrb[6].mxu1 }
 0x124   : > { %v848_v28 = vmax.f32 %v656_v22, 0.0  ;;  %v659_v29 = vadd.f32 %v1393_v3, %v658_v26  ;;  %v660_v30 = vpop.f32.mrb[7].mxu0  ;;  %v874_v31 = vmax.f32 %v760_v24, 0.0  ;;  %v763_v32 = vadd.f32 %v1393_v3, %v762_v27  ;;  %v764_v33 = vpop.f32.mrb[7].mxu1 }
 0x126   : > { %899 = vst.msk [vmem:[%s1402_s5 + $0x10] sm:$0xff] %vm896_vm0, %v848_v28  ;;  %v849_v34 = vmax.f32 %v659_v29, 0.0  ;;  %925 = vst.msk [vmem:[%s1402_s5 + $0xe0] sm:$0xff] %vm896_vm0, %v874_v31  ;;  %v875_v35 = vmax.f32 %v763_v32, 0.0 }
 0x128   : > { %900 = vst.msk [vmem:[%s1402_s5 + $0x18] sm:$0xff] %vm896_vm0, %v849_v34  ;;  %926 = vst.msk [vmem:[%s1402_s5 + $0xe8] sm:$0xff] %vm896_vm0, %v875_v35 }
 0x129   : > { %v663_v36 = vpop.f32.mrb[8].mxu0  ;;  %v767_v37 = vpop.f32.mrb[8].mxu1 }
 0x12a   : > { %v664_v38 = vadd.f32 %v1393_v3, %v663_v36  ;;  %v665_v39 = vpop.f32.mrb[9].mxu0  ;;  %v768_v40 = vadd.f32 %v1393_v3, %v767_v37  ;;  %v769_v41 = vpop.f32.mrb[9].mxu1 }
 0x12b   : > { %v666_v42 = vpop.f32.mrb[10].mxu0  ;;  %v770_v43 = vpop.f32.mrb[10].mxu1 }
 0x12c   : > { %v850_v44 = vmax.f32 %v664_v38, 0.0  ;;  %v667_v45 = vadd.f32 %v1393_v3, %v666_v42  ;;  %v668_v46 = vpop.f32.mrb[11].mxu0  ;;  %v876_v47 = vmax.f32 %v768_v40, 0.0  ;;  %v771_v48 = vadd.f32 %v1393_v3, %v770_v43  ;;  %v772_v49 = vpop.f32.mrb[11].mxu1 }
 0x12e   : > { %901 = vst.msk [vmem:[%s1402_s5 + $0x20] sm:$0xff] %vm896_vm0, %v850_v44  ;;  %v851_v50 = vmax.f32 %v667_v45, 0.0  ;;  %927 = vst.msk [vmem:[%s1402_s5 + $0xf0] sm:$0xff] %vm896_vm0, %v876_v47  ;;  %v877_v51 = vmax.f32 %v771_v48, 0.0 }
 0x130   : > { %902 = vst.msk [vmem:[%s1402_s5 + $0x28] sm:$0xff] %vm896_vm0, %v851_v50  ;;  %928 = vst.msk [vmem:[%s1402_s5 + $0xf8] sm:$0xff] %vm896_vm0, %v877_v51 }
 0x131   : > { %v671_v52 = vpop.f32.mrb[12].mxu0  ;;  %v775_v53 = vpop.f32.mrb[12].mxu1 }
 0x132   : > { %v672_v54 = vadd.f32 %v1393_v3, %v671_v52  ;;  %v673_v55 = vpop.f32.mrb[13].mxu0  ;;  %v776_v56 = vadd.f32 %v1393_v3, %v775_v53  ;;  %v777_v57 = vpop.f32.mrb[13].mxu1 }
 0x133   : > { %v674_v58 = vpop.f32.mrb[14].mxu0  ;;  %v778_v59 = vpop.f32.mrb[14].mxu1 }
 0x134   : > { %v852_v60 = vmax.f32 %v672_v54, 0.0  ;;  %v675_v61 = vadd.f32 %v1393_v3, %v674_v58  ;;  %v676_v62 = vpop.f32.mrb[15].mxu0  ;;  %v878_v63 = vmax.f32 %v776_v56, 0.0  ;;  %v779_v0 = vadd.f32 %v1393_v3, %v778_v59  ;;  %v780_v1 = vpop.f32.mrb[15].mxu1 }
 0x136   : > { %903 = vst.msk [vmem:[%s1402_s5 + $0x30] sm:$0xff] %vm896_vm0, %v852_v60  ;;  %v853_v2 = vmax.f32 %v675_v61, 0.0  ;;  %929 = vst.msk [vmem:[%s1402_s5 + $0x100] sm:$0xff] %vm896_vm0, %v878_v63  ;;  %v879_v4 = vmax.f32 %v779_v0, 0.0 }
 0x138   : > { %904 = vst.msk [vmem:[%s1402_s5 + $0x38] sm:$0xff] %vm896_vm0, %v853_v2  ;;  %930 = vst.msk [vmem:[%s1402_s5 + $0x108] sm:$0xff] %vm896_vm0, %v879_v4 }
 0x139   : > { %v679_v5 = vpop.f32.mrb[16].mxu0  ;;  %v783_v6 = vpop.f32.mrb[16].mxu1 }
 0x13a   : > { %v680_v7 = vadd.f32 %v1393_v3, %v679_v5  ;;  %v681_v8 = vpop.f32.mrb[17].mxu0  ;;  %v784_v9 = vadd.f32 %v1393_v3, %v783_v6  ;;  %v785_v10 = vpop.f32.mrb[17].mxu1 }
 0x13b   : > { %v682_v11 = vpop.f32.mrb[18].mxu0  ;;  %v786_v12 = vpop.f32.mrb[18].mxu1 }
 0x13c   : > { %v854_v13 = vmax.f32 %v680_v7, 0.0  ;;  %v683_v14 = vadd.f32 %v1393_v3, %v682_v11  ;;  %v684_v15 = vpop.f32.mrb[19].mxu0  ;;  %v880_v16 = vmax.f32 %v784_v9, 0.0  ;;  %v787_v17 = vadd.f32 %v1393_v3, %v786_v12  ;;  %v788_v18 = vpop.f32.mrb[19].mxu1 }
 0x13e   : > { %905 = vst.msk [vmem:[%s1402_s5 + $0x40] sm:$0xff] %vm896_vm0, %v854_v13  ;;  %v855_v19 = vmax.f32 %v683_v14, 0.0  ;;  %931 = vst.msk [vmem:[%s1402_s5 + $0x110] sm:$0xff] %vm896_vm0, %v880_v16  ;;  %v881_v20 = vmax.f32 %v787_v17, 0.0 }
 0x140   : > { %906 = vst.msk [vmem:[%s1402_s5 + $0x48] sm:$0xff] %vm896_vm0, %v855_v19  ;;  %932 = vst.msk [vmem:[%s1402_s5 + $0x118] sm:$0xff] %vm896_vm0, %v881_v20 }
 0x141   : > { %v687_v21 = vpop.f32.mrb[20].mxu0  ;;  %v791_v22 = vpop.f32.mrb[20].mxu1 }
 0x142   : > { %v688_v23 = vadd.f32 %v1393_v3, %v687_v21  ;;  %v689_v24 = vpop.f32.mrb[21].mxu0  ;;  %v792_v25 = vadd.f32 %v1393_v3, %v791_v22  ;;  %v793_v26 = vpop.f32.mrb[21].mxu1 }
 0x143   : > { %v690_v27 = vpop.f32.mrb[22].mxu0  ;;  %v794_v28 = vpop.f32.mrb[22].mxu1 }
 0x144   : > { %v856_v29 = vmax.f32 %v688_v23, 0.0  ;;  %v691_v30 = vadd.f32 %v1393_v3, %v690_v27  ;;  %v692_v31 = vpop.f32.mrb[23].mxu0  ;;  %v882_v32 = vmax.f32 %v792_v25, 0.0  ;;  %v795_v33 = vadd.f32 %v1393_v3, %v794_v28  ;;  %v796_v34 = vpop.f32.mrb[23].mxu1 }
 0x146   : > { %907 = vst.msk [vmem:[%s1402_s5 + $0x50] sm:$0xff] %vm896_vm0, %v856_v29  ;;  %v857_v35 = vmax.f32 %v691_v30, 0.0  ;;  %933 = vst.msk [vmem:[%s1402_s5 + $0x120] sm:$0xff] %vm896_vm0, %v882_v32  ;;  %v883_v36 = vmax.f32 %v795_v33, 0.0 }
 0x148   : > { %908 = vst.msk [vmem:[%s1402_s5 + $0x58] sm:$0xff] %vm896_vm0, %v857_v35  ;;  %934 = vst.msk [vmem:[%s1402_s5 + $0x128] sm:$0xff] %vm896_vm0, %v883_v36 }
 0x149   : > { %v695_v37 = vpop.f32.mrb[24].mxu0  ;;  %v799_v38 = vpop.f32.mrb[24].mxu1 }
 0x14a   : > { %v696_v39 = vadd.f32 %v1393_v3, %v695_v37  ;;  %v697_v40 = vpop.f32.mrb[25].mxu0  ;;  %v800_v41 = vadd.f32 %v1393_v3, %v799_v38  ;;  %v801_v42 = vpop.f32.mrb[25].mxu1 }
 0x14b   : > { %v698_v43 = vpop.f32.mrb[26].mxu0  ;;  %v802_v44 = vpop.f32.mrb[26].mxu1 }
 0x14c   : > { %v858_v45 = vmax.f32 %v696_v39, 0.0  ;;  %v699_v46 = vadd.f32 %v1393_v3, %v698_v43  ;;  %v700_v47 = vpop.f32.mrb[27].mxu0  ;;  %v884_v48 = vmax.f32 %v800_v41, 0.0  ;;  %v803_v49 = vadd.f32 %v1393_v3, %v802_v44  ;;  %v804_v50 = vpop.f32.mrb[27].mxu1 }
 0x14e   : > { %909 = vst.msk [vmem:[%s1402_s5 + $0x60] sm:$0xff] %vm896_vm0, %v858_v45  ;;  %v859_v51 = vmax.f32 %v699_v46, 0.0  ;;  %935 = vst.msk [vmem:[%s1402_s5 + $0x130] sm:$0xff] %vm896_vm0, %v884_v48  ;;  %v885_v52 = vmax.f32 %v803_v49, 0.0 }
 0x150   : > { %910 = vst.msk [vmem:[%s1402_s5 + $0x68] sm:$0xff] %vm896_vm0, %v859_v51  ;;  %936 = vst.msk [vmem:[%s1402_s5 + $0x138] sm:$0xff] %vm896_vm0, %v885_v52 }
 0x151   : > { %v703_v53 = vpop.f32.mrb[28].mxu0  ;;  %v807_v54 = vpop.f32.mrb[28].mxu1 }
 0x152   : > { %v704_v55 = vadd.f32 %v1393_v3, %v703_v53  ;;  %v705_v56 = vpop.f32.mrb[29].mxu0  ;;  %v808_v57 = vadd.f32 %v1393_v3, %v807_v54  ;;  %v809_v58 = vpop.f32.mrb[29].mxu1 }
 0x153   : > { %v706_v59 = vpop.f32.mrb[30].mxu0  ;;  %v810_v60 = vpop.f32.mrb[30].mxu1 }
 0x154   : > { %v860_v61 = vmax.f32 %v704_v55, 0.0  ;;  %v707_v62 = vadd.f32 %v1393_v3, %v706_v59  ;;  %v708_v63 = vpop.f32.mrb[31].mxu0  ;;  %v886_v0 = vmax.f32 %v808_v57, 0.0  ;;  %v811_v1 = vadd.f32 %v1393_v3, %v810_v60  ;;  %v812_v2 = vpop.f32.mrb[31].mxu1 }
 0x156   : > { %911 = vst.msk [vmem:[%s1402_s5 + $0x70] sm:$0xff] %vm896_vm0, %v860_v61  ;;  %v861_v4 = vmax.f32 %v707_v62, 0.0  ;;  %937 = vst.msk [vmem:[%s1402_s5 + $0x140] sm:$0xff] %vm896_vm0, %v886_v0  ;;  %v887_v5 = vmax.f32 %v811_v1, 0.0 }
 0x158   : > { %912 = vst.msk [vmem:[%s1402_s5 + $0x78] sm:$0xff] %vm896_vm0, %v861_v4  ;;  %938 = vst.msk [vmem:[%s1402_s5 + $0x148] sm:$0xff] %vm896_vm0, %v887_v5 }
 0x159   : > { %v711_v6 = vpop.f32.mrb[32].mxu0  ;;  %v815_v7 = vpop.f32.mrb[32].mxu1 }
 0x15a   : > { %v712_v8 = vadd.f32 %v1393_v3, %v711_v6  ;;  %v713_v9 = vpop.f32.mrb[33].mxu0  ;;  %v816_v10 = vadd.f32 %v1393_v3, %v815_v7  ;;  %v817_v11 = vpop.f32.mrb[33].mxu1 }
 0x15b   : > { %v714_v12 = vpop.f32.mrb[34].mxu0  ;;  %v818_v13 = vpop.f32.mrb[34].mxu1 }
 0x15c   : > { %v862_v14 = vmax.f32 %v712_v8, 0.0  ;;  %v715_v15 = vadd.f32 %v1393_v3, %v714_v12  ;;  %v716_v16 = vpop.f32.mrb[35].mxu0  ;;  %v888_v17 = vmax.f32 %v816_v10, 0.0  ;;  %v819_v18 = vadd.f32 %v1393_v3, %v818_v13  ;;  %v820_v19 = vpop.f32.mrb[35].mxu1 }
 0x15e   : > { %913 = vst.msk [vmem:[%s1402_s5 + $0x80] sm:$0xff] %vm896_vm0, %v862_v14  ;;  %v863_v20 = vmax.f32 %v715_v15, 0.0  ;;  %939 = vst.msk [vmem:[%s1402_s5 + $0x150] sm:$0xff] %vm896_vm0, %v888_v17  ;;  %v889_v21 = vmax.f32 %v819_v18, 0.0 }
 0x160   : > { %914 = vst.msk [vmem:[%s1402_s5 + $0x88] sm:$0xff] %vm896_vm0, %v863_v20  ;;  %940 = vst.msk [vmem:[%s1402_s5 + $0x158] sm:$0xff] %vm896_vm0, %v889_v21 }
 0x161   : > { %v719_v22 = vpop.f32.mrb[36].mxu0  ;;  %v823_v23 = vpop.f32.mrb[36].mxu1 }
 0x162   : > { %v720_v24 = vadd.f32 %v1393_v3, %v719_v22  ;;  %v721_v25 = vpop.f32.mrb[37].mxu0  ;;  %v824_v26 = vadd.f32 %v1393_v3, %v823_v23  ;;  %v825_v27 = vpop.f32.mrb[37].mxu1 }
 0x163   : > { %v722_v28 = vpop.f32.mrb[38].mxu0  ;;  %v826_v29 = vpop.f32.mrb[38].mxu1 }
 0x164   : > { %v864_v30 = vmax.f32 %v720_v24, 0.0  ;;  %v723_v31 = vadd.f32 %v1393_v3, %v722_v28  ;;  %v724_v32 = vpop.f32.mrb[39].mxu0  ;;  %v890_v33 = vmax.f32 %v824_v26, 0.0  ;;  %v827_v34 = vadd.f32 %v1393_v3, %v826_v29  ;;  %v828_v35 = vpop.f32.mrb[39].mxu1 }
 0x166   : > { %915 = vst.msk [vmem:[%s1402_s5 + $0x90] sm:$0xff] %vm896_vm0, %v864_v30  ;;  %v865_v36 = vmax.f32 %v723_v31, 0.0  ;;  %941 = vst.msk [vmem:[%s1402_s5 + $0x160] sm:$0xff] %vm896_vm0, %v890_v33  ;;  %v891_v37 = vmax.f32 %v827_v34, 0.0 }
 0x168   : > { %916 = vst.msk [vmem:[%s1402_s5 + $0x98] sm:$0xff] %vm896_vm0, %v865_v36  ;;  %942 = vst.msk [vmem:[%s1402_s5 + $0x168] sm:$0xff] %vm896_vm0, %v891_v37 }
 0x169   : > { %v727_v38 = vpop.f32.mrb[40].mxu0  ;;  %v831_v39 = vpop.f32.mrb[40].mxu1 }
 0x16a   : > { %v728_v40 = vadd.f32 %v1393_v3, %v727_v38  ;;  %v729_v41 = vpop.f32.mrb[41].mxu0  ;;  %v832_v42 = vadd.f32 %v1393_v3, %v831_v39  ;;  %v833_v43 = vpop.f32.mrb[41].mxu1 }
 0x16b   : > { %v730_v44 = vpop.f32.mrb[42].mxu0  ;;  %v834_v45 = vpop.f32.mrb[42].mxu1 }
 0x16c   : > { %v866_v46 = vmax.f32 %v728_v40, 0.0  ;;  %v731_v47 = vadd.f32 %v1393_v3, %v730_v44  ;;  %v732_v48 = vpop.f32.mrb[43].mxu0  ;;  %v892_v49 = vmax.f32 %v832_v42, 0.0  ;;  %v835_v50 = vadd.f32 %v1393_v3, %v834_v45  ;;  %v836_v51 = vpop.f32.mrb[43].mxu1 }
 0x16e   : > { %917 = vst.msk [vmem:[%s1402_s5 + $0xa0] sm:$0xff] %vm896_vm0, %v866_v46  ;;  %v867_v52 = vmax.f32 %v731_v47, 0.0  ;;  %943 = vst.msk [vmem:[%s1402_s5 + $0x170] sm:$0xff] %vm896_vm0, %v892_v49  ;;  %v893_v53 = vmax.f32 %v835_v50, 0.0 }
 0x170   : > { %918 = vst.msk [vmem:[%s1402_s5 + $0xa8] sm:$0xff] %vm896_vm0, %v867_v52  ;;  %944 = vst.msk [vmem:[%s1402_s5 + $0x178] sm:$0xff] %vm896_vm0, %v893_v53 }
 0x171   : > { %v735_v54 = vpop.f32.mrb[44].mxu0  ;;  %v839_v55 = vpop.f32.mrb[44].mxu1 }
 0x172   : > { %v736_v56 = vadd.f32 %v1393_v3, %v735_v54  ;;  %v737_v57 = vpop.f32.mrb[45].mxu0  ;;  %v840_v58 = vadd.f32 %v1393_v3, %v839_v55  ;;  %v841_v59 = vpop.f32.mrb[45].mxu1 }
 0x173   : > { %v738_v60 = vpop.f32.mrb[46].mxu0  ;;  %v842_v61 = vpop.f32.mrb[46].mxu1 }
 0x174   : > { %v868_v62 = vmax.f32 %v736_v56, 0.0  ;;  %v739_v63 = vadd.f32 %v1393_v3, %v738_v60  ;;  %v740_v0 = vpop.f32.mrb[47].mxu0  ;;  %v894_v1 = vmax.f32 %v840_v58, 0.0  ;;  %v843_v2 = vadd.f32 %v1393_v3, %v842_v61  ;;  %v844_v4 = vpop.f32.mrb[47].mxu1 }
 0x176   : > { %919 = vst.msk [vmem:[%s1402_s5 + $0xb0] sm:$0xff] %vm896_vm0, %v868_v62  ;;  %v869_v5 = vmax.f32 %v739_v63, 0.0  ;;  %945 = vst.msk [vmem:[%s1402_s5 + $0x180] sm:$0xff] %vm896_vm0, %v894_v1  ;;  %v895_v6 = vmax.f32 %v843_v2, 0.0 }
 0x178   : > { %920 = vst.msk [vmem:[%s1402_s5 + $0xb8] sm:$0xff] %vm896_vm0, %v869_v5  ;;  %946 = vst.msk [vmem:[%s1402_s5 + $0x188] sm:$0xff] %vm896_vm0, %v895_v6 }
 0x179   : > { %v743_v7 = vpop.f32.mrb[48].mxu0 }
 0x17a   : > { %v744_v8 = vadd.f32 %v1393_v3, %v743_v7  ;;  %v745_v9 = vpop.f32.mrb[49].mxu0 }
 0x17b   : > { %v746_v10 = vpop.f32.mrb[50].mxu0 }
 0x17c   : > { %v870_v11 = vmax.f32 %v744_v8, 0.0  ;;  %v747_v12 = vadd.f32 %v1393_v3, %v746_v10  ;;  %v748_v13 = vpop.f32.mrb[51].mxu0 }
 0x17e   : > { %921 = vst.msk [vmem:[%s1402_s5 + $0xc0] sm:$0xff] %vm896_vm0, %v870_v11  ;;  %v871_v14 = vmax.f32 %v747_v12, 0.0 }
 0x180   : > { %922 = vst.msk [vmem:[%s1402_s5 + $0xc8] sm:$0xff] %vm896_vm0, %v871_v14 }
 0x181 PF: > { %s13_s12 = sadd.s32 1, %s1219_s12  }
 0x182   : > { %p10_p4 = scmp.ge.s32.totalorder %s13_s12, 4  }
 0x184   :  { %12 = sbr.rel (!%p10_p4) target bundleno = 1 (0x1), region = 62 }

// kernel: network_forward.5
= control target key start
LH: loop header
LB: loop body
LE: loop exit
PB: predicated region body
PF: predicated region fallthrough
CT: control target
= control target key end

     0   :  { %vm795_vm0 = vcmask 523264   ;;  %vm816_vm1 = vcmask 517120   ;;  %s1510_s1 = inlined_call_operand.vmem [shape: bf16[512,64], index: 1, kind: input, shape index: {}]   ;;  %s1511_s0 = inlined_call_operand.vmem [shape: bf16[162,512], index: 0, kind: input, shape index: {}]   ;;  %s1512_s2 = inlined_call_operand.vmem [shape: f32[1,64], index: 2, kind: input, shape index: {}]   ;;  %s1513_s3 = inlined_call_operand.vmem [shape: f32[162,64], index: 3, kind: output, shape index: {}]  }
   0x1   :  { %v1063_v0 = vld [vmem:[%s1510_s1 + $0x40] sm:$0xff]   ;;  %v1067_v4 = vld [vmem:[%s1510_s1 + $0x48] sm:$0xff]   ;;  %v1071_v8 = vld [vmem:[%s1510_s1 + $0x50] sm:$0xff]  }
   0x2   :  { %v1064_v1 = vld [vmem:[%s1510_s1 + $0xc0] sm:$0xff]   ;;  %899 = vmatprep.subr.bf16.mxu0 %v1063_v0  ;;  %v1068_v5 = vld [vmem:[%s1510_s1 + $0xc8] sm:$0xff]   ;;  %v1072_v9 = vld [vmem:[%s1510_s1 + $0xd0] sm:$0xff]  }
   0x3   :  { %v1065_v2 = vld [vmem:[%s1510_s1] sm:$0xff]   ;;  %981 = vmatprep.subr.bf16.mxu1 %v1064_v1  ;;  %v1069_v6 = vld [vmem:[%s1510_s1 + $0x8] sm:$0xff]   ;;  %v1073_v10 = vld [vmem:[%s1510_s1 + $0x10] sm:$0xff]  }
   0x4   :  { %v1066_v3 = vld [vmem:[%s1510_s1 + $0x80] sm:$0xff]   ;;  %900 = vmatpush3.bf16.msra.mxu0 %v1065_v2  ;;  %v1070_v7 = vld [vmem:[%s1510_s1 + $0x88] sm:$0xff]   ;;  %v1074_v11 = vld [vmem:[%s1510_s1 + $0x90] sm:$0xff]  }
   0x5   :  { %982 = vmatpush3.bf16.msra.mxu1 %v1066_v3  ;;  %901 = vmatprep.subr.bf16.mxu0 %v1067_v4  ;;  %v1075_v12 = vld [vmem:[%s1510_s1 + $0x58] sm:$0xff]   ;;  %v1079_v16 = vld [vmem:[%s1510_s1 + $0x60] sm:$0xff]   ;;  %v1083_v20 = vld [vmem:[%s1510_s1 + $0x68] sm:$0xff]  }
   0x6   :  { %983 = vmatprep.subr.bf16.mxu1 %v1068_v5  ;;  %v1076_v13 = vld [vmem:[%s1510_s1 + $0xd8] sm:$0xff]   ;;  %v1080_v17 = vld [vmem:[%s1510_s1 + $0xe0] sm:$0xff]   ;;  %v1084_v21 = vld [vmem:[%s1510_s1 + $0xe8] sm:$0xff]  }
   0x7   :  { %v1077_v14 = vld [vmem:[%s1510_s1 + $0x18] sm:$0xff]   ;;  %v1081_v18 = vld [vmem:[%s1510_s1 + $0x20] sm:$0xff]   ;;  %v1085_v22 = vld [vmem:[%s1510_s1 + $0x28] sm:$0xff]  }
   0x8   :  { %902 = vmatpush3.bf16.msra.mxu0 %v1069_v6  ;;  %v1078_v15 = vld [vmem:[%s1510_s1 + $0x98] sm:$0xff]   ;;  %v1082_v19 = vld [vmem:[%s1510_s1 + $0xa0] sm:$0xff]   ;;  %v1086_v23 = vld [vmem:[%s1510_s1 + $0xa8] sm:$0xff]  }
   0x9   :  { %984 = vmatpush3.bf16.msra.mxu1 %v1070_v7  ;;  %903 = vmatprep.subr.bf16.mxu0 %v1071_v8  ;;  %v1087_v24 = vld [vmem:[%s1510_s1 + $0x70] sm:$0xff]   ;;  %v1091_v28 = vld [vmem:[%s1510_s1 + $0x78] sm:$0xff]   ;;  %v55_v6 = vld [vmem:[%s1511_s0 + $0x140] sm:$0x11] }
   0xa   :  { %985 = vmatprep.subr.bf16.mxu1 %v1072_v9  ;;  %v1088_v25 = vld [vmem:[%s1510_s1 + $0xf0] sm:$0xff]   ;;  %v1092_v29 = vld [vmem:[%s1510_s1 + $0xf8] sm:$0xff]   ;;  %v56_v7 = vld [vmem:[%s1511_s0 + $0x148] sm:$0x11] }
   0xb   :  { %v1089_v26 = vld [vmem:[%s1510_s1 + $0x30] sm:$0xff]   ;;  %v1093_v30 = vld [vmem:[%s1510_s1 + $0x38] sm:$0xff]  }
   0xc   :  { %904 = vmatpush3.bf16.msra.mxu0 %v1073_v10  ;;  %v1090_v27 = vld [vmem:[%s1510_s1 + $0xb0] sm:$0xff]   ;;  %v1094_v31 = vld [vmem:[%s1510_s1 + $0xb8] sm:$0xff]   ;;  %v864_v10 = vcombine.high %v55_v6, %v55_v6 }
   0xd   :  { %986 = vmatpush3.bf16.msra.mxu1 %v1074_v11  ;;  %905 = vmatprep.subr.bf16.mxu0 %v1075_v12  ;;  %v1095_v32 = vld [vmem:[%s1511_s0] ss:$16 sps:$4 sm:$0xff]   ;;  %v1097_v33 = vld [vmem:[%s1511_s0 + $0x4] ss:$16 sps:$4 sm:$0xff]   ;;  %v1098_v34 = vld [vmem:[%s1511_s0 + $0x8] ss:$16 sps:$4 sm:$0xff]   ;;  %v866_v11 = vcombine.high %v56_v7, %v56_v7  ;;  %v863_v12 = vcombine.low %v55_v6, %v55_v6 }
   0xe   :  { %987 = vmatprep.subr.bf16.mxu1 %v1076_v13  ;;  %v1100_v35 = vld [vmem:[%s1511_s0 + $0xc] ss:$16 sps:$4 sm:$0xff]   ;;  %566 = vmatprep.mubr.bf16.mxu0 %v1097_v33  ;;  %v1101_v36 = vld [vmem:[%s1511_s0 + $0x24] ss:$16 sps:$4 sm:$0xff]   ;;  %v1105_v38 = vld [vmem:[%s1511_s0 + $0x20] ss:$16 sps:$4 sm:$0xff]   ;;  %v865_v13 = vcombine.low %v56_v7, %v56_v7 }
   0xf   :  { %686 = vmatprep.mubr.bf16.mxu1 %v1100_v35  ;;  %v1103_v37 = vld [vmem:[%s1511_s0 + $0x2c] ss:$16 sps:$4 sm:$0xff]   ;;  %v1106_v39 = vld [vmem:[%s1511_s0 + $0x28] ss:$16 sps:$4 sm:$0xff]   ;;  %v1107_v40 = vld [vmem:[%s1511_s0 + $0x44] ss:$16 sps:$4 sm:$0xff]  }
  0x10   :  { %906 = vmatpush3.bf16.msra.mxu0 %v1077_v14  ;;  %v1109_v41 = vld [vmem:[%s1511_s0 + $0x4c] ss:$16 sps:$4 sm:$0xff]   ;;  %v1111_v42 = vld [vmem:[%s1511_s0 + $0x40] ss:$16 sps:$4 sm:$0xff]   ;;  %v1112_v43 = vld [vmem:[%s1511_s0 + $0x48] ss:$16 sps:$4 sm:$0xff]  }
  0x11   :  { %988 = vmatpush3.bf16.msra.mxu1 %v1078_v15  ;;  %907 = vmatprep.subr.bf16.mxu0 %v1079_v16  ;;  %v1113_v44 = vld [vmem:[%s1511_s0 + $0x64] ss:$16 sps:$4 sm:$0xff]   ;;  %v1115_v45 = vld [vmem:[%s1511_s0 + $0x6c] ss:$16 sps:$4 sm:$0xff]   ;;  %v1117_v46 = vld [vmem:[%s1511_s0 + $0x60] ss:$16 sps:$4 sm:$0xff]  }
  0x12   :  { %989 = vmatprep.subr.bf16.mxu1 %v1080_v17  ;;  %v1118_v47 = vld [vmem:[%s1511_s0 + $0x68] ss:$16 sps:$4 sm:$0xff]   ;;  %v1119_v48 = vld [vmem:[%s1511_s0 + $0x84] ss:$16 sps:$4 sm:$0xff]   ;;  %v1121_v49 = vld [vmem:[%s1511_s0 + $0x8c] ss:$16 sps:$4 sm:$0xff]  }
  0x13   :  { %v1123_v50 = vld [vmem:[%s1511_s0 + $0x80] ss:$16 sps:$4 sm:$0xff]   ;;  %v1124_v51 = vld [vmem:[%s1511_s0 + $0x88] ss:$16 sps:$4 sm:$0xff]   ;;  %v1125_v52 = vld [vmem:[%s1511_s0 + $0xa4] ss:$16 sps:$4 sm:$0xff]  }
  0x14   :  { %908 = vmatpush3.bf16.msra.mxu0 %v1081_v18  ;;  %v1127_v53 = vld [vmem:[%s1511_s0 + $0xac] ss:$16 sps:$4 sm:$0xff]   ;;  %v1129_v54 = vld [vmem:[%s1511_s0 + $0xa0] ss:$16 sps:$4 sm:$0xff]   ;;  %v1130_v55 = vld [vmem:[%s1511_s0 + $0xa8] ss:$16 sps:$4 sm:$0xff]  }
  0x15   :  { %990 = vmatpush3.bf16.msra.mxu1 %v1082_v19  ;;  %909 = vmatprep.subr.bf16.mxu0 %v1083_v20  ;;  %v1131_v56 = vld [vmem:[%s1511_s0 + $0xc4] ss:$16 sps:$4 sm:$0xff]   ;;  %v1133_v57 = vld [vmem:[%s1511_s0 + $0xcc] ss:$16 sps:$4 sm:$0xff]   ;;  %v1135_v58 = vld [vmem:[%s1511_s0 + $0xc0] ss:$16 sps:$4 sm:$0xff]  }
  0x16   :  { %991 = vmatprep.subr.bf16.mxu1 %v1084_v21  ;;  %v1136_v59 = vld [vmem:[%s1511_s0 + $0xc8] ss:$16 sps:$4 sm:$0xff]   ;;  %v1137_v60 = vld [vmem:[%s1511_s0 + $0xe4] ss:$16 sps:$4 sm:$0xff]   ;;  %v1139_v61 = vld [vmem:[%s1511_s0 + $0xec] ss:$16 sps:$4 sm:$0xff]  }
  0x17   :  { %v1141_v62 = vld [vmem:[%s1511_s0 + $0xe0] ss:$16 sps:$4 sm:$0xff]   ;;  %v1142_v63 = vld [vmem:[%s1511_s0 + $0xe8] ss:$16 sps:$4 sm:$0xff]   ;;  %v1143_v0 = vld [vmem:[%s1511_s0 + $0x104] ss:$16 sps:$4 sm:$0xff]  }
  0x18   :  { %910 = vmatpush3.bf16.msra.mxu0 %v1085_v22  ;;  %v1145_v1 = vld [vmem:[%s1511_s0 + $0x10c] ss:$16 sps:$4 sm:$0xff]   ;;  %v1147_v2 = vld [vmem:[%s1511_s0 + $0x100] ss:$16 sps:$4 sm:$0xff]   ;;  %v1148_v3 = vld [vmem:[%s1511_s0 + $0x108] ss:$16 sps:$4 sm:$0xff]  }
  0x19   :  { %992 = vmatpush3.bf16.msra.mxu1 %v1086_v23  ;;  %911 = vmatprep.subr.bf16.mxu0 %v1087_v24  ;;  %v1149_v4 = vld [vmem:[%s1511_s0 + $0x124] ss:$16 sps:$4 sm:$0xff]   ;;  %v1151_v5 = vld [vmem:[%s1511_s0 + $0x12c] ss:$16 sps:$4 sm:$0xff]   ;;  %v1153_v8 = vld [vmem:[%s1511_s0 + $0x120] ss:$16 sps:$4 sm:$0xff]  }
  0x1a   :  { %993 = vmatprep.subr.bf16.mxu1 %v1088_v25  ;;  %v1154_v9 = vld [vmem:[%s1511_s0 + $0x128] ss:$16 sps:$4 sm:$0xff]   ;;  %v1404_v16 = vld [vmem:[%s1512_s2] ss:$0 sm:$0xff] }
  0x1c   :  { %912 = vmatpush3.bf16.msra.mxu0 %v1089_v26 }
  0x1d   :  { %994 = vmatpush3.bf16.msra.mxu1 %v1090_v27  ;;  %913 = vmatprep.subr.bf16.mxu0 %v1091_v28 }
  0x1e   :  { %995 = vmatprep.subr.bf16.mxu1 %v1092_v29 }
  0x20   :  { %914 = vmatpush3.bf16.msra.mxu0 %v1093_v30 }
  0x21   :  { %996 = vmatpush3.bf16.msra.mxu1 %v1094_v31 }
  0x23   :  { %567 = vmatmul.mubr.bf16.vlgmr.msra.gmra.mrb[0].mxu0 %v1095_v32 }
  0x24   :  { %687 = vmatmul.mubr.bf16.vlgmr.msra.gmra.mrb[0].mxu1 %v1098_v34  ;;  %574 = vmatprep.mubr.bf16.mxu0 %v1101_v36 }
  0x25   :  { %694 = vmatprep.mubr.bf16.mxu1 %v1103_v37 }
  0x2b   :  { %575 = vmatmul.mubr.bf16.gmra.mrb[4].mxu0 %v1105_v38 }
  0x2c   :  { %695 = vmatmul.mubr.bf16.gmra.mrb[4].mxu1 %v1106_v39  ;;  %582 = vmatprep.mubr.bf16.mxu0 %v1107_v40 }
  0x2d   :  { %702 = vmatprep.mubr.bf16.mxu1 %v1109_v41 }
  0x33   :  { %583 = vmatmul.mubr.bf16.gmra.mrb[8].mxu0 %v1111_v42 }
  0x34   :  { %703 = vmatmul.mubr.bf16.gmra.mrb[8].mxu1 %v1112_v43  ;;  %590 = vmatprep.mubr.bf16.mxu0 %v1113_v44 }
  0x35   :  { %710 = vmatprep.mubr.bf16.mxu1 %v1115_v45 }
  0x3b   :  { %591 = vmatmul.mubr.bf16.gmra.mrb[12].mxu0 %v1117_v46 }
  0x3c   :  { %711 = vmatmul.mubr.bf16.gmra.mrb[12].mxu1 %v1118_v47  ;;  %598 = vmatprep.mubr.bf16.mxu0 %v1119_v48 }
  0x3d   :  { %718 = vmatprep.mubr.bf16.mxu1 %v1121_v49 }
  0x43   :  { %599 = vmatmul.mubr.bf16.gmra.mrb[16].mxu0 %v1123_v50 }
  0x44   :  { %719 = vmatmul.mubr.bf16.gmra.mrb[16].mxu1 %v1124_v51  ;;  %606 = vmatprep.mubr.bf16.mxu0 %v1125_v52 }
  0x45   :  { %726 = vmatprep.mubr.bf16.mxu1 %v1127_v53 }
  0x4b   :  { %607 = vmatmul.mubr.bf16.gmra.mrb[20].mxu0 %v1129_v54 }
  0x4c   :  { %727 = vmatmul.mubr.bf16.gmra.mrb[20].mxu1 %v1130_v55  ;;  %614 = vmatprep.mubr.bf16.mxu0 %v1131_v56 }
  0x4d   :  { %734 = vmatprep.mubr.bf16.mxu1 %v1133_v57 }
  0x53   :  { %615 = vmatmul.mubr.bf16.gmra.mrb[24].mxu0 %v1135_v58 }
  0x54   :  { %735 = vmatmul.mubr.bf16.gmra.mrb[24].mxu1 %v1136_v59  ;;  %622 = vmatprep.mubr.bf16.mxu0 %v1137_v60 }
  0x55   :  { %742 = vmatprep.mubr.bf16.mxu1 %v1139_v61 }
  0x5b   :  { %623 = vmatmul.mubr.bf16.gmra.mrb[28].mxu0 %v1141_v62 }
  0x5c   :  { %743 = vmatmul.mubr.bf16.gmra.mrb[28].mxu1 %v1142_v63  ;;  %630 = vmatprep.mubr.bf16.mxu0 %v1143_v0 }
  0x5d   :  { %750 = vmatprep.mubr.bf16.mxu1 %v1145_v1 }
  0x63   :  { %631 = vmatmul.mubr.bf16.gmra.mrb[32].mxu0 %v1147_v2 }
  0x64   :  { %751 = vmatmul.mubr.bf16.gmra.mrb[32].mxu1 %v1148_v3  ;;  %638 = vmatprep.mubr.bf16.mxu0 %v1149_v4 }
  0x65   :  { %758 = vmatprep.mubr.bf16.mxu1 %v1151_v5 }
  0x6b   :  { %639 = vmatmul.mubr.bf16.gmra.mrb[36].mxu0 %v1153_v8 }
  0x6c   :  { %759 = vmatmul.mubr.bf16.gmra.mrb[36].mxu1 %v1154_v9  ;;  %646 = vmatprep.mubr.bf16.mxu0 %v864_v10 }
  0x6d   :  { %766 = vmatprep.mubr.bf16.mxu1 %v866_v11 }
  0x73   :  { %647 = vmatmul.mubr.bf16.gmra.mrb[40].mxu0 %v863_v12 }
  0x74   :  { %767 = vmatmul.mubr.bf16.gmra.mrb[40].mxu1 %v865_v13 }
  0xf6   :  { %v915_v14 = vpop.f32.mrb[0].mxu0 }
  0xf7   :  { %v997_v15 = vpop.f32.mrb[0].mxu1  ;;  %v916_v17 = vpop.f32.mrb[1].mxu0 }
  0xf8   :  { %v917_v18 = vadd.f32 %v916_v17, %v915_v14  ;;  %v998_v19 = vpop.f32.mrb[1].mxu1  ;;  %v918_v20 = vpop.f32.mrb[2].mxu0 }
  0xf9   :  { %v999_v21 = vadd.f32 %v998_v19, %v997_v15  ;;  %v1000_v22 = vpop.f32.mrb[2].mxu1  ;;  %v919_v23 = vpop.f32.mrb[3].mxu0 }
  0xfa   :  { %v569_v24 = vadd.f32 %v917_v18, %v1404_v16  ;;  %v920_v25 = vadd.f32 %v919_v23, %v918_v20  ;;  %v1001_v26 = vpop.f32.mrb[3].mxu1 }
  0xfb   :  { %v1002_v27 = vadd.f32 %v1001_v26, %v1000_v22 }
  0xfc   :  { %v689_v28 = vadd.f32 %v999_v21, %v569_v24  ;;  %v572_v29 = vadd.f32 %v920_v25, %v1404_v16 }
  0xfe   :  { %v774_v30 = vmax.f32 %v689_v28, 0.0  ;;  %v692_v31 = vadd.f32 %v1002_v27, %v572_v29  ;;  %v921_v32 = vpop.f32.mrb[4].mxu0 }
  0xff   :  { %v1003_v33 = vpop.f32.mrb[4].mxu1  ;;  %v922_v34 = vpop.f32.mrb[5].mxu0 }
 0x100   :  { %796 = vst.msk [vmem:[%s1513_s3] sm:$0xff] %vm795_vm0, %v774_v30  ;;  %v775_v35 = vmax.f32 %v692_v31, 0.0  ;;  %v923_v36 = vadd.f32 %v922_v34, %v921_v32  ;;  %v1004_v37 = vpop.f32.mrb[5].mxu1  ;;  %v924_v38 = vpop.f32.mrb[6].mxu0 }
 0x101   :  { %v1005_v39 = vadd.f32 %v1004_v37, %v1003_v33  ;;  %v1006_v40 = vpop.f32.mrb[6].mxu1  ;;  %v925_v41 = vpop.f32.mrb[7].mxu0 }
 0x102   :  { %797 = vst.msk [vmem:[%s1513_s3 + $0x8] sm:$0xff] %vm795_vm0, %v775_v35  ;;  %v577_v42 = vadd.f32 %v923_v36, %v1404_v16  ;;  %v926_v43 = vadd.f32 %v925_v41, %v924_v38  ;;  %v1007_v44 = vpop.f32.mrb[7].mxu1 }
 0x103   :  { %v1008_v45 = vadd.f32 %v1007_v44, %v1006_v40 }
 0x104   :  { %v697_v46 = vadd.f32 %v1005_v39, %v577_v42  ;;  %v580_v47 = vadd.f32 %v926_v43, %v1404_v16 }
 0x106   :  { %v776_v48 = vmax.f32 %v697_v46, 0.0  ;;  %v700_v49 = vadd.f32 %v1008_v45, %v580_v47  ;;  %v927_v50 = vpop.f32.mrb[8].mxu0 }
 0x107   :  { %v1009_v51 = vpop.f32.mrb[8].mxu1  ;;  %v928_v52 = vpop.f32.mrb[9].mxu0 }
 0x108   :  { %798 = vst.msk [vmem:[%s1513_s3 + $0x10] sm:$0xff] %vm795_vm0, %v776_v48  ;;  %v777_v53 = vmax.f32 %v700_v49, 0.0  ;;  %v929_v54 = vadd.f32 %v928_v52, %v927_v50  ;;  %v1010_v55 = vpop.f32.mrb[9].mxu1  ;;  %v930_v56 = vpop.f32.mrb[10].mxu0 }
 0x109   :  { %v1011_v57 = vadd.f32 %v1010_v55, %v1009_v51  ;;  %v1012_v58 = vpop.f32.mrb[10].mxu1  ;;  %v931_v59 = vpop.f32.mrb[11].mxu0 }
 0x10a   :  { %799 = vst.msk [vmem:[%s1513_s3 + $0x18] sm:$0xff] %vm795_vm0, %v777_v53  ;;  %v585_v60 = vadd.f32 %v929_v54, %v1404_v16  ;;  %v932_v61 = vadd.f32 %v931_v59, %v930_v56  ;;  %v1013_v62 = vpop.f32.mrb[11].mxu1 }
 0x10b   :  { %v1014_v63 = vadd.f32 %v1013_v62, %v1012_v58 }
 0x10c   :  { %v705_v0 = vadd.f32 %v1011_v57, %v585_v60  ;;  %v588_v1 = vadd.f32 %v932_v61, %v1404_v16 }
 0x10e   :  { %v778_v2 = vmax.f32 %v705_v0, 0.0  ;;  %v708_v3 = vadd.f32 %v1014_v63, %v588_v1  ;;  %v933_v4 = vpop.f32.mrb[12].mxu0 }
 0x10f   :  { %v1015_v5 = vpop.f32.mrb[12].mxu1  ;;  %v934_v6 = vpop.f32.mrb[13].mxu0 }
 0x110   :  { %800 = vst.msk [vmem:[%s1513_s3 + $0x20] sm:$0xff] %vm795_vm0, %v778_v2  ;;  %v779_v7 = vmax.f32 %v708_v3, 0.0  ;;  %v935_v8 = vadd.f32 %v934_v6, %v933_v4  ;;  %v1016_v9 = vpop.f32.mrb[13].mxu1  ;;  %v936_v10 = vpop.f32.mrb[14].mxu0 }
 0x111   :  { %v1017_v11 = vadd.f32 %v1016_v9, %v1015_v5  ;;  %v1018_v12 = vpop.f32.mrb[14].mxu1  ;;  %v937_v13 = vpop.f32.mrb[15].mxu0 }
 0x112   :  { %801 = vst.msk [vmem:[%s1513_s3 + $0x28] sm:$0xff] %vm795_vm0, %v779_v7  ;;  %v593_v14 = vadd.f32 %v935_v8, %v1404_v16  ;;  %v938_v15 = vadd.f32 %v937_v13, %v936_v10  ;;  %v1019_v17 = vpop.f32.mrb[15].mxu1 }
 0x113   :  { %v1020_v18 = vadd.f32 %v1019_v17, %v1018_v12 }
 0x114   :  { %v713_v19 = vadd.f32 %v1017_v11, %v593_v14  ;;  %v596_v20 = vadd.f32 %v938_v15, %v1404_v16 }
 0x116   :  { %v780_v21 = vmax.f32 %v713_v19, 0.0  ;;  %v716_v22 = vadd.f32 %v1020_v18, %v596_v20  ;;  %v939_v23 = vpop.f32.mrb[16].mxu0 }
 0x117   :  { %v1021_v24 = vpop.f32.mrb[16].mxu1  ;;  %v940_v25 = vpop.f32.mrb[17].mxu0 }
 0x118   :  { %802 = vst.msk [vmem:[%s1513_s3 + $0x30] sm:$0xff] %vm795_vm0, %v780_v21  ;;  %v781_v26 = vmax.f32 %v716_v22, 0.0  ;;  %v941_v27 = vadd.f32 %v940_v25, %v939_v23  ;;  %v1022_v28 = vpop.f32.mrb[17].mxu1  ;;  %v942_v29 = vpop.f32.mrb[18].mxu0 }
 0x119   :  { %v1023_v30 = vadd.f32 %v1022_v28, %v1021_v24  ;;  %v1024_v31 = vpop.f32.mrb[18].mxu1  ;;  %v943_v32 = vpop.f32.mrb[19].mxu0 }
 0x11a   :  { %803 = vst.msk [vmem:[%s1513_s3 + $0x38] sm:$0xff] %vm795_vm0, %v781_v26  ;;  %v601_v33 = vadd.f32 %v941_v27, %v1404_v16  ;;  %v944_v34 = vadd.f32 %v943_v32, %v942_v29  ;;  %v1025_v35 = vpop.f32.mrb[19].mxu1 }
 0x11b   :  { %v1026_v36 = vadd.f32 %v1025_v35, %v1024_v31 }
 0x11c   :  { %v721_v37 = vadd.f32 %v1023_v30, %v601_v33  ;;  %v604_v38 = vadd.f32 %v944_v34, %v1404_v16 }
 0x11e   :  { %v782_v39 = vmax.f32 %v721_v37, 0.0  ;;  %v724_v40 = vadd.f32 %v1026_v36, %v604_v38  ;;  %v945_v41 = vpop.f32.mrb[20].mxu0 }
 0x11f   :  { %v1027_v42 = vpop.f32.mrb[20].mxu1  ;;  %v946_v43 = vpop.f32.mrb[21].mxu0 }
 0x120   :  { %804 = vst.msk [vmem:[%s1513_s3 + $0x40] sm:$0xff] %vm795_vm0, %v782_v39  ;;  %v783_v44 = vmax.f32 %v724_v40, 0.0  ;;  %v947_v45 = vadd.f32 %v946_v43, %v945_v41  ;;  %v1028_v46 = vpop.f32.mrb[21].mxu1  ;;  %v948_v47 = vpop.f32.mrb[22].mxu0 }
 0x121   :  { %v1029_v48 = vadd.f32 %v1028_v46, %v1027_v42  ;;  %v1030_v49 = vpop.f32.mrb[22].mxu1  ;;  %v949_v50 = vpop.f32.mrb[23].mxu0 }
 0x122   :  { %805 = vst.msk [vmem:[%s1513_s3 + $0x48] sm:$0xff] %vm795_vm0, %v783_v44  ;;  %v609_v51 = vadd.f32 %v947_v45, %v1404_v16  ;;  %v950_v52 = vadd.f32 %v949_v50, %v948_v47  ;;  %v1031_v53 = vpop.f32.mrb[23].mxu1 }
 0x123   :  { %v1032_v54 = vadd.f32 %v1031_v53, %v1030_v49 }
 0x124   :  { %v729_v55 = vadd.f32 %v1029_v48, %v609_v51  ;;  %v612_v56 = vadd.f32 %v950_v52, %v1404_v16 }
 0x126   :  { %v784_v57 = vmax.f32 %v729_v55, 0.0  ;;  %v732_v58 = vadd.f32 %v1032_v54, %v612_v56  ;;  %v951_v59 = vpop.f32.mrb[24].mxu0 }
 0x127   :  { %v1033_v60 = vpop.f32.mrb[24].mxu1  ;;  %v952_v61 = vpop.f32.mrb[25].mxu0 }
 0x128   :  { %806 = vst.msk [vmem:[%s1513_s3 + $0x50] sm:$0xff] %vm795_vm0, %v784_v57  ;;  %v785_v62 = vmax.f32 %v732_v58, 0.0  ;;  %v953_v63 = vadd.f32 %v952_v61, %v951_v59  ;;  %v1034_v0 = vpop.f32.mrb[25].mxu1  ;;  %v954_v1 = vpop.f32.mrb[26].mxu0 }
 0x129   :  { %v1035_v2 = vadd.f32 %v1034_v0, %v1033_v60  ;;  %v1036_v3 = vpop.f32.mrb[26].mxu1  ;;  %v955_v4 = vpop.f32.mrb[27].mxu0 }
 0x12a   :  { %807 = vst.msk [vmem:[%s1513_s3 + $0x58] sm:$0xff] %vm795_vm0, %v785_v62  ;;  %v617_v5 = vadd.f32 %v953_v63, %v1404_v16  ;;  %v956_v6 = vadd.f32 %v955_v4, %v954_v1  ;;  %v1037_v7 = vpop.f32.mrb[27].mxu1 }
 0x12b   :  { %v1038_v8 = vadd.f32 %v1037_v7, %v1036_v3 }
 0x12c   :  { %v737_v9 = vadd.f32 %v1035_v2, %v617_v5  ;;  %v620_v10 = vadd.f32 %v956_v6, %v1404_v16 }
 0x12e   :  { %v786_v11 = vmax.f32 %v737_v9, 0.0  ;;  %v740_v12 = vadd.f32 %v1038_v8, %v620_v10  ;;  %v957_v13 = vpop.f32.mrb[28].mxu0 }
 0x12f   :  { %v1039_v14 = vpop.f32.mrb[28].mxu1  ;;  %v958_v15 = vpop.f32.mrb[29].mxu0 }
 0x130   :  { %808 = vst.msk [vmem:[%s1513_s3 + $0x60] sm:$0xff] %vm795_vm0, %v786_v11  ;;  %v787_v17 = vmax.f32 %v740_v12, 0.0  ;;  %v959_v18 = vadd.f32 %v958_v15, %v957_v13  ;;  %v1040_v19 = vpop.f32.mrb[29].mxu1  ;;  %v960_v20 = vpop.f32.mrb[30].mxu0 }
 0x131   :  { %v1041_v21 = vadd.f32 %v1040_v19, %v1039_v14  ;;  %v1042_v22 = vpop.f32.mrb[30].mxu1  ;;  %v961_v23 = vpop.f32.mrb[31].mxu0 }
 0x132   :  { %809 = vst.msk [vmem:[%s1513_s3 + $0x68] sm:$0xff] %vm795_vm0, %v787_v17  ;;  %v625_v24 = vadd.f32 %v959_v18, %v1404_v16  ;;  %v962_v25 = vadd.f32 %v961_v23, %v960_v20  ;;  %v1043_v26 = vpop.f32.mrb[31].mxu1 }
 0x133   :  { %v1044_v27 = vadd.f32 %v1043_v26, %v1042_v22 }
 0x134   :  { %v745_v28 = vadd.f32 %v1041_v21, %v625_v24  ;;  %v628_v29 = vadd.f32 %v962_v25, %v1404_v16 }
 0x136   :  { %v788_v30 = vmax.f32 %v745_v28, 0.0  ;;  %v748_v31 = vadd.f32 %v1044_v27, %v628_v29  ;;  %v963_v32 = vpop.f32.mrb[32].mxu0 }
 0x137   :  { %v1045_v33 = vpop.f32.mrb[32].mxu1  ;;  %v964_v34 = vpop.f32.mrb[33].mxu0 }
 0x138   :  { %810 = vst.msk [vmem:[%s1513_s3 + $0x70] sm:$0xff] %vm795_vm0, %v788_v30  ;;  %v789_v35 = vmax.f32 %v748_v31, 0.0  ;;  %v965_v36 = vadd.f32 %v964_v34, %v963_v32  ;;  %v1046_v37 = vpop.f32.mrb[33].mxu1  ;;  %v966_v38 = vpop.f32.mrb[34].mxu0 }
 0x139   :  { %v1047_v39 = vadd.f32 %v1046_v37, %v1045_v33  ;;  %v1048_v40 = vpop.f32.mrb[34].mxu1  ;;  %v967_v41 = vpop.f32.mrb[35].mxu0 }
 0x13a   :  { %811 = vst.msk [vmem:[%s1513_s3 + $0x78] sm:$0xff] %vm795_vm0, %v789_v35  ;;  %v633_v42 = vadd.f32 %v965_v36, %v1404_v16  ;;  %v968_v43 = vadd.f32 %v967_v41, %v966_v38  ;;  %v1049_v44 = vpop.f32.mrb[35].mxu1 }
 0x13b   :  { %v1050_v45 = vadd.f32 %v1049_v44, %v1048_v40 }
 0x13c   :  { %v753_v46 = vadd.f32 %v1047_v39, %v633_v42  ;;  %v636_v47 = vadd.f32 %v968_v43, %v1404_v16 }
 0x13e   :  { %v790_v48 = vmax.f32 %v753_v46, 0.0  ;;  %v756_v49 = vadd.f32 %v1050_v45, %v636_v47  ;;  %v969_v50 = vpop.f32.mrb[36].mxu0 }
 0x13f   :  { %v1051_v51 = vpop.f32.mrb[36].mxu1  ;;  %v970_v52 = vpop.f32.mrb[37].mxu0 }
 0x140   :  { %812 = vst.msk [vmem:[%s1513_s3 + $0x80] sm:$0xff] %vm795_vm0, %v790_v48  ;;  %v791_v53 = vmax.f32 %v756_v49, 0.0  ;;  %v971_v54 = vadd.f32 %v970_v52, %v969_v50  ;;  %v1052_v55 = vpop.f32.mrb[37].mxu1  ;;  %v972_v56 = vpop.f32.mrb[38].mxu0 }
 0x141   :  { %v1053_v57 = vadd.f32 %v1052_v55, %v1051_v51  ;;  %v1054_v58 = vpop.f32.mrb[38].mxu1  ;;  %v973_v59 = vpop.f32.mrb[39].mxu0 }
 0x142   :  { %813 = vst.msk [vmem:[%s1513_s3 + $0x88] sm:$0xff] %vm795_vm0, %v791_v53  ;;  %v641_v60 = vadd.f32 %v971_v54, %v1404_v16  ;;  %v974_v61 = vadd.f32 %v973_v59, %v972_v56  ;;  %v1055_v62 = vpop.f32.mrb[39].mxu1 }
 0x143   :  { %v1056_v63 = vadd.f32 %v1055_v62, %v1054_v58 }
 0x144   :  { %v761_v0 = vadd.f32 %v1053_v57, %v641_v60  ;;  %v644_v1 = vadd.f32 %v974_v61, %v1404_v16 }
 0x146   :  { %v792_v2 = vmax.f32 %v761_v0, 0.0  ;;  %v764_v3 = vadd.f32 %v1056_v63, %v644_v1  ;;  %v975_v4 = vpop.f32.mrb[40].mxu0 }
 0x147   :  { %v1057_v5 = vpop.f32.mrb[40].mxu1  ;;  %v976_v6 = vpop.f32.mrb[41].mxu0 }
 0x148   :  { %814 = vst.msk [vmem:[%s1513_s3 + $0x90] sm:$0xff] %vm795_vm0, %v792_v2  ;;  %v793_v7 = vmax.f32 %v764_v3, 0.0  ;;  %v977_v8 = vadd.f32 %v976_v6, %v975_v4  ;;  %v1058_v9 = vpop.f32.mrb[41].mxu1  ;;  %v978_v10 = vpop.f32.mrb[42].mxu0 }
 0x149   :  { %v1059_v11 = vadd.f32 %v1058_v9, %v1057_v5  ;;  %v1060_v12 = vpop.f32.mrb[42].mxu1  ;;  %v979_v13 = vpop.f32.mrb[43].mxu0 }
 0x14a   :  { %815 = vst.msk [vmem:[%s1513_s3 + $0x98] sm:$0xff] %vm795_vm0, %v793_v7  ;;  %v649_v14 = vadd.f32 %v977_v8, %v1404_v16  ;;  %v1061_v15 = vpop.f32.mrb[43].mxu1 }
 0x14c   :  { %v769_v17 = vadd.f32 %v1059_v11, %v649_v14 }
 0x14e   :  { %v794_v18 = vmax.f32 %v769_v17, 0.0 }
 0x150   :  { %817 = vst.msk [vmem:[%s1513_s3 + $0xa0] sm:$0x3] %vm816_vm1, %v794_v18 }

// kernel: network_forward.6
= control target key start
LH: loop header
LB: loop body
LE: loop exit
PB: predicated region body
PF: predicated region fallthrough
CT: control target
= control target key end

     0   :  { %v1168_v34 = vmov 0.0   ;;  %vm1169_vm0 = vmmov 0   ;;  %vm516_vm1 = vcmask 523264   ;;  %vm827_vm2 = vcmask 517120   ;;  %s1519_s1 = inlined_call_operand.vmem [shape: bf16[576,64], index: 1, kind: input, shape index: {}]   ;;  %s1520_s0 = inlined_call_operand.vmem [shape: bf16[98,576], index: 0, kind: input, shape index: {}]   ;;  %s1521_s2 = inlined_call_operand.vmem [shape: f32[1,64], index: 2, kind: input, shape index: {}]   ;;  %s1522_s3 = inlined_call_operand.vmem [shape: f32[98,64], index: 3, kind: output, shape index: {}]  }
   0x1   :  { %v1085_v0 = vld [vmem:[%s1519_s1 + $0x40] sm:$0xff]   ;;  %v1089_v4 = vld [vmem:[%s1519_s1 + $0x48] sm:$0xff]   ;;  %v1093_v8 = vld [vmem:[%s1519_s1 + $0x50] sm:$0xff]  }
   0x2   :  { %v1086_v1 = vld [vmem:[%s1519_s1 + $0xc0] sm:$0xff]   ;;  %912 = vmatprep.subr.bf16.mxu0 %v1085_v0  ;;  %v1090_v5 = vld [vmem:[%s1519_s1 + $0xc8] sm:$0xff]   ;;  %v1094_v9 = vld [vmem:[%s1519_s1 + $0xd0] sm:$0xff]  }
   0x3   :  { %v1087_v2 = vld [vmem:[%s1519_s1] sm:$0xff]   ;;  %970 = vmatprep.subr.bf16.mxu1 %v1086_v1  ;;  %v1091_v6 = vld [vmem:[%s1519_s1 + $0x8] sm:$0xff]   ;;  %v1095_v10 = vld [vmem:[%s1519_s1 + $0x10] sm:$0xff]  }
   0x4   :  { %v1088_v3 = vld [vmem:[%s1519_s1 + $0x80] sm:$0xff]   ;;  %913 = vmatpush3.bf16.msra.mxu0 %v1087_v2  ;;  %v1092_v7 = vld [vmem:[%s1519_s1 + $0x88] sm:$0xff]   ;;  %v1096_v11 = vld [vmem:[%s1519_s1 + $0x90] sm:$0xff]  }
   0x5   :  { %971 = vmatpush3.bf16.msra.mxu1 %v1088_v3  ;;  %914 = vmatprep.subr.bf16.mxu0 %v1089_v4  ;;  %v1097_v12 = vld [vmem:[%s1519_s1 + $0x58] sm:$0xff]   ;;  %v1101_v16 = vld [vmem:[%s1519_s1 + $0x60] sm:$0xff]   ;;  %v1105_v20 = vld [vmem:[%s1519_s1 + $0x68] sm:$0xff]  }
   0x6   :  { %972 = vmatprep.subr.bf16.mxu1 %v1090_v5  ;;  %v1098_v13 = vld [vmem:[%s1519_s1 + $0xd8] sm:$0xff]   ;;  %v1102_v17 = vld [vmem:[%s1519_s1 + $0xe0] sm:$0xff]   ;;  %v1106_v21 = vld [vmem:[%s1519_s1 + $0xe8] sm:$0xff]  }
   0x7   :  { %v1099_v14 = vld [vmem:[%s1519_s1 + $0x18] sm:$0xff]   ;;  %v1103_v18 = vld [vmem:[%s1519_s1 + $0x20] sm:$0xff]   ;;  %v1107_v22 = vld [vmem:[%s1519_s1 + $0x28] sm:$0xff]  }
   0x8   :  { %915 = vmatpush3.bf16.msra.mxu0 %v1091_v6  ;;  %v1100_v15 = vld [vmem:[%s1519_s1 + $0x98] sm:$0xff]   ;;  %v1104_v19 = vld [vmem:[%s1519_s1 + $0xa0] sm:$0xff]   ;;  %v1108_v23 = vld [vmem:[%s1519_s1 + $0xa8] sm:$0xff]  }
   0x9   :  { %973 = vmatpush3.bf16.msra.mxu1 %v1092_v7  ;;  %916 = vmatprep.subr.bf16.mxu0 %v1093_v8  ;;  %v1109_v24 = vld [vmem:[%s1519_s1 + $0x70] sm:$0xff]   ;;  %v1113_v28 = vld [vmem:[%s1519_s1 + $0x78] sm:$0xff]   ;;  %v1122_v36 = vld [vmem:[%s1520_s0 + $0xc] ss:$20 sps:$4 sm:$0xff]  }
   0xa   :  { %974 = vmatprep.subr.bf16.mxu1 %v1094_v9  ;;  %v1110_v25 = vld [vmem:[%s1519_s1 + $0xf0] sm:$0xff]   ;;  %v1114_v29 = vld [vmem:[%s1519_s1 + $0xf8] sm:$0xff]   ;;  %v1123_v37 = vld [vmem:[%s1519_s1 + $0x100] sm:$0xff]   ;;  %658 = vmatprep.mubr.bf16.mxu1 %v1122_v36 }
   0xb   :  { %v1111_v26 = vld [vmem:[%s1519_s1 + $0x30] sm:$0xff]   ;;  %v1115_v30 = vld [vmem:[%s1519_s1 + $0x38] sm:$0xff]   ;;  %v1124_v38 = vld [vmem:[%s1520_s0 + $0x2c] ss:$20 sps:$4 sm:$0xff]  }
   0xc   :  { %917 = vmatpush3.bf16.msra.mxu0 %v1095_v10  ;;  %v1112_v27 = vld [vmem:[%s1519_s1 + $0xb0] sm:$0xff]   ;;  %v1116_v31 = vld [vmem:[%s1519_s1 + $0xb8] sm:$0xff]   ;;  %v1134_v43 = vld [vmem:[%s1519_s1 + $0x108] sm:$0xff]  }
   0xd   :  { %975 = vmatpush3.bf16.msra.mxu1 %v1096_v11  ;;  %918 = vmatprep.subr.bf16.mxu0 %v1097_v12  ;;  %v1117_v32 = vld [vmem:[%s1520_s0] ss:$20 sps:$4 sm:$0xff]   ;;  %v1119_v33 = vld [vmem:[%s1520_s0 + $0x4] ss:$20 sps:$4 sm:$0xff]   ;;  %v1120_v35 = vld [vmem:[%s1520_s0 + $0x8] ss:$20 sps:$4 sm:$0xff]  }
   0xe   :  { %976 = vmatprep.subr.bf16.mxu1 %v1098_v13  ;;  %570 = vmatprep.mubr.bf16.mxu0 %v1119_v33  ;;  %v1126_v39 = vld [vmem:[%s1520_s0 + $0x34] ss:$20 sps:$4 sm:$0xff]   ;;  %v1129_v41 = vld [vmem:[%s1520_s0 + $0x30] ss:$20 sps:$4 sm:$0xff]   ;;  %v1136_v47 = vld [vmem:[%s1520_s0 + $0x58] ss:$20 sps:$4 sm:$0xff]  }
   0xf   :  { %v1128_v40 = vld [vmem:[%s1520_s0 + $0x28] ss:$20 sps:$4 sm:$0xff]   ;;  %v1143_v45 = vld [vmem:[%s1519_s1 + $0x110] sm:$0xff]   ;;  %v1139_v49 = vld [vmem:[%s1520_s0 + $0x84] ss:$20 sps:$4 sm:$0xff]  }
  0x10   :  { %919 = vmatpush3.bf16.msra.mxu0 %v1099_v14  ;;  %v1130_v42 = vld [vmem:[%s1520_s0 + $0x54] ss:$20 sps:$4 sm:$0xff]   ;;  %v1132_v44 = vld [vmem:[%s1520_s0 + $0x5c] ss:$20 sps:$4 sm:$0xff]   ;;  %v1141_v51 = vld [vmem:[%s1520_s0 + $0x78] ss:$20 sps:$4 sm:$0xff]  }
  0x11   :  { %977 = vmatpush3.bf16.msra.mxu1 %v1100_v15  ;;  %920 = vmatprep.subr.bf16.mxu0 %v1101_v16  ;;  %v1135_v46 = vld [vmem:[%s1520_s0 + $0x50] ss:$20 sps:$4 sm:$0xff]   ;;  %v1156_v50 = vld [vmem:[%s1519_s1 + $0x118] sm:$0xff]   ;;  %v1142_v52 = vld [vmem:[%s1520_s0 + $0x80] ss:$20 sps:$4 sm:$0xff]  }
  0x12   :  { %978 = vmatprep.subr.bf16.mxu1 %v1102_v17  ;;  %v1137_v48 = vld [vmem:[%s1520_s0 + $0x7c] ss:$20 sps:$4 sm:$0xff]   ;;  %v1144_v53 = vld [vmem:[%s1520_s0 + $0xa4] ss:$20 sps:$4 sm:$0xff]   ;;  %v1146_v54 = vld [vmem:[%s1520_s0 + $0xac] ss:$20 sps:$4 sm:$0xff]  }
  0x13   :  { %v1148_v55 = vld [vmem:[%s1520_s0 + $0xa0] ss:$20 sps:$4 sm:$0xff]   ;;  %v1149_v56 = vld [vmem:[%s1520_s0 + $0xa8] ss:$20 sps:$4 sm:$0xff]   ;;  %v1155_v62 = vld [vmem:[%s1520_s0 + $0xd0] ss:$20 sps:$4 sm:$0xff]  }
  0x14   :  { %921 = vmatpush3.bf16.msra.mxu0 %v1103_v18  ;;  %v1150_v57 = vld [vmem:[%s1520_s0 + $0xcc] ss:$20 sps:$4 sm:$0xff]   ;;  %v1152_v58 = vld [vmem:[%s1520_s0 + $0xd4] ss:$20 sps:$4 sm:$0xff]   ;;  %v52_v60 = vld [vmem:[%s1520_s0 + $0xf8] sm:$0x11] }
  0x15   :  { %979 = vmatpush3.bf16.msra.mxu1 %v1104_v19  ;;  %922 = vmatprep.subr.bf16.mxu0 %v1105_v20  ;;  %v51_v59 = vld [vmem:[%s1520_s0 + $0xf0] sm:$0x11]  ;;  %v1154_v61 = vld [vmem:[%s1520_s0 + $0xc8] ss:$20 sps:$4 sm:$0xff]   ;;  %v867_v0 = vcombine.high %v52_v60, %v52_v60  ;;  %v866_v2 = vcombine.low %v52_v60, %v52_v60  ;;  %v1163_v5 = vld [vmem:[%s1520_s0 + $0x38] ss:$20 sps:$4 sm:$0xff]  }
  0x16   :  { %980 = vmatprep.subr.bf16.mxu1 %v1106_v21  ;;  %v865_v63 = vcombine.high %v51_v59, %v51_v59  ;;  %v864_v1 = vcombine.low %v51_v59, %v51_v59  ;;  %v1161_v3 = vld [vmem:[%s1520_s0 + $0x10] ss:$20 sps:$4 sm:$0xff]   ;;  %v1164_v6 = vld [vmem:[%s1520_s0 + $0xd8] ss:$20 sps:$4 sm:$0xff]   ;;  %v1165_v7 = vld [vmem:[%s1520_s0 + $0x60] ss:$20 sps:$4 sm:$0xff]  }
  0x17   :  { %v1162_v4 = vld [vmem:[%s1520_s0 + $0xb0] ss:$20 sps:$4 sm:$0xff]   ;;  %v1166_v8 = vld [vmem:[%s1520_s0 + $0x100] ss:$0 sps:$4 sm:$0x11]  }
  0x18   :  { %923 = vmatpush3.bf16.msra.mxu0 %v1107_v22  ;;  %v1167_v9 = vld [vmem:[%s1520_s0 + $0x88] ss:$20 sps:$4 sm:$0xff]   ;;  %v1429_v11 = vld [vmem:[%s1521_s2] ss:$0 sm:$0xff] }
  0x19   :  { %981 = vmatpush3.bf16.msra.mxu1 %v1108_v23  ;;  %924 = vmatprep.subr.bf16.mxu0 %v1109_v24 }
  0x1a   :  { %982 = vmatprep.subr.bf16.mxu1 %v1110_v25 }
  0x1c   :  { %925 = vmatpush3.bf16.msra.mxu0 %v1111_v26 }
  0x1d   :  { %983 = vmatpush3.bf16.msra.mxu1 %v1112_v27  ;;  %926 = vmatprep.subr.bf16.mxu0 %v1113_v28 }
  0x1e   :  { %984 = vmatprep.subr.bf16.mxu1 %v1114_v29 }
  0x20   :  { %927 = vmatpush3.bf16.msra.mxu0 %v1115_v30 }
  0x21   :  { %985 = vmatpush3.bf16.msra.mxu1 %v1116_v31  ;;  %1039 = vmatprep.subr.bf16.mxu0 %v1168_v34 }
  0x22   :  { %1075 = vmatprep.subr.bf16.mxu1 %v1168_v34 }
  0x23   :  { %571 = vmatmul.mubr.bf16.vlgmr.msra.gmra.mrb[0].mxu0 %v1117_v32 }
  0x24   :  { %659 = vmatmul.mubr.bf16.vlgmr.msra.gmra.mrb[0].mxu1 %v1120_v35  ;;  %1040 = vmatpush3.bf16.msra.mxu0 %v1123_v37 }
  0x25   :  { %578 = vmatprep.mubr.bf16.mxu0 %v1124_v38  ;;  %1079 = vmatpush3.bf16.msra.mxu1 %v1123_v37 }
  0x26   :  { %666 = vmatprep.mubr.bf16.mxu1 %v1126_v39  ;;  %1041 = vmatprep.subr.bf16.mxu0 %v1168_v34 }
  0x27   :  { %1076 = vmatprep.subr.bf16.mxu1 %v1168_v34 }
  0x28   :  { %1042 = vmatpush3.bf16.msra.mxu0 %v1134_v43 }
  0x29   :  { %1080 = vmatpush3.bf16.msra.mxu1 %v1134_v43  ;;  %1043 = vmatprep.subr.bf16.mxu0 %v1168_v34 }
  0x2a   :  { %1077 = vmatprep.subr.bf16.mxu1 %v1168_v34 }
  0x2b   :  { %579 = vmatmul.mubr.bf16.gmra.mrb[4].mxu0 %v1128_v40 }
  0x2c   :  { %667 = vmatmul.mubr.bf16.gmra.mrb[4].mxu1 %v1129_v41  ;;  %586 = vmatprep.mubr.bf16.mxu0 %v1130_v42 }
  0x2d   :  { %674 = vmatprep.mubr.bf16.mxu1 %v1132_v44  ;;  %1044 = vmatpush3.bf16.msra.mxu0 %v1143_v45 }
  0x2e   :  { %1081 = vmatpush3.bf16.msra.mxu1 %v1143_v45  ;;  %1045 = vmatprep.subr.bf16.mxu0 %v1168_v34 }
  0x2f   :  { %1078 = vmatprep.subr.bf16.mxu1 %v1168_v34 }
  0x31   :  { %1046 = vmatpush3.bf16.msra.mxu0 %v1156_v50 }
  0x32   :  { %1082 = vmatpush3.bf16.msra.mxu1 %v1156_v50 }
  0x33   :  { %587 = vmatmul.mubr.bf16.gmra.mrb[8].mxu0 %v1135_v46 }
  0x34   :  { %675 = vmatmul.mubr.bf16.gmra.mrb[8].mxu1 %v1136_v47  ;;  %594 = vmatprep.mubr.bf16.mxu0 %v1137_v48 }
  0x35   :  { %682 = vmatprep.mubr.bf16.mxu1 %v1139_v49 }
  0x3b   :  { %595 = vmatmul.mubr.bf16.gmra.mrb[12].mxu0 %v1141_v51 }
  0x3c   :  { %683 = vmatmul.mubr.bf16.gmra.mrb[12].mxu1 %v1142_v52  ;;  %602 = vmatprep.mubr.bf16.mxu0 %v1144_v53 }
  0x3d   :  { %690 = vmatprep.mubr.bf16.mxu1 %v1146_v54 }
  0x43   :  { %603 = vmatmul.mubr.bf16.gmra.mrb[16].mxu0 %v1148_v55 }
  0x44   :  { %691 = vmatmul.mubr.bf16.gmra.mrb[16].mxu1 %v1149_v56  ;;  %610 = vmatprep.mubr.bf16.mxu0 %v1150_v57 }
  0x45   :  { %698 = vmatprep.mubr.bf16.mxu1 %v1152_v58 }
  0x4b   :  { %611 = vmatmul.mubr.bf16.gmra.mrb[20].mxu0 %v1154_v61 }
  0x4c   :  { %699 = vmatmul.mubr.bf16.gmra.mrb[20].mxu1 %v1155_v62  ;;  %618 = vmatprep.mubr.bf16.mxu0 %v865_v63 }
  0x4d   :  { %706 = vmatprep.mubr.bf16.mxu1 %v867_v0 }
  0x53   :  { %619 = vmatmul.mubr.bf16.gmra.mrb[24].mxu0 %v864_v1 }
  0x54   :  { %707 = vmatmul.mubr.bf16.gmra.mrb[24].mxu1 %v866_v2  ;;  %1047 = vmatprep.mubr.msk.bf16.mxu0 %vm1169_vm0, %v1168_v34 }
  0x55   :  { %1063 = vmatprep.mubr.msk.bf16.mxu1 %vm1169_vm0, %v1168_v34 }
  0x5b   :  { %1048 = vmatmul.mubr.msk.bf16.vlgmr.msra.gmra.mrb[28].mxu0 %vm516_vm1, %v1161_v3 }
  0x5c   :  { %1064 = vmatmul.mubr.msk.bf16.vlgmr.msra.gmra.mrb[28].mxu1 %vm516_vm1, %v1162_v4  ;;  %1051 = vmatprep.mubr.msk.bf16.mxu0 %vm1169_vm0, %v1168_v34 }
  0x5d   :  { %1067 = vmatprep.mubr.msk.bf16.mxu1 %vm1169_vm0, %v1168_v34 }
  0x63   :  { %1052 = vmatmul.mubr.msk.bf16.gmra.mrb[32].mxu0 %vm516_vm1, %v1163_v5 }
  0x64   :  { %1068 = vmatmul.mubr.msk.bf16.gmra.mrb[32].mxu1 %vm516_vm1, %v1164_v6  ;;  %1055 = vmatprep.mubr.msk.bf16.mxu0 %vm1169_vm0, %v1168_v34 }
  0x65   :  { %1071 = vmatprep.mubr.msk.bf16.mxu1 %vm1169_vm0, %v1168_v34 }
  0x6b   :  { %1056 = vmatmul.mubr.msk.bf16.gmra.mrb[36].mxu0 %vm516_vm1, %v1165_v7 }
  0x6c   :  { %1072 = vmatmul.mubr.msk.bf16.gmra.mrb[36].mxu1 %vm516_vm1, %v1166_v8  ;;  %1059 = vmatprep.mubr.msk.bf16.mxu0 %vm1169_vm0, %v1168_v34 }
  0x73   :  { %1060 = vmatmul.mubr.msk.bf16.gmra.mrb[40].mxu0 %vm516_vm1, %v1167_v9 }
  0xf6   :  { %v928_v10 = vpop.f32.mrb[0].mxu0 }
  0xf7   :  { %v929_v12 = vpop.f32.mrb[1].mxu0  ;;  %v986_v13 = vpop.f32.mrb[0].mxu1 }
  0xf8   :  { %v930_v14 = vadd.f32 %v929_v12, %v928_v10  ;;  %v931_v15 = vpop.f32.mrb[2].mxu0  ;;  %v987_v16 = vpop.f32.mrb[1].mxu1 }
  0xf9   :  { %v932_v17 = vpop.f32.mrb[3].mxu0  ;;  %v988_v18 = vadd.f32 %v987_v16, %v986_v13  ;;  %v989_v19 = vpop.f32.mrb[2].mxu1 }
  0xfa   :  { %v573_v20 = vadd.f32 %v930_v14, %v1429_v11  ;;  %v933_v21 = vadd.f32 %v932_v17, %v931_v15  ;;  %v990_v22 = vpop.f32.mrb[3].mxu1 }
  0xfb   :  { %v991_v23 = vadd.f32 %v990_v22, %v989_v19 }
  0xfc   :  { %v576_v24 = vadd.f32 %v933_v21, %v1429_v11  ;;  %v1433_v25 = vadd.f32 %v988_v18, %v573_v20 }
  0xfe   :  { %v934_v26 = vpop.f32.mrb[4].mxu0  ;;  %v1435_v27 = vadd.f32 %v991_v23, %v576_v24 }
  0xff   :  { %v935_v28 = vpop.f32.mrb[5].mxu0  ;;  %v992_v29 = vpop.f32.mrb[4].mxu1 }
 0x100   :  { %v936_v30 = vadd.f32 %v935_v28, %v934_v26  ;;  %v937_v31 = vpop.f32.mrb[6].mxu0  ;;  %v993_v32 = vpop.f32.mrb[5].mxu1 }
 0x101   :  { %v938_v33 = vpop.f32.mrb[7].mxu0  ;;  %v994_v34 = vadd.f32 %v993_v32, %v992_v29  ;;  %v995_v35 = vpop.f32.mrb[6].mxu1 }
 0x102   :  { %v581_v36 = vadd.f32 %v936_v30, %v1429_v11  ;;  %v939_v37 = vadd.f32 %v938_v33, %v937_v31  ;;  %v996_v38 = vpop.f32.mrb[7].mxu1 }
 0x103   :  { %v997_v39 = vadd.f32 %v996_v38, %v995_v35 }
 0x104   :  { %v584_v40 = vadd.f32 %v939_v37, %v1429_v11  ;;  %v1439_v41 = vadd.f32 %v994_v34, %v581_v36 }
 0x106   :  { %v940_v42 = vpop.f32.mrb[8].mxu0  ;;  %v1441_v43 = vadd.f32 %v997_v39, %v584_v40 }
 0x107   :  { %v941_v44 = vpop.f32.mrb[9].mxu0  ;;  %v998_v45 = vpop.f32.mrb[8].mxu1 }
 0x108   :  { %v942_v46 = vadd.f32 %v941_v44, %v940_v42  ;;  %v943_v47 = vpop.f32.mrb[10].mxu0  ;;  %v999_v48 = vpop.f32.mrb[9].mxu1 }
 0x109   :  { %v944_v49 = vpop.f32.mrb[11].mxu0  ;;  %v1000_v50 = vadd.f32 %v999_v48, %v998_v45  ;;  %v1001_v51 = vpop.f32.mrb[10].mxu1 }
 0x10a   :  { %v589_v52 = vadd.f32 %v942_v46, %v1429_v11  ;;  %v945_v53 = vadd.f32 %v944_v49, %v943_v47  ;;  %v1002_v54 = vpop.f32.mrb[11].mxu1 }
 0x10b   :  { %v1003_v55 = vadd.f32 %v1002_v54, %v1001_v51 }
 0x10c   :  { %v592_v56 = vadd.f32 %v945_v53, %v1429_v11  ;;  %v1445_v57 = vadd.f32 %v1000_v50, %v589_v52 }
 0x10e   :  { %v946_v58 = vpop.f32.mrb[12].mxu0  ;;  %v1447_v59 = vadd.f32 %v1003_v55, %v592_v56 }
 0x10f   :  { %v947_v60 = vpop.f32.mrb[13].mxu0  ;;  %v1004_v61 = vpop.f32.mrb[12].mxu1 }
 0x110   :  { %v948_v62 = vadd.f32 %v947_v60, %v946_v58  ;;  %v949_v63 = vpop.f32.mrb[14].mxu0  ;;  %v1005_v0 = vpop.f32.mrb[13].mxu1 }
 0x111   :  { %v950_v1 = vpop.f32.mrb[15].mxu0  ;;  %v1006_v2 = vadd.f32 %v1005_v0, %v1004_v61  ;;  %v1007_v3 = vpop.f32.mrb[14].mxu1 }
 0x112   :  { %v597_v4 = vadd.f32 %v948_v62, %v1429_v11  ;;  %v951_v5 = vadd.f32 %v950_v1, %v949_v63  ;;  %v1008_v6 = vpop.f32.mrb[15].mxu1 }
 0x113   :  { %v1009_v7 = vadd.f32 %v1008_v6, %v1007_v3 }
 0x114   :  { %v600_v8 = vadd.f32 %v951_v5, %v1429_v11  ;;  %v1451_v9 = vadd.f32 %v1006_v2, %v597_v4 }
 0x116   :  { %v952_v10 = vpop.f32.mrb[16].mxu0  ;;  %v1453_v12 = vadd.f32 %v1009_v7, %v600_v8 }
 0x117   :  { %v953_v13 = vpop.f32.mrb[17].mxu0  ;;  %v1010_v14 = vpop.f32.mrb[16].mxu1 }
 0x118   :  { %v954_v15 = vadd.f32 %v953_v13, %v952_v10  ;;  %v955_v16 = vpop.f32.mrb[18].mxu0  ;;  %v1011_v17 = vpop.f32.mrb[17].mxu1 }
 0x119   :  { %v956_v18 = vpop.f32.mrb[19].mxu0  ;;  %v1012_v19 = vadd.f32 %v1011_v17, %v1010_v14  ;;  %v1013_v20 = vpop.f32.mrb[18].mxu1 }
 0x11a   :  { %v605_v21 = vadd.f32 %v954_v15, %v1429_v11  ;;  %v957_v22 = vadd.f32 %v956_v18, %v955_v16  ;;  %v1014_v23 = vpop.f32.mrb[19].mxu1 }
 0x11b   :  { %v1015_v24 = vadd.f32 %v1014_v23, %v1013_v20 }
 0x11c   :  { %v608_v26 = vadd.f32 %v957_v22, %v1429_v11  ;;  %v693_v28 = vadd.f32 %v1012_v19, %v605_v21 }
 0x11e   :  { %v958_v29 = vpop.f32.mrb[20].mxu0  ;;  %v696_v30 = vadd.f32 %v1015_v24, %v608_v26 }
 0x11f   :  { %v959_v31 = vpop.f32.mrb[21].mxu0  ;;  %v1016_v32 = vpop.f32.mrb[20].mxu1 }
 0x120   :  { %v960_v33 = vadd.f32 %v959_v31, %v958_v29  ;;  %v961_v34 = vpop.f32.mrb[22].mxu0  ;;  %v1017_v35 = vpop.f32.mrb[21].mxu1 }
 0x121   :  { %v962_v36 = vpop.f32.mrb[23].mxu0  ;;  %v1018_v37 = vadd.f32 %v1017_v35, %v1016_v32  ;;  %v1019_v38 = vpop.f32.mrb[22].mxu1 }
 0x122   :  { %v613_v39 = vadd.f32 %v960_v33, %v1429_v11  ;;  %v963_v40 = vadd.f32 %v962_v36, %v961_v34  ;;  %v1020_v42 = vpop.f32.mrb[23].mxu1 }
 0x123   :  { %v1021_v44 = vadd.f32 %v1020_v42, %v1019_v38 }
 0x124   :  { %v616_v45 = vadd.f32 %v963_v40, %v1429_v11  ;;  %v701_v46 = vadd.f32 %v1018_v37, %v613_v39 }
 0x126   :  { %v964_v47 = vpop.f32.mrb[24].mxu0  ;;  %v704_v48 = vadd.f32 %v1021_v44, %v616_v45 }
 0x127   :  { %v965_v49 = vpop.f32.mrb[25].mxu0  ;;  %v1022_v50 = vpop.f32.mrb[24].mxu1 }
 0x128   :  { %v966_v51 = vadd.f32 %v965_v49, %v964_v47  ;;  %v967_v52 = vpop.f32.mrb[26].mxu0  ;;  %v1023_v53 = vpop.f32.mrb[25].mxu1 }
 0x129   :  { %v968_v54 = vpop.f32.mrb[27].mxu0  ;;  %v1024_v55 = vadd.f32 %v1023_v53, %v1022_v50  ;;  %v1025_v56 = vpop.f32.mrb[26].mxu1 }
 0x12a   :  { %v621_v58 = vadd.f32 %v966_v51, %v1429_v11  ;;  %v1026_v60 = vpop.f32.mrb[27].mxu1 }
 0x12c   :  { %v709_v61 = vadd.f32 %v1024_v55, %v621_v58 }
 0x12e   :  { %v748_v62 = vpop.f32.mrb[28].mxu0 }
 0x12f   :  { %v749_v63 = vadd.f32 %v748_v62, %v1433_v25  ;;  %v780_v0 = vpop.f32.mrb[28].mxu1  ;;  %v1049_v1 = vpop.f32.mrb[29].mxu0 }
 0x130   :  { %v781_v2 = vadd.f32 %v780_v0, %v693_v28  ;;  %v1065_v3 = vpop.f32.mrb[29].mxu1  ;;  %v751_v4 = vpop.f32.mrb[30].mxu0 }
 0x131   :  { %v802_v5 = vmax.f32 %v749_v63, 0.0  ;;  %v752_v6 = vadd.f32 %v751_v4, %v1435_v27  ;;  %v783_v7 = vpop.f32.mrb[30].mxu1  ;;  %v1050_v8 = vpop.f32.mrb[31].mxu0 }
 0x132   :  { %v810_v10 = vmax.f32 %v781_v2, 0.0  ;;  %v784_v13 = vadd.f32 %v783_v7, %v696_v30  ;;  %v1066_v14 = vpop.f32.mrb[31].mxu1 }
 0x133   :  { %815 = vst.msk [vmem:[%s1522_s3] sm:$0xff] %vm516_vm1, %v802_v5  ;;  %v803_v11 = vmax.f32 %v752_v6, 0.0 }
 0x134   :  { %823 = vst.msk [vmem:[%s1522_s3 + $0x40] sm:$0xff] %vm516_vm1, %v810_v10  ;;  %v811_v25 = vmax.f32 %v784_v13, 0.0 }
 0x135   :  { %816 = vst.msk [vmem:[%s1522_s3 + $0x8] sm:$0xff] %vm516_vm1, %v803_v11 }
 0x136   :  { %824 = vst.msk [vmem:[%s1522_s3 + $0x48] sm:$0xff] %vm516_vm1, %v811_v25  ;;  %v756_v27 = vpop.f32.mrb[32].mxu0 }
 0x137   :  { %v757_v15 = vadd.f32 %v756_v27, %v1439_v41  ;;  %v788_v16 = vpop.f32.mrb[32].mxu1  ;;  %v1053_v17 = vpop.f32.mrb[33].mxu0 }
 0x138   :  { %v789_v18 = vadd.f32 %v788_v16, %v701_v46  ;;  %v1069_v19 = vpop.f32.mrb[33].mxu1  ;;  %v759_v20 = vpop.f32.mrb[34].mxu0 }
 0x139   :  { %v804_v21 = vmax.f32 %v757_v15, 0.0  ;;  %v760_v22 = vadd.f32 %v759_v20, %v1441_v43  ;;  %v791_v23 = vpop.f32.mrb[34].mxu1  ;;  %v1054_v24 = vpop.f32.mrb[35].mxu0 }
 0x13a   :  { %v812_v26 = vmax.f32 %v789_v18, 0.0  ;;  %v792_v28 = vadd.f32 %v791_v23, %v704_v48  ;;  %v1070_v29 = vpop.f32.mrb[35].mxu1 }
 0x13b   :  { %817 = vst.msk [vmem:[%s1522_s3 + $0x10] sm:$0xff] %vm516_vm1, %v804_v21  ;;  %v805_v30 = vmax.f32 %v760_v22, 0.0 }
 0x13c   :  { %825 = vst.msk [vmem:[%s1522_s3 + $0x50] sm:$0xff] %vm516_vm1, %v812_v26  ;;  %v813_v41 = vmax.f32 %v792_v28, 0.0 }
 0x13d   :  { %818 = vst.msk [vmem:[%s1522_s3 + $0x18] sm:$0xff] %vm516_vm1, %v805_v30 }
 0x13e   :  { %826 = vst.msk [vmem:[%s1522_s3 + $0x58] sm:$0xff] %vm516_vm1, %v813_v41  ;;  %v764_v43 = vpop.f32.mrb[36].mxu0 }
 0x13f   :  { %v765_v31 = vadd.f32 %v764_v43, %v1445_v57  ;;  %v796_v32 = vpop.f32.mrb[36].mxu1  ;;  %v1057_v33 = vpop.f32.mrb[37].mxu0 }
 0x140   :  { %v797_v34 = vadd.f32 %v796_v32, %v709_v61  ;;  %v767_v35 = vpop.f32.mrb[38].mxu0  ;;  %v1073_v36 = vpop.f32.mrb[37].mxu1 }
 0x141   :  { %v806_v37 = vmax.f32 %v765_v31, 0.0  ;;  %v768_v38 = vadd.f32 %v767_v35, %v1447_v59  ;;  %v1058_v39 = vpop.f32.mrb[39].mxu0  ;;  %v799_v40 = vpop.f32.mrb[38].mxu1 }
 0x142   :  { %v814_v42 = vmax.f32 %v797_v34, 0.0  ;;  %v1074_v44 = vpop.f32.mrb[39].mxu1 }
 0x143   :  { %819 = vst.msk [vmem:[%s1522_s3 + $0x20] sm:$0xff] %vm516_vm1, %v806_v37  ;;  %v807_v45 = vmax.f32 %v768_v38, 0.0 }
 0x144   :  { %828 = vst.msk [vmem:[%s1522_s3 + $0x60] sm:$0x3] %vm827_vm2, %v814_v42 }
 0x145   :  { %820 = vst.msk [vmem:[%s1522_s3 + $0x28] sm:$0xff] %vm516_vm1, %v807_v45 }
 0x146   :  { %v772_v57 = vpop.f32.mrb[40].mxu0 }
 0x147   :  { %v773_v59 = vadd.f32 %v772_v57, %v1451_v9  ;;  %v1061_v46 = vpop.f32.mrb[41].mxu0 }
 0x148   :  { %v775_v47 = vpop.f32.mrb[42].mxu0 }
 0x149   :  { %v808_v48 = vmax.f32 %v773_v59, 0.0  ;;  %v776_v49 = vadd.f32 %v775_v47, %v1453_v12  ;;  %v1062_v50 = vpop.f32.mrb[43].mxu0 }
 0x14b   :  { %821 = vst.msk [vmem:[%s1522_s3 + $0x30] sm:$0xff] %vm516_vm1, %v808_v48  ;;  %v809_v51 = vmax.f32 %v776_v49, 0.0 }
 0x14d   :  { %822 = vst.msk [vmem:[%s1522_s3 + $0x38] sm:$0xff] %vm516_vm1, %v809_v51 }

// kernel: network_forward.7
= control target key start
LH: loop header
LB: loop body
LE: loop exit
PB: predicated region body
PF: predicated region fallthrough
CT: control target
= control target key end

     0   :  { %12 = vsyncpa [#allocation3], 0  ;;  %v815_v36 = vlaneseq  ;;  %v8648_v37 = vmov 1966171168   ;;  %s11310_s0 = inlined_call_operand.vmem [shape: bf16[2,3136], index: 0, kind: input, shape index: {}]   ;;  %s11311_s1 = inlined_call_operand.vmem [shape: bf16[3136,512], index: 1, kind: input, shape index: {}]   ;;  %s11312_s2 = inlined_call_operand.vmem [shape: f32[1,512], index: 2, kind: input, shape index: {}]   ;;  %s11313_s3 = inlined_call_operand.vmem [shape: bf16[512,6], index: 3, kind: input, shape index: {}]   ;;  %s11314_s4 = inlined_call_operand.vmem [shape: f32[1,6], index: 4, kind: input, shape index: {}]   ;;  %s11315_s5 = inlined_call_operand.hbm [shape: f32[2,512], index: 5, kind: output, shape index: {0}]   ;;  %s11316_s6 = inlined_call_operand.hbm [shape: f32[2,6], index: 6, kind: output, shape index: {1}]  }
   0x1   :  { %v7387_v0 = vld [vmem:[%s11311_s1 + $0x4] ss:$16 sps:$4 sm:$0xff]   ;;  %v7389_v1 = vld [vmem:[%s11311_s1 + $0xc] ss:$16 sps:$4 sm:$0xff]   ;;  %v7391_v2 = vld [vmem:[%s11311_s1] ss:$16 sps:$4 sm:$0xff]   ;;  %v841_v38 = vunpack.c.l.s4 %v8648_v37 }
   0x2   :  { %4948 = vmatprep.subr.bf16.mxu0 %v7387_v0  ;;  %v7392_v3 = vld [vmem:[%s11311_s1 + $0x8] ss:$16 sps:$4 sm:$0xff]   ;;  %5481 = vmatprep.subr.bf16.mxu1 %v7389_v1  ;;  %v7393_v4 = vld [vmem:[%s11311_s1 + $0x24] ss:$16 sps:$4 sm:$0xff]   ;;  %v7395_v5 = vld [vmem:[%s11311_s1 + $0x2c] ss:$16 sps:$4 sm:$0xff]  }
   0x3   :  { %4949 = vmatpush1.bf16.msra.mxu0 %v7391_v2  ;;  %5482 = vmatpush1.bf16.msra.mxu1 %v7392_v3  ;;  %v7397_v6 = vld [vmem:[%s11311_s1 + $0x20] ss:$16 sps:$4 sm:$0xff]   ;;  %v7398_v7 = vld [vmem:[%s11311_s1 + $0x28] ss:$16 sps:$4 sm:$0xff]   ;;  %v7399_v8 = vld [vmem:[%s11311_s1 + $0x44] ss:$16 sps:$4 sm:$0xff]   ;;  %v842_v43 = vunpack.c.0.s8 %v841_v38 }
   0x4   :  { %4950 = vmatprep.subr.bf16.mxu0 %v7393_v4  ;;  %5483 = vmatprep.subr.bf16.mxu1 %v7395_v5  ;;  %v7401_v9 = vld [vmem:[%s11311_s1 + $0x4c] ss:$16 sps:$4 sm:$0xff]   ;;  %v7403_v10 = vld [vmem:[%s11311_s1 + $0x40] ss:$16 sps:$4 sm:$0xff]   ;;  %v7404_v11 = vld [vmem:[%s11311_s1 + $0x48] ss:$16 sps:$4 sm:$0xff]  }
   0x5   :  { %v7405_v12 = vld [vmem:[%s11311_s1 + $0x64] ss:$16 sps:$4 sm:$0xff]   ;;  %v7407_v13 = vld [vmem:[%s11311_s1 + $0x6c] ss:$16 sps:$4 sm:$0xff]   ;;  %v7409_v14 = vld [vmem:[%s11311_s1 + $0x60] ss:$16 sps:$4 sm:$0xff]  }
   0x6   :  { %v7410_v15 = vld [vmem:[%s11311_s1 + $0x68] ss:$16 sps:$4 sm:$0xff]   ;;  %v7411_v16 = vld [vmem:[%s11311_s1 + $0x84] ss:$16 sps:$4 sm:$0xff]   ;;  %v7413_v17 = vld [vmem:[%s11311_s1 + $0x8c] ss:$16 sps:$4 sm:$0xff]  }
   0x7   :  { %4951 = vmatpush1.bf16.msra.mxu0 %v7397_v6  ;;  %5484 = vmatpush1.bf16.msra.mxu1 %v7398_v7  ;;  %v7415_v18 = vld [vmem:[%s11311_s1 + $0x80] ss:$16 sps:$4 sm:$0xff]   ;;  %v7416_v19 = vld [vmem:[%s11311_s1 + $0x88] ss:$16 sps:$4 sm:$0xff]   ;;  %v7417_v20 = vld [vmem:[%s11311_s1 + $0xa4] ss:$16 sps:$4 sm:$0xff]  }
   0x8   :  { %4952 = vmatprep.subr.bf16.mxu0 %v7399_v8  ;;  %5485 = vmatprep.subr.bf16.mxu1 %v7401_v9  ;;  %v7419_v21 = vld [vmem:[%s11311_s1 + $0xac] ss:$16 sps:$4 sm:$0xff]   ;;  %v7421_v22 = vld [vmem:[%s11311_s1 + $0xa0] ss:$16 sps:$4 sm:$0xff]   ;;  %v7422_v23 = vld [vmem:[%s11311_s1 + $0xa8] ss:$16 sps:$4 sm:$0xff]  }
   0x9   :  { %v7423_v24 = vld [vmem:[%s11311_s1 + $0xc4] ss:$16 sps:$4 sm:$0xff]   ;;  %v7425_v25 = vld [vmem:[%s11311_s1 + $0xcc] ss:$16 sps:$4 sm:$0xff]   ;;  %v7427_v26 = vld [vmem:[%s11311_s1 + $0xc0] ss:$16 sps:$4 sm:$0xff]  }
   0xa   :  { %v7428_v27 = vld [vmem:[%s11311_s1 + $0xc8] ss:$16 sps:$4 sm:$0xff]   ;;  %v7429_v28 = vld [vmem:[%s11311_s1 + $0xe4] ss:$16 sps:$4 sm:$0xff]   ;;  %v7431_v29 = vld [vmem:[%s11311_s1 + $0xec] ss:$16 sps:$4 sm:$0xff]  }
   0xb   :  { %4953 = vmatpush1.bf16.msra.mxu0 %v7403_v10  ;;  %5486 = vmatpush1.bf16.msra.mxu1 %v7404_v11  ;;  %v7433_v30 = vld [vmem:[%s11311_s1 + $0xe0] ss:$16 sps:$4 sm:$0xff]   ;;  %v7434_v31 = vld [vmem:[%s11311_s1 + $0xe8] ss:$16 sps:$4 sm:$0xff]   ;;  %v7435_v32 = vld [vmem:[%s11311_s1 + $0x104] ss:$16 sps:$4 sm:$0xff]  }
   0xc   :  { %4954 = vmatprep.subr.bf16.mxu0 %v7405_v12  ;;  %5487 = vmatprep.subr.bf16.mxu1 %v7407_v13  ;;  %v7437_v33 = vld [vmem:[%s11311_s1 + $0x10c] ss:$16 sps:$4 sm:$0xff]   ;;  %v7439_v34 = vld [vmem:[%s11311_s1 + $0x100] ss:$16 sps:$4 sm:$0xff]   ;;  %v7440_v35 = vld [vmem:[%s11311_s1 + $0x108] ss:$16 sps:$4 sm:$0xff]  }
   0xd   :  { %v7441_v39 = vld [vmem:[%s11311_s1 + $0x124] ss:$16 sps:$4 sm:$0xff]   ;;  %v7443_v40 = vld [vmem:[%s11311_s1 + $0x12c] ss:$16 sps:$4 sm:$0xff]   ;;  %v7445_v41 = vld [vmem:[%s11311_s1 + $0x120] ss:$16 sps:$4 sm:$0xff]  }
   0xe   :  { %v8805_v42 = vshrl.u32 %v815_v36, 7  ;;  %v7446_v44 = vld [vmem:[%s11311_s1 + $0x128] ss:$16 sps:$4 sm:$0xff]   ;;  %v7447_v45 = vld [vmem:[%s11311_s1 + $0x144] ss:$16 sps:$4 sm:$0xff]  }
   0xf   :  { %4955 = vmatpush1.bf16.msra.mxu0 %v7409_v14  ;;  %5488 = vmatpush1.bf16.msra.mxu1 %v7410_v15  ;;  %v7449_v46 = vld [vmem:[%s11311_s1 + $0x14c] ss:$16 sps:$4 sm:$0xff]   ;;  %v7451_v47 = vld [vmem:[%s11311_s1 + $0x140] ss:$16 sps:$4 sm:$0xff]   ;;  %v7452_v48 = vld [vmem:[%s11311_s1 + $0x148] ss:$16 sps:$4 sm:$0xff]  }
  0x10   :  { %4956 = vmatprep.subr.bf16.mxu0 %v7411_v16  ;;  %5489 = vmatprep.subr.bf16.mxu1 %v7413_v17  ;;  %v8823_v49 = vsub.s32 %v842_v43, %v8805_v42  ;;  %v7453_v50 = vld [vmem:[%s11311_s1 + $0x164] ss:$16 sps:$4 sm:$0xff]   ;;  %v7455_v51 = vld [vmem:[%s11311_s1 + $0x16c] ss:$16 sps:$4 sm:$0xff]   ;;  %v7457_v53 = vld [vmem:[%s11311_s1 + $0x160] ss:$16 sps:$4 sm:$0xff]  }
  0x11   :  { %v8834_v52 = vld [vmem:[%s11310_s0] sm:$0xff]  ;;  %v7458_v55 = vld [vmem:[%s11311_s1 + $0x168] ss:$16 sps:$4 sm:$0xff]   ;;  %v7461_v57 = vld [vmem:[%s11311_s1 + $0x18c] ss:$16 sps:$4 sm:$0xff]  }
  0x12   :  { %v846_v54 = vrot.slane %v8834_v52, %v8823_v49  ;;  %v7459_v56 = vld [vmem:[%s11311_s1 + $0x184] ss:$16 sps:$4 sm:$0xff]   ;;  %v7463_v59 = vld [vmem:[%s11311_s1 + $0x180] ss:$16 sps:$4 sm:$0xff]   ;;  %v7464_v61 = vld [vmem:[%s11311_s1 + $0x188] ss:$16 sps:$4 sm:$0xff]  }
  0x13   :  { %4957 = vmatpush1.bf16.msra.mxu0 %v7415_v18  ;;  %5490 = vmatpush1.bf16.msra.mxu1 %v7416_v19  ;;  %v7465_v62 = vld [vmem:[%s11311_s1 + $0x1a4] ss:$16 sps:$4 sm:$0xff]   ;;  %v7467_v63 = vld [vmem:[%s11311_s1 + $0x1ac] ss:$16 sps:$4 sm:$0xff]   ;;  %v7469_v0 = vld [vmem:[%s11311_s1 + $0x1a0] ss:$16 sps:$4 sm:$0xff]  }
  0x14   :  { %4958 = vmatprep.subr.bf16.mxu0 %v7417_v20  ;;  %5491 = vmatprep.subr.bf16.mxu1 %v7419_v21  ;;  %v854_v58 = vcombine.high %v846_v54, %v846_v54  ;;  %v7470_v1 = vld [vmem:[%s11311_s1 + $0x1a8] ss:$16 sps:$4 sm:$0xff]   ;;  %v7471_v2 = vld [vmem:[%s11311_s1 + $0x1c4] ss:$16 sps:$4 sm:$0xff]   ;;  %v7473_v3 = vld [vmem:[%s11311_s1 + $0x1cc] ss:$16 sps:$4 sm:$0xff]   ;;  %v8903_v13 = vrot.slane %v846_v54, %v8823_v49 }
  0x15   :  { %v7475_v4 = vld [vmem:[%s11311_s1 + $0x1c0] ss:$16 sps:$4 sm:$0xff]   ;;  %v7476_v5 = vld [vmem:[%s11311_s1 + $0x1c8] ss:$16 sps:$4 sm:$0xff]   ;;  %v7477_v6 = vld [vmem:[%s11311_s1 + $0x1e4] ss:$16 sps:$4 sm:$0xff]  }
  0x16   :  { %v876_v60 = vrot.slane %v854_v58, %v8823_v49  ;;  %v7479_v7 = vld [vmem:[%s11311_s1 + $0x1ec] ss:$16 sps:$4 sm:$0xff]   ;;  %v7481_v8 = vld [vmem:[%s11311_s1 + $0x1e0] ss:$16 sps:$4 sm:$0xff]   ;;  %v7482_v9 = vld [vmem:[%s11311_s1 + $0x1e8] ss:$16 sps:$4 sm:$0xff]  }
  0x17   :  { %4959 = vmatpush1.bf16.msra.mxu0 %v7421_v22  ;;  %5492 = vmatpush1.bf16.msra.mxu1 %v7422_v23  ;;  %v7485_v10 = vld [vmem:[%s11311_s1 + $0x204] ss:$16 sps:$4 sm:$0xff]   ;;  %v7488_v11 = vld [vmem:[%s11311_s1 + $0x20c] ss:$16 sps:$4 sm:$0xff]   ;;  %v7483_v12 = vld [vmem:[%s11311_s1 + $0x200] ss:$16 sps:$4 sm:$0xff]  }
  0x18   :  { %4960 = vmatprep.subr.bf16.mxu0 %v7423_v24  ;;  %5493 = vmatprep.subr.bf16.mxu1 %v7425_v25  ;;  %v7486_v14 = vld [vmem:[%s11311_s1 + $0x208] ss:$16 sps:$4 sm:$0xff]   ;;  %v7491_v15 = vld [vmem:[%s11311_s1 + $0x224] ss:$16 sps:$4 sm:$0xff]   ;;  %v7494_v16 = vld [vmem:[%s11311_s1 + $0x22c] ss:$16 sps:$4 sm:$0xff]   ;;  %v886_v17 = vcombine.high %v876_v60, %v876_v60 }
  0x19   :  { %4980 = vmatprep.mubr.bf16.mxu0 %v876_v60  ;;  %5513 = vmatprep.mubr.bf16.mxu1 %v876_v60  ;;  %v7489_v18 = vld [vmem:[%s11311_s1 + $0x220] ss:$16 sps:$4 sm:$0xff]   ;;  %v7492_v19 = vld [vmem:[%s11311_s1 + $0x228] ss:$16 sps:$4 sm:$0xff]   ;;  %v7497_v20 = vld [vmem:[%s11311_s1 + $0x244] ss:$16 sps:$4 sm:$0xff]  }
  0x1a   :  { %v7500_v21 = vld [vmem:[%s11311_s1 + $0x24c] ss:$16 sps:$4 sm:$0xff]   ;;  %v7495_v22 = vld [vmem:[%s11311_s1 + $0x240] ss:$16 sps:$4 sm:$0xff]   ;;  %v7498_v23 = vld [vmem:[%s11311_s1 + $0x248] ss:$16 sps:$4 sm:$0xff]  }
  0x1b   :  { %4961 = vmatpush1.bf16.msra.mxu0 %v7427_v26  ;;  %5494 = vmatpush1.bf16.msra.mxu1 %v7428_v27  ;;  %v7503_v24 = vld [vmem:[%s11311_s1 + $0x264] ss:$16 sps:$4 sm:$0xff]   ;;  %v7506_v25 = vld [vmem:[%s11311_s1 + $0x26c] ss:$16 sps:$4 sm:$0xff]   ;;  %v7501_v26 = vld [vmem:[%s11311_s1 + $0x260] ss:$16 sps:$4 sm:$0xff]  }
  0x1c   :  { %4962 = vmatprep.subr.bf16.mxu0 %v7429_v28  ;;  %5495 = vmatprep.subr.bf16.mxu1 %v7431_v29  ;;  %v7504_v27 = vld [vmem:[%s11311_s1 + $0x268] ss:$16 sps:$4 sm:$0xff]   ;;  %v7509_v28 = vld [vmem:[%s11311_s1 + $0x284] ss:$16 sps:$4 sm:$0xff]   ;;  %v7512_v29 = vld [vmem:[%s11311_s1 + $0x28c] ss:$16 sps:$4 sm:$0xff]  }
  0x1d   :  { %v7521_v36 = vld [vmem:[%s11311_s1 + $0x2c4] ss:$16 sps:$4 sm:$0xff]   ;;  %v7524_v37 = vld [vmem:[%s11311_s1 + $0x2cc] ss:$16 sps:$4 sm:$0xff]   ;;  %v7519_v38 = vld [vmem:[%s11311_s1 + $0x2c0] ss:$16 sps:$4 sm:$0xff]  }
  0x1e   :  { %v7525_v43 = vld [vmem:[%s11311_s1 + $0x2e0] ss:$16 sps:$4 sm:$0xff]   ;;  %v7540_v54 = vld [vmem:[%s11311_s1 + $0x328] ss:$16 sps:$4 sm:$0xff]   ;;  %v7554_v60 = vld [vmem:[%s11311_s1 + $0x36c] ss:$16 sps:$4 sm:$0xff]  }
  0x1f   :  { %4963 = vmatpush1.bf16.msra.mxu0 %v7433_v30  ;;  %5496 = vmatpush1.bf16.msra.mxu1 %v7434_v31  ;;  %v7507_v30 = vld [vmem:[%s11311_s1 + $0x280] ss:$16 sps:$4 sm:$0xff]   ;;  %v7510_v31 = vld [vmem:[%s11311_s1 + $0x288] ss:$16 sps:$4 sm:$0xff]  }
  0x20   :  { %4964 = vmatprep.subr.bf16.mxu0 %v7435_v32  ;;  %5497 = vmatprep.subr.bf16.mxu1 %v7437_v33  ;;  %v7515_v32 = vld [vmem:[%s11311_s1 + $0x2a4] ss:$16 sps:$4 sm:$0xff]   ;;  %v7518_v33 = vld [vmem:[%s11311_s1 + $0x2ac] ss:$16 sps:$4 sm:$0xff]   ;;  %v7546_v58 = vld [vmem:[%s11311_s1 + $0x348] ss:$16 sps:$4 sm:$0xff]  }
  0x23   :  { %4965 = vmatpush1.bf16.msra.mxu0 %v7439_v34  ;;  %5498 = vmatpush1.bf16.msra.mxu1 %v7440_v35  ;;  %v7513_v34 = vld [vmem:[%s11311_s1 + $0x2a0] ss:$16 sps:$4 sm:$0xff]   ;;  %v7516_v35 = vld [vmem:[%s11311_s1 + $0x2a8] ss:$16 sps:$4 sm:$0xff]  }
  0x24   :  { %4966 = vmatprep.subr.bf16.mxu0 %v7441_v39  ;;  %5499 = vmatprep.subr.bf16.mxu1 %v7443_v40  ;;  %v7522_v39 = vld [vmem:[%s11311_s1 + $0x2c8] ss:$16 sps:$4 sm:$0xff]   ;;  %v7527_v40 = vld [vmem:[%s11311_s1 + $0x2e4] ss:$16 sps:$4 sm:$0xff]  }
  0x27   :  { %4967 = vmatpush1.bf16.msra.mxu0 %v7445_v41  ;;  %5500 = vmatpush1.bf16.msra.mxu1 %v7446_v44  ;;  %v7530_v41 = vld [vmem:[%s11311_s1 + $0x2ec] ss:$16 sps:$4 sm:$0xff]   ;;  %v7528_v44 = vld [vmem:[%s11311_s1 + $0x2e8] ss:$16 sps:$4 sm:$0xff]  }
  0x28   :  { %4968 = vmatprep.subr.bf16.mxu0 %v7447_v45  ;;  %5501 = vmatprep.subr.bf16.mxu1 %v7449_v46  ;;  %v7533_v45 = vld [vmem:[%s11311_s1 + $0x304] ss:$16 sps:$4 sm:$0xff]   ;;  %v7536_v46 = vld [vmem:[%s11311_s1 + $0x30c] ss:$16 sps:$4 sm:$0xff]  }
  0x2b   :  { %4969 = vmatpush1.bf16.msra.mxu0 %v7451_v47  ;;  %5502 = vmatpush1.bf16.msra.mxu1 %v7452_v48  ;;  %v7531_v47 = vld [vmem:[%s11311_s1 + $0x300] ss:$16 sps:$4 sm:$0xff]   ;;  %v7534_v48 = vld [vmem:[%s11311_s1 + $0x308] ss:$16 sps:$4 sm:$0xff]  }
  0x2c   :  { %4970 = vmatprep.subr.bf16.mxu0 %v7453_v50  ;;  %5503 = vmatprep.subr.bf16.mxu1 %v7455_v51  ;;  %v7539_v50 = vld [vmem:[%s11311_s1 + $0x324] ss:$16 sps:$4 sm:$0xff]   ;;  %v7542_v51 = vld [vmem:[%s11311_s1 + $0x32c] ss:$16 sps:$4 sm:$0xff]  }
  0x2f   :  { %4971 = vmatpush1.bf16.msra.mxu0 %v7457_v53  ;;  %5504 = vmatpush1.bf16.msra.mxu1 %v7458_v55  ;;  %v7537_v53 = vld [vmem:[%s11311_s1 + $0x320] ss:$16 sps:$4 sm:$0xff]   ;;  %v7545_v55 = vld [vmem:[%s11311_s1 + $0x344] ss:$16 sps:$4 sm:$0xff]  }
  0x30   :  { %4972 = vmatprep.subr.bf16.mxu0 %v7459_v56  ;;  %5505 = vmatprep.subr.bf16.mxu1 %v7461_v57  ;;  %v7548_v56 = vld [vmem:[%s11311_s1 + $0x34c] ss:$16 sps:$4 sm:$0xff]   ;;  %v7543_v57 = vld [vmem:[%s11311_s1 + $0x340] ss:$16 sps:$4 sm:$0xff]  }
  0x33   :  { %4973 = vmatpush1.bf16.msra.mxu0 %v7463_v59  ;;  %5506 = vmatpush1.bf16.msra.mxu1 %v7464_v61  ;;  %v7551_v59 = vld [vmem:[%s11311_s1 + $0x364] ss:$16 sps:$4 sm:$0xff]   ;;  %v7549_v61 = vld [vmem:[%s11311_s1 + $0x360] ss:$16 sps:$4 sm:$0xff]  }
  0x34   :  { %4974 = vmatprep.subr.bf16.mxu0 %v7465_v62  ;;  %5507 = vmatprep.subr.bf16.mxu1 %v7467_v63  ;;  %v7552_v62 = vld [vmem:[%s11311_s1 + $0x368] ss:$16 sps:$4 sm:$0xff]   ;;  %v7557_v63 = vld [vmem:[%s11311_s1 + $0x384] ss:$16 sps:$4 sm:$0xff]  }
  0x37   :  { %4975 = vmatpush1.bf16.msra.mxu0 %v7469_v0  ;;  %5508 = vmatpush1.bf16.msra.mxu1 %v7470_v1  ;;  %v7560_v0 = vld [vmem:[%s11311_s1 + $0x38c] ss:$16 sps:$4 sm:$0xff]   ;;  %v7555_v1 = vld [vmem:[%s11311_s1 + $0x380] ss:$16 sps:$4 sm:$0xff]  }
  0x38   :  { %4976 = vmatprep.subr.bf16.mxu0 %v7471_v2  ;;  %5509 = vmatprep.subr.bf16.mxu1 %v7473_v3  ;;  %v7558_v2 = vld [vmem:[%s11311_s1 + $0x388] ss:$16 sps:$4 sm:$0xff]   ;;  %v7563_v3 = vld [vmem:[%s11311_s1 + $0x3a4] ss:$16 sps:$4 sm:$0xff]  }
  0x3b   :  { %4977 = vmatpush1.bf16.msra.mxu0 %v7475_v4  ;;  %5510 = vmatpush1.bf16.msra.mxu1 %v7476_v5  ;;  %v7566_v4 = vld [vmem:[%s11311_s1 + $0x3ac] ss:$16 sps:$4 sm:$0xff]   ;;  %v7561_v5 = vld [vmem:[%s11311_s1 + $0x3a0] ss:$16 sps:$4 sm:$0xff]  }
  0x3c   :  { %4978 = vmatprep.subr.bf16.mxu0 %v7477_v6  ;;  %5511 = vmatprep.subr.bf16.mxu1 %v7479_v7  ;;  %v7564_v6 = vld [vmem:[%s11311_s1 + $0x3a8] ss:$16 sps:$4 sm:$0xff]   ;;  %v7569_v7 = vld [vmem:[%s11311_s1 + $0x3c4] ss:$16 sps:$4 sm:$0xff]  }
  0x3f   :  { %4979 = vmatpush1.bf16.msra.mxu0 %v7481_v8  ;;  %5512 = vmatpush1.bf16.msra.mxu1 %v7482_v9  ;;  %v7572_v8 = vld [vmem:[%s11311_s1 + $0x3cc] ss:$16 sps:$4 sm:$0xff]   ;;  %v839_v9 = vcombine.high %v8834_v52, %v8834_v52 }
  0x40   :  { %4989 = vmatprep.subr.bf16.mxu0 %v7485_v10  ;;  %5522 = vmatprep.subr.bf16.mxu1 %v7488_v11  ;;  %v7567_v10 = vld [vmem:[%s11311_s1 + $0x3c0] ss:$16 sps:$4 sm:$0xff]   ;;  %v7570_v11 = vld [vmem:[%s11311_s1 + $0x3c8] ss:$16 sps:$4 sm:$0xff]   ;;  %v7578_v52 = vld [vmem:[%s11311_s1 + $0x3ec] ss:$16 sps:$4 sm:$0xff]  }
  0x42   :  { %4981 = vmatmul.mubr.bf16.vlgmr.msra.gmra.mrb[0].mxu0 %v8903_v13  ;;  %5514 = vmatmul.mubr.bf16.vlgmr.msra.gmra.mrb[0].mxu1 %v8903_v13 }
  0x43   :  { %4990 = vmatpush1.bf16.msra.mxu0 %v7483_v12  ;;  %5523 = vmatpush1.bf16.msra.mxu1 %v7486_v14  ;;  %v7575_v12 = vld [vmem:[%s11311_s1 + $0x3e4] ss:$16 sps:$4 sm:$0xff]   ;;  %v9087_v14 = vrot.slane %v839_v9, %v8823_v49  ;;  %v7654_v9 = vld [vmem:[%s11311_s1 + $0x588] ss:$16 sps:$4 sm:$0xff]  }
  0x44   :  { %4991 = vmatprep.subr.bf16.mxu0 %v7491_v15  ;;  %5524 = vmatprep.subr.bf16.mxu1 %v7494_v16  ;;  %v7573_v15 = vld [vmem:[%s11311_s1 + $0x3e0] ss:$16 sps:$4 sm:$0xff]   ;;  %v7576_v16 = vld [vmem:[%s11311_s1 + $0x3e8] ss:$16 sps:$4 sm:$0xff]  }
  0x45   :  { %5021 = vmatprep.mubr.bf16.mxu0 %v886_v17  ;;  %5554 = vmatprep.mubr.bf16.mxu1 %v886_v17  ;;  %v7581_v17 = vld [vmem:[%s11311_s1 + $0x404] ss:$16 sps:$4 sm:$0xff]  }
  0x47   :  { %4992 = vmatpush1.bf16.msra.mxu0 %v7489_v18  ;;  %5525 = vmatpush1.bf16.msra.mxu1 %v7492_v19  ;;  %v7584_v18 = vld [vmem:[%s11311_s1 + $0x40c] ss:$16 sps:$4 sm:$0xff]   ;;  %v855_v19 = vcombine.high %v9087_v14, %v9087_v14 }
  0x48   :  { %4993 = vmatprep.subr.bf16.mxu0 %v7497_v20  ;;  %5526 = vmatprep.subr.bf16.mxu1 %v7500_v21  ;;  %v7579_v20 = vld [vmem:[%s11311_s1 + $0x400] ss:$16 sps:$4 sm:$0xff]   ;;  %v884_v21 = vcombine.high %v8903_v13, %v8903_v13 }
  0x49   :  { %v7585_v13 = vld [vmem:[%s11311_s1 + $0x420] ss:$16 sps:$4 sm:$0xff]  }
  0x4b   :  { %4994 = vmatpush1.bf16.msra.mxu0 %v7495_v22  ;;  %5527 = vmatpush1.bf16.msra.mxu1 %v7498_v23  ;;  %v7582_v22 = vld [vmem:[%s11311_s1 + $0x408] ss:$16 sps:$4 sm:$0xff]   ;;  %v7587_v23 = vld [vmem:[%s11311_s1 + $0x424] ss:$16 sps:$4 sm:$0xff]  }
  0x4c   :  { %4995 = vmatprep.subr.bf16.mxu0 %v7503_v24  ;;  %5528 = vmatprep.subr.bf16.mxu1 %v7506_v25  ;;  %v7590_v24 = vld [vmem:[%s11311_s1 + $0x42c] ss:$16 sps:$4 sm:$0xff]   ;;  %v9118_v25 = vrot.slane %v855_v19, %v8823_v49  ;;  %v7671_v19 = vld [vmem:[%s11311_s1 + $0x5e4] ss:$16 sps:$4 sm:$0xff]  }
  0x4f   :  { %4996 = vmatpush1.bf16.msra.mxu0 %v7501_v26  ;;  %5529 = vmatpush1.bf16.msra.mxu1 %v7504_v27  ;;  %v7588_v26 = vld [vmem:[%s11311_s1 + $0x428] ss:$16 sps:$4 sm:$0xff]   ;;  %v7593_v27 = vld [vmem:[%s11311_s1 + $0x444] ss:$16 sps:$4 sm:$0xff]  }
  0x50   :  { %4997 = vmatprep.subr.bf16.mxu0 %v7509_v28  ;;  %5530 = vmatprep.subr.bf16.mxu1 %v7512_v29  ;;  %v7596_v28 = vld [vmem:[%s11311_s1 + $0x44c] ss:$16 sps:$4 sm:$0xff]   ;;  %v7591_v29 = vld [vmem:[%s11311_s1 + $0x440] ss:$16 sps:$4 sm:$0xff]  }
  0x53   :  { %4998 = vmatpush1.bf16.msra.mxu0 %v7507_v30  ;;  %5531 = vmatpush1.bf16.msra.mxu1 %v7510_v31  ;;  %v7594_v30 = vld [vmem:[%s11311_s1 + $0x448] ss:$16 sps:$4 sm:$0xff]   ;;  %v7599_v31 = vld [vmem:[%s11311_s1 + $0x464] ss:$16 sps:$4 sm:$0xff]  }
  0x54   :  { %4999 = vmatprep.subr.bf16.mxu0 %v7515_v32  ;;  %5532 = vmatprep.subr.bf16.mxu1 %v7518_v33  ;;  %v7602_v32 = vld [vmem:[%s11311_s1 + $0x46c] ss:$16 sps:$4 sm:$0xff]   ;;  %v7597_v33 = vld [vmem:[%s11311_s1 + $0x460] ss:$16 sps:$4 sm:$0xff]  }
  0x57   :  { %5000 = vmatpush1.bf16.msra.mxu0 %v7513_v34  ;;  %5533 = vmatpush1.bf16.msra.mxu1 %v7516_v35  ;;  %v7600_v34 = vld [vmem:[%s11311_s1 + $0x468] ss:$16 sps:$4 sm:$0xff]   ;;  %v7605_v35 = vld [vmem:[%s11311_s1 + $0x484] ss:$16 sps:$4 sm:$0xff]  }
  0x58   :  { %5001 = vmatprep.subr.bf16.mxu0 %v7521_v36  ;;  %5534 = vmatprep.subr.bf16.mxu1 %v7524_v37  ;;  %v7608_v36 = vld [vmem:[%s11311_s1 + $0x48c] ss:$16 sps:$4 sm:$0xff]   ;;  %v7603_v37 = vld [vmem:[%s11311_s1 + $0x480] ss:$16 sps:$4 sm:$0xff]  }
  0x5b   :  { %5002 = vmatpush1.bf16.msra.mxu0 %v7519_v38  ;;  %5535 = vmatpush1.bf16.msra.mxu1 %v7522_v39  ;;  %v7606_v38 = vld [vmem:[%s11311_s1 + $0x488] ss:$16 sps:$4 sm:$0xff]   ;;  %v7611_v39 = vld [vmem:[%s11311_s1 + $0x4a4] ss:$16 sps:$4 sm:$0xff]  }
  0x5c   :  { %5003 = vmatprep.subr.bf16.mxu0 %v7527_v40  ;;  %5536 = vmatprep.subr.bf16.mxu1 %v7530_v41  ;;  %v7614_v40 = vld [vmem:[%s11311_s1 + $0x4ac] ss:$16 sps:$4 sm:$0xff]   ;;  %v7609_v41 = vld [vmem:[%s11311_s1 + $0x4a0] ss:$16 sps:$4 sm:$0xff]  }
  0x5f   :  { %5004 = vmatpush1.bf16.msra.mxu0 %v7525_v43  ;;  %5537 = vmatpush1.bf16.msra.mxu1 %v7528_v44  ;;  %v7612_v43 = vld [vmem:[%s11311_s1 + $0x4a8] ss:$16 sps:$4 sm:$0xff]   ;;  %v7617_v44 = vld [vmem:[%s11311_s1 + $0x4c4] ss:$16 sps:$4 sm:$0xff]  }
  0x60   :  { %5005 = vmatprep.subr.bf16.mxu0 %v7533_v45  ;;  %5538 = vmatprep.subr.bf16.mxu1 %v7536_v46  ;;  %v7620_v45 = vld [vmem:[%s11311_s1 + $0x4cc] ss:$16 sps:$4 sm:$0xff]   ;;  %v7615_v46 = vld [vmem:[%s11311_s1 + $0x4c0] ss:$16 sps:$4 sm:$0xff]  }
  0x63   :  { %5006 = vmatpush1.bf16.msra.mxu0 %v7531_v47  ;;  %5539 = vmatpush1.bf16.msra.mxu1 %v7534_v48  ;;  %v7618_v47 = vld [vmem:[%s11311_s1 + $0x4c8] ss:$16 sps:$4 sm:$0xff]   ;;  %v7623_v48 = vld [vmem:[%s11311_s1 + $0x4e4] ss:$16 sps:$4 sm:$0xff]  }
  0x64   :  { %5007 = vmatprep.subr.bf16.mxu0 %v7539_v50  ;;  %5540 = vmatprep.subr.bf16.mxu1 %v7542_v51  ;;  %v7626_v50 = vld [vmem:[%s11311_s1 + $0x4ec] ss:$16 sps:$4 sm:$0xff]   ;;  %v7621_v51 = vld [vmem:[%s11311_s1 + $0x4e0] ss:$16 sps:$4 sm:$0xff]  }
  0x67   :  { %5008 = vmatpush1.bf16.msra.mxu0 %v7537_v53  ;;  %5541 = vmatpush1.bf16.msra.mxu1 %v7540_v54  ;;  %v7624_v53 = vld [vmem:[%s11311_s1 + $0x4e8] ss:$16 sps:$4 sm:$0xff]   ;;  %v7629_v54 = vld [vmem:[%s11311_s1 + $0x504] ss:$16 sps:$4 sm:$0xff]  }
  0x68   :  { %5009 = vmatprep.subr.bf16.mxu0 %v7545_v55  ;;  %5542 = vmatprep.subr.bf16.mxu1 %v7548_v56  ;;  %v7632_v55 = vld [vmem:[%s11311_s1 + $0x50c] ss:$16 sps:$4 sm:$0xff]   ;;  %v7627_v56 = vld [vmem:[%s11311_s1 + $0x500] ss:$16 sps:$4 sm:$0xff]  }
  0x6b   :  { %5010 = vmatpush1.bf16.msra.mxu0 %v7543_v57  ;;  %5543 = vmatpush1.bf16.msra.mxu1 %v7546_v58  ;;  %v7630_v57 = vld [vmem:[%s11311_s1 + $0x508] ss:$16 sps:$4 sm:$0xff]   ;;  %v7635_v58 = vld [vmem:[%s11311_s1 + $0x524] ss:$16 sps:$4 sm:$0xff]  }
  0x6c   :  { %5011 = vmatprep.subr.bf16.mxu0 %v7551_v59  ;;  %5544 = vmatprep.subr.bf16.mxu1 %v7554_v60  ;;  %v7638_v59 = vld [vmem:[%s11311_s1 + $0x52c] ss:$16 sps:$4 sm:$0xff]   ;;  %v7633_v60 = vld [vmem:[%s11311_s1 + $0x520] ss:$16 sps:$4 sm:$0xff]  }
  0x6f   :  { %5012 = vmatpush1.bf16.msra.mxu0 %v7549_v61  ;;  %5545 = vmatpush1.bf16.msra.mxu1 %v7552_v62  ;;  %v7636_v61 = vld [vmem:[%s11311_s1 + $0x528] ss:$16 sps:$4 sm:$0xff]   ;;  %v7641_v62 = vld [vmem:[%s11311_s1 + $0x544] ss:$16 sps:$4 sm:$0xff]  }
  0x70   :  { %5013 = vmatprep.subr.bf16.mxu0 %v7557_v63  ;;  %5546 = vmatprep.subr.bf16.mxu1 %v7560_v0  ;;  %v7644_v63 = vld [vmem:[%s11311_s1 + $0x54c] ss:$16 sps:$4 sm:$0xff]   ;;  %v7639_v0 = vld [vmem:[%s11311_s1 + $0x540] ss:$16 sps:$4 sm:$0xff]  }
  0x73   :  { %5014 = vmatpush1.bf16.msra.mxu0 %v7555_v1  ;;  %5547 = vmatpush1.bf16.msra.mxu1 %v7558_v2  ;;  %v7642_v1 = vld [vmem:[%s11311_s1 + $0x548] ss:$16 sps:$4 sm:$0xff]   ;;  %v7647_v2 = vld [vmem:[%s11311_s1 + $0x564] ss:$16 sps:$4 sm:$0xff]  }
  0x74   :  { %5015 = vmatprep.subr.bf16.mxu0 %v7563_v3  ;;  %5548 = vmatprep.subr.bf16.mxu1 %v7566_v4  ;;  %v7650_v3 = vld [vmem:[%s11311_s1 + $0x56c] ss:$16 sps:$4 sm:$0xff]   ;;  %v7645_v4 = vld [vmem:[%s11311_s1 + $0x560] ss:$16 sps:$4 sm:$0xff]  }
  0x77   :  { %5016 = vmatpush1.bf16.msra.mxu0 %v7561_v5  ;;  %5549 = vmatpush1.bf16.msra.mxu1 %v7564_v6  ;;  %v7648_v5 = vld [vmem:[%s11311_s1 + $0x568] ss:$16 sps:$4 sm:$0xff]   ;;  %v7653_v6 = vld [vmem:[%s11311_s1 + $0x584] ss:$16 sps:$4 sm:$0xff]  }
  0x78   :  { %5017 = vmatprep.subr.bf16.mxu0 %v7569_v7  ;;  %5550 = vmatprep.subr.bf16.mxu1 %v7572_v8  ;;  %v7656_v7 = vld [vmem:[%s11311_s1 + $0x58c] ss:$16 sps:$4 sm:$0xff]   ;;  %v7651_v8 = vld [vmem:[%s11311_s1 + $0x580] ss:$16 sps:$4 sm:$0xff]  }
  0x7b   :  { %5018 = vmatpush1.bf16.msra.mxu0 %v7567_v10  ;;  %5551 = vmatpush1.bf16.msra.mxu1 %v7570_v11  ;;  %v7659_v10 = vld [vmem:[%s11311_s1 + $0x5a4] ss:$16 sps:$4 sm:$0xff]   ;;  %v7662_v11 = vld [vmem:[%s11311_s1 + $0x5ac] ss:$16 sps:$4 sm:$0xff]  }
  0x7c   :  { %5019 = vmatprep.subr.bf16.mxu0 %v7575_v12  ;;  %5552 = vmatprep.subr.bf16.mxu1 %v7578_v52  ;;  %v7657_v12 = vld [vmem:[%s11311_s1 + $0x5a0] ss:$16 sps:$4 sm:$0xff]   ;;  %v7660_v52 = vld [vmem:[%s11311_s1 + $0x5a8] ss:$16 sps:$4 sm:$0xff]  }
  0x7f   :  { %5020 = vmatpush1.bf16.msra.mxu0 %v7573_v15  ;;  %5553 = vmatpush1.bf16.msra.mxu1 %v7576_v16  ;;  %v7665_v15 = vld [vmem:[%s11311_s1 + $0x5c4] ss:$16 sps:$4 sm:$0xff]   ;;  %v7668_v16 = vld [vmem:[%s11311_s1 + $0x5cc] ss:$16 sps:$4 sm:$0xff]  }
  0x80   :  { %5030 = vmatprep.subr.bf16.mxu0 %v7581_v17  ;;  %5563 = vmatprep.subr.bf16.mxu1 %v7584_v18  ;;  %v7663_v17 = vld [vmem:[%s11311_s1 + $0x5c0] ss:$16 sps:$4 sm:$0xff]   ;;  %v7666_v18 = vld [vmem:[%s11311_s1 + $0x5c8] ss:$16 sps:$4 sm:$0xff]  }
  0x82   :  { %5022 = vmatmul.mubr.bf16.vlgmr.msra.gmra.mrb[0].mxu0 %v884_v21  ;;  %5555 = vmatmul.mubr.bf16.vlgmr.msra.gmra.mrb[0].mxu1 %v884_v21  ;;  %v7669_v21 = vld [vmem:[%s11311_s1 + $0x5e0] ss:$16 sps:$4 sm:$0xff]  }
  0x83   :  { %5031 = vmatpush1.bf16.msra.mxu0 %v7579_v20  ;;  %5564 = vmatpush1.bf16.msra.mxu1 %v7582_v22  ;;  %v7674_v20 = vld [vmem:[%s11311_s1 + $0x5ec] ss:$16 sps:$4 sm:$0xff]   ;;  %v7672_v22 = vld [vmem:[%s11311_s1 + $0x5e8] ss:$16 sps:$4 sm:$0xff]  }
  0x84   :  { %5032 = vmatprep.subr.bf16.mxu0 %v7587_v23  ;;  %5565 = vmatprep.subr.bf16.mxu1 %v7590_v24  ;;  %v7678_v23 = vld [vmem:[%s11311_s1 + $0x604] ss:$16 sps:$4 sm:$0xff]   ;;  %v7681_v24 = vld [vmem:[%s11311_s1 + $0x60c] ss:$16 sps:$4 sm:$0xff]  }
  0x85   :  { %5062 = vmatprep.mubr.bf16.mxu0 %v9118_v25  ;;  %5595 = vmatprep.mubr.bf16.mxu1 %v9118_v25 }
  0x87   :  { %5033 = vmatpush1.bf16.msra.mxu0 %v7585_v13  ;;  %5566 = vmatpush1.bf16.msra.mxu1 %v7588_v26  ;;  %v7676_v13 = vld [vmem:[%s11311_s1 + $0x600] ss:$16 sps:$4 sm:$0xff]   ;;  %v9307_v26 = vrot.slane %v9087_v14, %v8823_v49  ;;  %v887_v14 = vcombine.high %v9118_v25, %v9118_v25  ;;  %v7690_v25 = vld [vmem:[%s11311_s1 + $0x644] ss:$16 sps:$4 sm:$0xff]  }
  0x88   :  { %5034 = vmatprep.subr.bf16.mxu0 %v7593_v27  ;;  %5567 = vmatprep.subr.bf16.mxu1 %v7596_v28  ;;  %v7679_v27 = vld [vmem:[%s11311_s1 + $0x608] ss:$16 sps:$4 sm:$0xff]   ;;  %v7684_v28 = vld [vmem:[%s11311_s1 + $0x624] ss:$16 sps:$4 sm:$0xff]  }
  0x8b   :  { %5035 = vmatpush1.bf16.msra.mxu0 %v7591_v29  ;;  %5568 = vmatpush1.bf16.msra.mxu1 %v7594_v30  ;;  %v7687_v29 = vld [vmem:[%s11311_s1 + $0x62c] ss:$16 sps:$4 sm:$0xff]   ;;  %v7682_v30 = vld [vmem:[%s11311_s1 + $0x620] ss:$16 sps:$4 sm:$0xff]  }
  0x8c   :  { %5036 = vmatprep.subr.bf16.mxu0 %v7599_v31  ;;  %5569 = vmatprep.subr.bf16.mxu1 %v7602_v32  ;;  %v7685_v31 = vld [vmem:[%s11311_s1 + $0x628] ss:$16 sps:$4 sm:$0xff]   ;;  %v7693_v32 = vld [vmem:[%s11311_s1 + $0x64c] ss:$16 sps:$4 sm:$0xff]  }
  0x8f   :  { %5037 = vmatpush1.bf16.msra.mxu0 %v7597_v33  ;;  %5570 = vmatpush1.bf16.msra.mxu1 %v7600_v34  ;;  %v7688_v33 = vld [vmem:[%s11311_s1 + $0x640] ss:$16 sps:$4 sm:$0xff]   ;;  %v7691_v34 = vld [vmem:[%s11311_s1 + $0x648] ss:$16 sps:$4 sm:$0xff]  }
  0x90   :  { %5038 = vmatprep.subr.bf16.mxu0 %v7605_v35  ;;  %5571 = vmatprep.subr.bf16.mxu1 %v7608_v36  ;;  %v7696_v35 = vld [vmem:[%s11311_s1 + $0x664] ss:$16 sps:$4 sm:$0xff]   ;;  %v7699_v36 = vld [vmem:[%s11311_s1 + $0x66c] ss:$16 sps:$4 sm:$0xff]  }
  0x93   :  { %5039 = vmatpush1.bf16.msra.mxu0 %v7603_v37  ;;  %5572 = vmatpush1.bf16.msra.mxu1 %v7606_v38  ;;  %v7694_v37 = vld [vmem:[%s11311_s1 + $0x660] ss:$16 sps:$4 sm:$0xff]   ;;  %v7697_v38 = vld [vmem:[%s11311_s1 + $0x668] ss:$16 sps:$4 sm:$0xff]  }
  0x94   :  { %5040 = vmatprep.subr.bf16.mxu0 %v7611_v39  ;;  %5573 = vmatprep.subr.bf16.mxu1 %v7614_v40  ;;  %v7702_v39 = vld [vmem:[%s11311_s1 + $0x684] ss:$16 sps:$4 sm:$0xff]   ;;  %v7705_v40 = vld [vmem:[%s11311_s1 + $0x68c] ss:$16 sps:$4 sm:$0xff]  }
  0x97   :  { %5041 = vmatpush1.bf16.msra.mxu0 %v7609_v41  ;;  %5574 = vmatpush1.bf16.msra.mxu1 %v7612_v43  ;;  %v7700_v41 = vld [vmem:[%s11311_s1 + $0x680] ss:$16 sps:$4 sm:$0xff]   ;;  %v7703_v43 = vld [vmem:[%s11311_s1 + $0x688] ss:$16 sps:$4 sm:$0xff]  }
  0x98   :  { %5042 = vmatprep.subr.bf16.mxu0 %v7617_v44  ;;  %5575 = vmatprep.subr.bf16.mxu1 %v7620_v45  ;;  %v7708_v44 = vld [vmem:[%s11311_s1 + $0x6a4] ss:$16 sps:$4 sm:$0xff]   ;;  %v7711_v45 = vld [vmem:[%s11311_s1 + $0x6ac] ss:$16 sps:$4 sm:$0xff]  }
  0x9b   :  { %5043 = vmatpush1.bf16.msra.mxu0 %v7615_v46  ;;  %5576 = vmatpush1.bf16.msra.mxu1 %v7618_v47  ;;  %v7706_v46 = vld [vmem:[%s11311_s1 + $0x6a0] ss:$16 sps:$4 sm:$0xff]   ;;  %v7709_v47 = vld [vmem:[%s11311_s1 + $0x6a8] ss:$16 sps:$4 sm:$0xff]  }
  0x9c   :  { %5044 = vmatprep.subr.bf16.mxu0 %v7623_v48  ;;  %5577 = vmatprep.subr.bf16.mxu1 %v7626_v50  ;;  %v7714_v48 = vld [vmem:[%s11311_s1 + $0x6c4] ss:$16 sps:$4 sm:$0xff]   ;;  %v7717_v50 = vld [vmem:[%s11311_s1 + $0x6cc] ss:$16 sps:$4 sm:$0xff]  }
  0x9f   :  { %5045 = vmatpush1.bf16.msra.mxu0 %v7621_v51  ;;  %5578 = vmatpush1.bf16.msra.mxu1 %v7624_v53  ;;  %v7712_v51 = vld [vmem:[%s11311_s1 + $0x6c0] ss:$16 sps:$4 sm:$0xff]   ;;  %v7715_v53 = vld [vmem:[%s11311_s1 + $0x6c8] ss:$16 sps:$4 sm:$0xff]  }
  0xa0   :  { %5046 = vmatprep.subr.bf16.mxu0 %v7629_v54  ;;  %5579 = vmatprep.subr.bf16.mxu1 %v7632_v55  ;;  %v7720_v54 = vld [vmem:[%s11311_s1 + $0x6e4] ss:$16 sps:$4 sm:$0xff]   ;;  %v7723_v55 = vld [vmem:[%s11311_s1 + $0x6ec] ss:$16 sps:$4 sm:$0xff]  }
  0xa3   :  { %5047 = vmatpush1.bf16.msra.mxu0 %v7627_v56  ;;  %5580 = vmatpush1.bf16.msra.mxu1 %v7630_v57  ;;  %v7718_v56 = vld [vmem:[%s11311_s1 + $0x6e0] ss:$16 sps:$4 sm:$0xff]   ;;  %v7721_v57 = vld [vmem:[%s11311_s1 + $0x6e8] ss:$16 sps:$4 sm:$0xff]  }
  0xa4   :  { %5048 = vmatprep.subr.bf16.mxu0 %v7635_v58  ;;  %5581 = vmatprep.subr.bf16.mxu1 %v7638_v59  ;;  %v7726_v58 = vld [vmem:[%s11311_s1 + $0x704] ss:$16 sps:$4 sm:$0xff]   ;;  %v7729_v59 = vld [vmem:[%s11311_s1 + $0x70c] ss:$16 sps:$4 sm:$0xff]  }
  0xa7   :  { %5049 = vmatpush1.bf16.msra.mxu0 %v7633_v60  ;;  %5582 = vmatpush1.bf16.msra.mxu1 %v7636_v61  ;;  %v7724_v60 = vld [vmem:[%s11311_s1 + $0x700] ss:$16 sps:$4 sm:$0xff]   ;;  %v7727_v61 = vld [vmem:[%s11311_s1 + $0x708] ss:$16 sps:$4 sm:$0xff]  }
  0xa8   :  { %5050 = vmatprep.subr.bf16.mxu0 %v7641_v62  ;;  %5583 = vmatprep.subr.bf16.mxu1 %v7644_v63  ;;  %v7732_v62 = vld [vmem:[%s11311_s1 + $0x724] ss:$16 sps:$4 sm:$0xff]   ;;  %v7735_v63 = vld [vmem:[%s11311_s1 + $0x72c] ss:$16 sps:$4 sm:$0xff]  }
  0xab   :  { %5051 = vmatpush1.bf16.msra.mxu0 %v7639_v0  ;;  %5584 = vmatpush1.bf16.msra.mxu1 %v7642_v1  ;;  %v7730_v0 = vld [vmem:[%s11311_s1 + $0x720] ss:$16 sps:$4 sm:$0xff]   ;;  %v7733_v1 = vld [vmem:[%s11311_s1 + $0x728] ss:$16 sps:$4 sm:$0xff]  }
  0xac   :  { %5052 = vmatprep.subr.bf16.mxu0 %v7647_v2  ;;  %5585 = vmatprep.subr.bf16.mxu1 %v7650_v3  ;;  %v7738_v2 = vld [vmem:[%s11311_s1 + $0x744] ss:$16 sps:$4 sm:$0xff]   ;;  %v7741_v3 = vld [vmem:[%s11311_s1 + $0x74c] ss:$16 sps:$4 sm:$0xff]  }
  0xaf   :  { %5053 = vmatpush1.bf16.msra.mxu0 %v7645_v4  ;;  %5586 = vmatpush1.bf16.msra.mxu1 %v7648_v5  ;;  %v7736_v4 = vld [vmem:[%s11311_s1 + $0x740] ss:$16 sps:$4 sm:$0xff]   ;;  %v7739_v5 = vld [vmem:[%s11311_s1 + $0x748] ss:$16 sps:$4 sm:$0xff]  }
  0xb0   :  { %5054 = vmatprep.subr.bf16.mxu0 %v7653_v6  ;;  %5587 = vmatprep.subr.bf16.mxu1 %v7656_v7  ;;  %v7744_v6 = vld [vmem:[%s11311_s1 + $0x764] ss:$16 sps:$4 sm:$0xff]   ;;  %v7747_v7 = vld [vmem:[%s11311_s1 + $0x76c] ss:$16 sps:$4 sm:$0xff]  }
  0xb3   :  { %5055 = vmatpush1.bf16.msra.mxu0 %v7651_v8  ;;  %5588 = vmatpush1.bf16.msra.mxu1 %v7654_v9  ;;  %v7742_v8 = vld [vmem:[%s11311_s1 + $0x760] ss:$16 sps:$4 sm:$0xff]   ;;  %v7745_v9 = vld [vmem:[%s11311_s1 + $0x768] ss:$16 sps:$4 sm:$0xff]  }
  0xb4   :  { %5056 = vmatprep.subr.bf16.mxu0 %v7659_v10  ;;  %5589 = vmatprep.subr.bf16.mxu1 %v7662_v11  ;;  %v7750_v10 = vld [vmem:[%s11311_s1 + $0x784] ss:$16 sps:$4 sm:$0xff]   ;;  %v7753_v11 = vld [vmem:[%s11311_s1 + $0x78c] ss:$16 sps:$4 sm:$0xff]  }
  0xb7   :  { %5057 = vmatpush1.bf16.msra.mxu0 %v7657_v12  ;;  %5590 = vmatpush1.bf16.msra.mxu1 %v7660_v52  ;;  %v7748_v12 = vld [vmem:[%s11311_s1 + $0x780] ss:$16 sps:$4 sm:$0xff]   ;;  %v7751_v52 = vld [vmem:[%s11311_s1 + $0x788] ss:$16 sps:$4 sm:$0xff]  }
  0xb8   :  { %5058 = vmatprep.subr.bf16.mxu0 %v7665_v15  ;;  %5591 = vmatprep.subr.bf16.mxu1 %v7668_v16  ;;  %v7756_v15 = vld [vmem:[%s11311_s1 + $0x7a4] ss:$16 sps:$4 sm:$0xff]   ;;  %v7759_v16 = vld [vmem:[%s11311_s1 + $0x7ac] ss:$16 sps:$4 sm:$0xff]  }
  0xbb   :  { %5059 = vmatpush1.bf16.msra.mxu0 %v7663_v17  ;;  %5592 = vmatpush1.bf16.msra.mxu1 %v7666_v18  ;;  %v7754_v17 = vld [vmem:[%s11311_s1 + $0x7a0] ss:$16 sps:$4 sm:$0xff]   ;;  %v7757_v18 = vld [vmem:[%s11311_s1 + $0x7a8] ss:$16 sps:$4 sm:$0xff]  }
  0xbc   :  { %5060 = vmatprep.subr.bf16.mxu0 %v7671_v19  ;;  %5593 = vmatprep.subr.bf16.mxu1 %v7674_v20  ;;  %v7762_v19 = vld [vmem:[%s11311_s1 + $0x7c4] ss:$16 sps:$4 sm:$0xff]   ;;  %v7765_v20 = vld [vmem:[%s11311_s1 + $0x7cc] ss:$16 sps:$4 sm:$0xff]  }
  0xbf   :  { %5061 = vmatpush1.bf16.msra.mxu0 %v7669_v21  ;;  %5594 = vmatpush1.bf16.msra.mxu1 %v7672_v22  ;;  %v9481_v21 = vld.sshfl [vmem:[%s11310_s0 + $0x8] sm:$0xff pattern:$0x75316420]  ;;  %v7760_v22 = vld [vmem:[%s11311_s1 + $0x7c0] ss:$16 sps:$4 sm:$0xff]  }
  0xc0   :  { %5071 = vmatprep.subr.bf16.mxu0 %v7678_v23  ;;  %5604 = vmatprep.subr.bf16.mxu1 %v7681_v24  ;;  %v7763_v23 = vld [vmem:[%s11311_s1 + $0x7c8] ss:$16 sps:$4 sm:$0xff]   ;;  %v7768_v24 = vld [vmem:[%s11311_s1 + $0x7e4] ss:$16 sps:$4 sm:$0xff]  }
  0xc2   :  { %5063 = vmatmul.mubr.bf16.vlgmr.msra.gmra.mrb[0].mxu0 %v9307_v26  ;;  %5596 = vmatmul.mubr.bf16.vlgmr.msra.gmra.mrb[0].mxu1 %v9307_v26 }
  0xc3   :  { %5072 = vmatpush1.bf16.msra.mxu0 %v7676_v13  ;;  %5605 = vmatpush1.bf16.msra.mxu1 %v7679_v27  ;;  %v7771_v13 = vld [vmem:[%s11311_s1 + $0x7ec] ss:$16 sps:$4 sm:$0xff]   ;;  %v7766_v27 = vld [vmem:[%s11311_s1 + $0x7e0] ss:$16 sps:$4 sm:$0xff]  }
  0xc4   :  { %5073 = vmatprep.subr.bf16.mxu0 %v7684_v28  ;;  %5606 = vmatprep.subr.bf16.mxu1 %v7687_v29  ;;  %v7769_v28 = vld [vmem:[%s11311_s1 + $0x7e8] ss:$16 sps:$4 sm:$0xff]   ;;  %v7774_v29 = vld [vmem:[%s11311_s1 + $0x804] ss:$16 sps:$4 sm:$0xff]  }
  0xc5   :  { %5103 = vmatprep.mubr.bf16.mxu0 %v887_v14  ;;  %5636 = vmatprep.mubr.bf16.mxu1 %v887_v14  ;;  %v7777_v14 = vld [vmem:[%s11311_s1 + $0x80c] ss:$16 sps:$4 sm:$0xff]  }
  0xc7   :  { %5074 = vmatpush1.bf16.msra.mxu0 %v7682_v30  ;;  %5607 = vmatpush1.bf16.msra.mxu1 %v7685_v31  ;;  %v903_v30 = vcombine.high %v9481_v21, %v9481_v21  ;;  %v885_v31 = vcombine.high %v9307_v26, %v9307_v26  ;;  %v7783_v26 = vld [vmem:[%s11311_s1 + $0x82c] ss:$16 sps:$4 sm:$0xff]  }
  0xc8   :  { %5075 = vmatprep.subr.bf16.mxu0 %v7690_v25  ;;  %5608 = vmatprep.subr.bf16.mxu1 %v7693_v32  ;;  %v7772_v25 = vld [vmem:[%s11311_s1 + $0x800] ss:$16 sps:$4 sm:$0xff]   ;;  %v7775_v32 = vld [vmem:[%s11311_s1 + $0x808] ss:$16 sps:$4 sm:$0xff]  }
  0xcb   :  { %5076 = vmatpush1.bf16.msra.mxu0 %v7688_v33  ;;  %5609 = vmatpush1.bf16.msra.mxu1 %v7691_v34  ;;  %v7780_v33 = vld [vmem:[%s11311_s1 + $0x824] ss:$16 sps:$4 sm:$0xff]   ;;  %v9524_v34 = vrot.slane %v903_v30, %v8823_v49 }
  0xcc   :  { %5077 = vmatprep.subr.bf16.mxu0 %v7696_v35  ;;  %5610 = vmatprep.subr.bf16.mxu1 %v7699_v36  ;;  %v7778_v35 = vld [vmem:[%s11311_s1 + $0x820] ss:$16 sps:$4 sm:$0xff]   ;;  %v7781_v36 = vld [vmem:[%s11311_s1 + $0x828] ss:$16 sps:$4 sm:$0xff]   ;;  %v7864_v30 = vld [vmem:[%s11311_s1 + $0x9e4] ss:$16 sps:$4 sm:$0xff]  }
  0xcf   :  { %5078 = vmatpush1.bf16.msra.mxu0 %v7694_v37  ;;  %5611 = vmatpush1.bf16.msra.mxu1 %v7697_v38  ;;  %v7786_v37 = vld [vmem:[%s11311_s1 + $0x844] ss:$16 sps:$4 sm:$0xff]   ;;  %v7789_v38 = vld [vmem:[%s11311_s1 + $0x84c] ss:$16 sps:$4 sm:$0xff]  }
  0xd0   :  { %5079 = vmatprep.subr.bf16.mxu0 %v7702_v39  ;;  %5612 = vmatprep.subr.bf16.mxu1 %v7705_v40  ;;  %v7784_v39 = vld [vmem:[%s11311_s1 + $0x840] ss:$16 sps:$4 sm:$0xff]   ;;  %v7787_v40 = vld [vmem:[%s11311_s1 + $0x848] ss:$16 sps:$4 sm:$0xff]  }
  0xd3   :  { %5080 = vmatpush1.bf16.msra.mxu0 %v7700_v41  ;;  %5613 = vmatpush1.bf16.msra.mxu1 %v7703_v43  ;;  %v7792_v41 = vld [vmem:[%s11311_s1 + $0x864] ss:$16 sps:$4 sm:$0xff]   ;;  %v7795_v43 = vld [vmem:[%s11311_s1 + $0x86c] ss:$16 sps:$4 sm:$0xff]  }
  0xd4   :  { %5081 = vmatprep.subr.bf16.mxu0 %v7708_v44  ;;  %5614 = vmatprep.subr.bf16.mxu1 %v7711_v45  ;;  %v7790_v44 = vld [vmem:[%s11311_s1 + $0x860] ss:$16 sps:$4 sm:$0xff]   ;;  %v7793_v45 = vld [vmem:[%s11311_s1 + $0x868] ss:$16 sps:$4 sm:$0xff]  }
  0xd7   :  { %5082 = vmatpush1.bf16.msra.mxu0 %v7706_v46  ;;  %5615 = vmatpush1.bf16.msra.mxu1 %v7709_v47  ;;  %v7798_v46 = vld [vmem:[%s11311_s1 + $0x884] ss:$16 sps:$4 sm:$0xff]   ;;  %v7801_v47 = vld [vmem:[%s11311_s1 + $0x88c] ss:$16 sps:$4 sm:$0xff]  }
  0xd8   :  { %5083 = vmatprep.subr.bf16.mxu0 %v7714_v48  ;;  %5616 = vmatprep.subr.bf16.mxu1 %v7717_v50  ;;  %v7796_v48 = vld [vmem:[%s11311_s1 + $0x880] ss:$16 sps:$4 sm:$0xff]   ;;  %v7799_v50 = vld [vmem:[%s11311_s1 + $0x888] ss:$16 sps:$4 sm:$0xff]  }
  0xdb   :  { %5084 = vmatpush1.bf16.msra.mxu0 %v7712_v51  ;;  %5617 = vmatpush1.bf16.msra.mxu1 %v7715_v53  ;;  %v7804_v51 = vld [vmem:[%s11311_s1 + $0x8a4] ss:$16 sps:$4 sm:$0xff]   ;;  %v7807_v53 = vld [vmem:[%s11311_s1 + $0x8ac] ss:$16 sps:$4 sm:$0xff]  }
  0xdc   :  { %5085 = vmatprep.subr.bf16.mxu0 %v7720_v54  ;;  %5618 = vmatprep.subr.bf16.mxu1 %v7723_v55  ;;  %v7802_v54 = vld [vmem:[%s11311_s1 + $0x8a0] ss:$16 sps:$4 sm:$0xff]   ;;  %v7805_v55 = vld [vmem:[%s11311_s1 + $0x8a8] ss:$16 sps:$4 sm:$0xff]  }
  0xdf   :  { %5086 = vmatpush1.bf16.msra.mxu0 %v7718_v56  ;;  %5619 = vmatpush1.bf16.msra.mxu1 %v7721_v57  ;;  %v7810_v56 = vld [vmem:[%s11311_s1 + $0x8c4] ss:$16 sps:$4 sm:$0xff]   ;;  %v7813_v57 = vld [vmem:[%s11311_s1 + $0x8cc] ss:$16 sps:$4 sm:$0xff]  }
  0xe0   :  { %5087 = vmatprep.subr.bf16.mxu0 %v7726_v58  ;;  %5620 = vmatprep.subr.bf16.mxu1 %v7729_v59  ;;  %v7808_v58 = vld [vmem:[%s11311_s1 + $0x8c0] ss:$16 sps:$4 sm:$0xff]   ;;  %v7811_v59 = vld [vmem:[%s11311_s1 + $0x8c8] ss:$16 sps:$4 sm:$0xff]  }
  0xe3   :  { %5088 = vmatpush1.bf16.msra.mxu0 %v7724_v60  ;;  %5621 = vmatpush1.bf16.msra.mxu1 %v7727_v61  ;;  %v7816_v60 = vld [vmem:[%s11311_s1 + $0x8e4] ss:$16 sps:$4 sm:$0xff]   ;;  %v7819_v61 = vld [vmem:[%s11311_s1 + $0x8ec] ss:$16 sps:$4 sm:$0xff]  }
  0xe4   :  { %5089 = vmatprep.subr.bf16.mxu0 %v7732_v62  ;;  %5622 = vmatprep.subr.bf16.mxu1 %v7735_v63  ;;  %v7814_v62 = vld [vmem:[%s11311_s1 + $0x8e0] ss:$16 sps:$4 sm:$0xff]   ;;  %v7817_v63 = vld [vmem:[%s11311_s1 + $0x8e8] ss:$16 sps:$4 sm:$0xff]  }
  0xe7   :  { %5090 = vmatpush1.bf16.msra.mxu0 %v7730_v0  ;;  %5623 = vmatpush1.bf16.msra.mxu1 %v7733_v1  ;;  %v7822_v0 = vld [vmem:[%s11311_s1 + $0x904] ss:$16 sps:$4 sm:$0xff]   ;;  %v7825_v1 = vld [vmem:[%s11311_s1 + $0x90c] ss:$16 sps:$4 sm:$0xff]  }
  0xe8   :  { %5091 = vmatprep.subr.bf16.mxu0 %v7738_v2  ;;  %5624 = vmatprep.subr.bf16.mxu1 %v7741_v3  ;;  %v7820_v2 = vld [vmem:[%s11311_s1 + $0x900] ss:$16 sps:$4 sm:$0xff]   ;;  %v7823_v3 = vld [vmem:[%s11311_s1 + $0x908] ss:$16 sps:$4 sm:$0xff]  }
  0xeb   :  { %5092 = vmatpush1.bf16.msra.mxu0 %v7736_v4  ;;  %5625 = vmatpush1.bf16.msra.mxu1 %v7739_v5  ;;  %v7828_v4 = vld [vmem:[%s11311_s1 + $0x924] ss:$16 sps:$4 sm:$0xff]   ;;  %v7831_v5 = vld [vmem:[%s11311_s1 + $0x92c] ss:$16 sps:$4 sm:$0xff]  }
  0xec   :  { %5093 = vmatprep.subr.bf16.mxu0 %v7744_v6  ;;  %5626 = vmatprep.subr.bf16.mxu1 %v7747_v7  ;;  %v7826_v6 = vld [vmem:[%s11311_s1 + $0x920] ss:$16 sps:$4 sm:$0xff]   ;;  %v7829_v7 = vld [vmem:[%s11311_s1 + $0x928] ss:$16 sps:$4 sm:$0xff]  }
  0xef   :  { %5094 = vmatpush1.bf16.msra.mxu0 %v7742_v8  ;;  %5627 = vmatpush1.bf16.msra.mxu1 %v7745_v9  ;;  %v7834_v8 = vld [vmem:[%s11311_s1 + $0x944] ss:$16 sps:$4 sm:$0xff]   ;;  %v7837_v9 = vld [vmem:[%s11311_s1 + $0x94c] ss:$16 sps:$4 sm:$0xff]  }
  0xf0   :  { %5095 = vmatprep.subr.bf16.mxu0 %v7750_v10  ;;  %5628 = vmatprep.subr.bf16.mxu1 %v7753_v11  ;;  %v7832_v10 = vld [vmem:[%s11311_s1 + $0x940] ss:$16 sps:$4 sm:$0xff]   ;;  %v7835_v11 = vld [vmem:[%s11311_s1 + $0x948] ss:$16 sps:$4 sm:$0xff]  }
  0xf3   :  { %5096 = vmatpush1.bf16.msra.mxu0 %v7748_v12  ;;  %5629 = vmatpush1.bf16.msra.mxu1 %v7751_v52  ;;  %v7840_v12 = vld [vmem:[%s11311_s1 + $0x964] ss:$16 sps:$4 sm:$0xff]   ;;  %v7843_v52 = vld [vmem:[%s11311_s1 + $0x96c] ss:$16 sps:$4 sm:$0xff]  }
  0xf4   :  { %5097 = vmatprep.subr.bf16.mxu0 %v7756_v15  ;;  %5630 = vmatprep.subr.bf16.mxu1 %v7759_v16  ;;  %v7838_v15 = vld [vmem:[%s11311_s1 + $0x960] ss:$16 sps:$4 sm:$0xff]   ;;  %v7841_v16 = vld [vmem:[%s11311_s1 + $0x968] ss:$16 sps:$4 sm:$0xff]  }
  0xf7   :  { %5098 = vmatpush1.bf16.msra.mxu0 %v7754_v17  ;;  %5631 = vmatpush1.bf16.msra.mxu1 %v7757_v18  ;;  %v7846_v17 = vld [vmem:[%s11311_s1 + $0x984] ss:$16 sps:$4 sm:$0xff]   ;;  %v7849_v18 = vld [vmem:[%s11311_s1 + $0x98c] ss:$16 sps:$4 sm:$0xff]  }
  0xf8   :  { %5099 = vmatprep.subr.bf16.mxu0 %v7762_v19  ;;  %5632 = vmatprep.subr.bf16.mxu1 %v7765_v20  ;;  %v7844_v19 = vld [vmem:[%s11311_s1 + $0x980] ss:$16 sps:$4 sm:$0xff]   ;;  %v7847_v20 = vld [vmem:[%s11311_s1 + $0x988] ss:$16 sps:$4 sm:$0xff]  }
  0xfb   :  { %5100 = vmatpush1.bf16.msra.mxu0 %v7760_v22  ;;  %5633 = vmatpush1.bf16.msra.mxu1 %v7763_v23  ;;  %v7852_v22 = vld [vmem:[%s11311_s1 + $0x9a4] ss:$16 sps:$4 sm:$0xff]   ;;  %v7855_v23 = vld [vmem:[%s11311_s1 + $0x9ac] ss:$16 sps:$4 sm:$0xff]  }
  0xfc   :  { %5101 = vmatprep.subr.bf16.mxu0 %v7768_v24  ;;  %5634 = vmatprep.subr.bf16.mxu1 %v7771_v13  ;;  %v7850_v24 = vld [vmem:[%s11311_s1 + $0x9a0] ss:$16 sps:$4 sm:$0xff]   ;;  %v7853_v13 = vld [vmem:[%s11311_s1 + $0x9a8] ss:$16 sps:$4 sm:$0xff]  }
  0xff   :  { %5102 = vmatpush1.bf16.msra.mxu0 %v7766_v27  ;;  %5635 = vmatpush1.bf16.msra.mxu1 %v7769_v28  ;;  %v7858_v27 = vld [vmem:[%s11311_s1 + $0x9c4] ss:$16 sps:$4 sm:$0xff]   ;;  %v7861_v28 = vld [vmem:[%s11311_s1 + $0x9cc] ss:$16 sps:$4 sm:$0xff]  }
 0x100   :  { %5112 = vmatprep.subr.bf16.mxu0 %v7774_v29  ;;  %5645 = vmatprep.subr.bf16.mxu1 %v7777_v14  ;;  %v7856_v29 = vld [vmem:[%s11311_s1 + $0x9c0] ss:$16 sps:$4 sm:$0xff]   ;;  %v7859_v14 = vld [vmem:[%s11311_s1 + $0x9c8] ss:$16 sps:$4 sm:$0xff]  }
 0x102   :  { %5104 = vmatmul.mubr.bf16.vlgmr.msra.gmra.mrb[0].mxu0 %v885_v31  ;;  %5637 = vmatmul.mubr.bf16.vlgmr.msra.gmra.mrb[0].mxu1 %v885_v31  ;;  %v7867_v31 = vld [vmem:[%s11311_s1 + $0x9ec] ss:$16 sps:$4 sm:$0xff]  }
 0x103   :  { %5113 = vmatpush1.bf16.msra.mxu0 %v7772_v25  ;;  %5646 = vmatpush1.bf16.msra.mxu1 %v7775_v32  ;;  %v7862_v25 = vld [vmem:[%s11311_s1 + $0x9e0] ss:$16 sps:$4 sm:$0xff]   ;;  %v7865_v32 = vld [vmem:[%s11311_s1 + $0x9e8] ss:$16 sps:$4 sm:$0xff]  }
 0x104   :  { %5114 = vmatprep.subr.bf16.mxu0 %v7780_v33  ;;  %5647 = vmatprep.subr.bf16.mxu1 %v7783_v26  ;;  %v7870_v33 = vld [vmem:[%s11311_s1 + $0xa04] ss:$16 sps:$4 sm:$0xff]   ;;  %v7873_v26 = vld [vmem:[%s11311_s1 + $0xa0c] ss:$16 sps:$4 sm:$0xff]  }
 0x105   :  { %5144 = vmatprep.mubr.bf16.mxu0 %v9524_v34  ;;  %5677 = vmatprep.mubr.bf16.mxu1 %v9524_v34 }
 0x107   :  { %5115 = vmatpush1.bf16.msra.mxu0 %v7778_v35  ;;  %5648 = vmatpush1.bf16.msra.mxu1 %v7781_v36  ;;  %v9710_v35 = vrot.slane %v9481_v21, %v8823_v49  ;;  %v7868_v36 = vld [vmem:[%s11311_s1 + $0xa00] ss:$16 sps:$4 sm:$0xff]   ;;  %v7879_v21 = vld [vmem:[%s11311_s1 + $0xa2c] ss:$16 sps:$4 sm:$0xff]  }
 0x108   :  { %5116 = vmatprep.subr.bf16.mxu0 %v7786_v37  ;;  %5649 = vmatprep.subr.bf16.mxu1 %v7789_v38  ;;  %v7871_v37 = vld [vmem:[%s11311_s1 + $0xa08] ss:$16 sps:$4 sm:$0xff]   ;;  %v7876_v38 = vld [vmem:[%s11311_s1 + $0xa24] ss:$16 sps:$4 sm:$0xff]  }
 0x10b   :  { %5117 = vmatpush1.bf16.msra.mxu0 %v7784_v39  ;;  %5650 = vmatpush1.bf16.msra.mxu1 %v7787_v40  ;;  %v935_v39 = vcombine.high %v9524_v34, %v9524_v34  ;;  %v7874_v40 = vld [vmem:[%s11311_s1 + $0xa20] ss:$16 sps:$4 sm:$0xff]   ;;  %v7882_v34 = vld [vmem:[%s11311_s1 + $0xa44] ss:$16 sps:$4 sm:$0xff]  }
 0x10c   :  { %5118 = vmatprep.subr.bf16.mxu0 %v7792_v41  ;;  %5651 = vmatprep.subr.bf16.mxu1 %v7795_v43  ;;  %v7877_v41 = vld [vmem:[%s11311_s1 + $0xa28] ss:$16 sps:$4 sm:$0xff]   ;;  %v7885_v43 = vld [vmem:[%s11311_s1 + $0xa4c] ss:$16 sps:$4 sm:$0xff]  }
 0x10f   :  { %5119 = vmatpush1.bf16.msra.mxu0 %v7790_v44  ;;  %5652 = vmatpush1.bf16.msra.mxu1 %v7793_v45  ;;  %v7880_v44 = vld [vmem:[%s11311_s1 + $0xa40] ss:$16 sps:$4 sm:$0xff]   ;;  %v7883_v45 = vld [vmem:[%s11311_s1 + $0xa48] ss:$16 sps:$4 sm:$0xff]  }
 0x110   :  { %5120 = vmatprep.subr.bf16.mxu0 %v7798_v46  ;;  %5653 = vmatprep.subr.bf16.mxu1 %v7801_v47  ;;  %v7888_v46 = vld [vmem:[%s11311_s1 + $0xa64] ss:$16 sps:$4 sm:$0xff]   ;;  %v7891_v47 = vld [vmem:[%s11311_s1 + $0xa6c] ss:$16 sps:$4 sm:$0xff]  }
 0x113   :  { %5121 = vmatpush1.bf16.msra.mxu0 %v7796_v48  ;;  %5654 = vmatpush1.bf16.msra.mxu1 %v7799_v50  ;;  %v7886_v48 = vld [vmem:[%s11311_s1 + $0xa60] ss:$16 sps:$4 sm:$0xff]   ;;  %v7889_v50 = vld [vmem:[%s11311_s1 + $0xa68] ss:$16 sps:$4 sm:$0xff]  }
 0x114   :  { %5122 = vmatprep.subr.bf16.mxu0 %v7804_v51  ;;  %5655 = vmatprep.subr.bf16.mxu1 %v7807_v53  ;;  %v7894_v51 = vld [vmem:[%s11311_s1 + $0xa84] ss:$16 sps:$4 sm:$0xff]   ;;  %v7897_v53 = vld [vmem:[%s11311_s1 + $0xa8c] ss:$16 sps:$4 sm:$0xff]  }
 0x117   :  { %5123 = vmatpush1.bf16.msra.mxu0 %v7802_v54  ;;  %5656 = vmatpush1.bf16.msra.mxu1 %v7805_v55  ;;  %v7892_v54 = vld [vmem:[%s11311_s1 + $0xa80] ss:$16 sps:$4 sm:$0xff]   ;;  %v7895_v55 = vld [vmem:[%s11311_s1 + $0xa88] ss:$16 sps:$4 sm:$0xff]  }
 0x118   :  { %5124 = vmatprep.subr.bf16.mxu0 %v7810_v56  ;;  %5657 = vmatprep.subr.bf16.mxu1 %v7813_v57  ;;  %v7900_v56 = vld [vmem:[%s11311_s1 + $0xaa4] ss:$16 sps:$4 sm:$0xff]   ;;  %v7903_v57 = vld [vmem:[%s11311_s1 + $0xaac] ss:$16 sps:$4 sm:$0xff]  }
 0x11b   :  { %5125 = vmatpush1.bf16.msra.mxu0 %v7808_v58  ;;  %5658 = vmatpush1.bf16.msra.mxu1 %v7811_v59  ;;  %v7898_v58 = vld [vmem:[%s11311_s1 + $0xaa0] ss:$16 sps:$4 sm:$0xff]   ;;  %v7901_v59 = vld [vmem:[%s11311_s1 + $0xaa8] ss:$16 sps:$4 sm:$0xff]  }
 0x11c   :  { %5126 = vmatprep.subr.bf16.mxu0 %v7816_v60  ;;  %5659 = vmatprep.subr.bf16.mxu1 %v7819_v61  ;;  %v7906_v60 = vld [vmem:[%s11311_s1 + $0xac4] ss:$16 sps:$4 sm:$0xff]   ;;  %v7909_v61 = vld [vmem:[%s11311_s1 + $0xacc] ss:$16 sps:$4 sm:$0xff]  }
 0x11f   :  { %5127 = vmatpush1.bf16.msra.mxu0 %v7814_v62  ;;  %5660 = vmatpush1.bf16.msra.mxu1 %v7817_v63  ;;  %v7904_v62 = vld [vmem:[%s11311_s1 + $0xac0] ss:$16 sps:$4 sm:$0xff]   ;;  %v7907_v63 = vld [vmem:[%s11311_s1 + $0xac8] ss:$16 sps:$4 sm:$0xff]  }
 0x120   :  { %5128 = vmatprep.subr.bf16.mxu0 %v7822_v0  ;;  %5661 = vmatprep.subr.bf16.mxu1 %v7825_v1  ;;  %v7912_v0 = vld [vmem:[%s11311_s1 + $0xae4] ss:$16 sps:$4 sm:$0xff]   ;;  %v7915_v1 = vld [vmem:[%s11311_s1 + $0xaec] ss:$16 sps:$4 sm:$0xff]  }
 0x123   :  { %5129 = vmatpush1.bf16.msra.mxu0 %v7820_v2  ;;  %5662 = vmatpush1.bf16.msra.mxu1 %v7823_v3  ;;  %v7910_v2 = vld [vmem:[%s11311_s1 + $0xae0] ss:$16 sps:$4 sm:$0xff]   ;;  %v7913_v3 = vld [vmem:[%s11311_s1 + $0xae8] ss:$16 sps:$4 sm:$0xff]  }
 0x124   :  { %5130 = vmatprep.subr.bf16.mxu0 %v7828_v4  ;;  %5663 = vmatprep.subr.bf16.mxu1 %v7831_v5  ;;  %v7918_v4 = vld [vmem:[%s11311_s1 + $0xb04] ss:$16 sps:$4 sm:$0xff]   ;;  %v7921_v5 = vld [vmem:[%s11311_s1 + $0xb0c] ss:$16 sps:$4 sm:$0xff]  }
 0x127   :  { %5131 = vmatpush1.bf16.msra.mxu0 %v7826_v6  ;;  %5664 = vmatpush1.bf16.msra.mxu1 %v7829_v7  ;;  %v7916_v6 = vld [vmem:[%s11311_s1 + $0xb00] ss:$16 sps:$4 sm:$0xff]   ;;  %v7919_v7 = vld [vmem:[%s11311_s1 + $0xb08] ss:$16 sps:$4 sm:$0xff]  }
 0x128   :  { %5132 = vmatprep.subr.bf16.mxu0 %v7834_v8  ;;  %5665 = vmatprep.subr.bf16.mxu1 %v7837_v9  ;;  %v7924_v8 = vld [vmem:[%s11311_s1 + $0xb24] ss:$16 sps:$4 sm:$0xff]   ;;  %v7927_v9 = vld [vmem:[%s11311_s1 + $0xb2c] ss:$16 sps:$4 sm:$0xff]  }
 0x12b   :  { %5133 = vmatpush1.bf16.msra.mxu0 %v7832_v10  ;;  %5666 = vmatpush1.bf16.msra.mxu1 %v7835_v11  ;;  %v7922_v10 = vld [vmem:[%s11311_s1 + $0xb20] ss:$16 sps:$4 sm:$0xff]   ;;  %v7925_v11 = vld [vmem:[%s11311_s1 + $0xb28] ss:$16 sps:$4 sm:$0xff]  }
 0x12c   :  { %5134 = vmatprep.subr.bf16.mxu0 %v7840_v12  ;;  %5667 = vmatprep.subr.bf16.mxu1 %v7843_v52  ;;  %v7930_v12 = vld [vmem:[%s11311_s1 + $0xb44] ss:$16 sps:$4 sm:$0xff]   ;;  %v7933_v52 = vld [vmem:[%s11311_s1 + $0xb4c] ss:$16 sps:$4 sm:$0xff]  }
 0x12f   :  { %5135 = vmatpush1.bf16.msra.mxu0 %v7838_v15  ;;  %5668 = vmatpush1.bf16.msra.mxu1 %v7841_v16  ;;  %v7928_v15 = vld [vmem:[%s11311_s1 + $0xb40] ss:$16 sps:$4 sm:$0xff]   ;;  %v7931_v16 = vld [vmem:[%s11311_s1 + $0xb48] ss:$16 sps:$4 sm:$0xff]  }
 0x130   :  { %5136 = vmatprep.subr.bf16.mxu0 %v7846_v17  ;;  %5669 = vmatprep.subr.bf16.mxu1 %v7849_v18  ;;  %v7936_v17 = vld [vmem:[%s11311_s1 + $0xb64] ss:$16 sps:$4 sm:$0xff]   ;;  %v7939_v18 = vld [vmem:[%s11311_s1 + $0xb6c] ss:$16 sps:$4 sm:$0xff]  }
 0x133   :  { %5137 = vmatpush1.bf16.msra.mxu0 %v7844_v19  ;;  %5670 = vmatpush1.bf16.msra.mxu1 %v7847_v20  ;;  %v7934_v19 = vld [vmem:[%s11311_s1 + $0xb60] ss:$16 sps:$4 sm:$0xff]   ;;  %v7937_v20 = vld [vmem:[%s11311_s1 + $0xb68] ss:$16 sps:$4 sm:$0xff]  }
 0x134   :  { %5138 = vmatprep.subr.bf16.mxu0 %v7852_v22  ;;  %5671 = vmatprep.subr.bf16.mxu1 %v7855_v23  ;;  %v7942_v22 = vld [vmem:[%s11311_s1 + $0xb84] ss:$16 sps:$4 sm:$0xff]   ;;  %v7945_v23 = vld [vmem:[%s11311_s1 + $0xb8c] ss:$16 sps:$4 sm:$0xff]  }
 0x137   :  { %5139 = vmatpush1.bf16.msra.mxu0 %v7850_v24  ;;  %5672 = vmatpush1.bf16.msra.mxu1 %v7853_v13  ;;  %v7940_v24 = vld [vmem:[%s11311_s1 + $0xb80] ss:$16 sps:$4 sm:$0xff]   ;;  %v7943_v13 = vld [vmem:[%s11311_s1 + $0xb88] ss:$16 sps:$4 sm:$0xff]  }
 0x138   :  { %5140 = vmatprep.subr.bf16.mxu0 %v7858_v27  ;;  %5673 = vmatprep.subr.bf16.mxu1 %v7861_v28  ;;  %v7948_v27 = vld [vmem:[%s11311_s1 + $0xba4] ss:$16 sps:$4 sm:$0xff]   ;;  %v7951_v28 = vld [vmem:[%s11311_s1 + $0xbac] ss:$16 sps:$4 sm:$0xff]  }
 0x13b   :  { %5141 = vmatpush1.bf16.msra.mxu0 %v7856_v29  ;;  %5674 = vmatpush1.bf16.msra.mxu1 %v7859_v14  ;;  %v7946_v29 = vld [vmem:[%s11311_s1 + $0xba0] ss:$16 sps:$4 sm:$0xff]   ;;  %v7949_v14 = vld [vmem:[%s11311_s1 + $0xba8] ss:$16 sps:$4 sm:$0xff]  }
 0x13c   :  { %5142 = vmatprep.subr.bf16.mxu0 %v7864_v30  ;;  %5675 = vmatprep.subr.bf16.mxu1 %v7867_v31  ;;  %v7954_v30 = vld [vmem:[%s11311_s1 + $0xbc4] ss:$16 sps:$4 sm:$0xff]   ;;  %v7957_v31 = vld [vmem:[%s11311_s1 + $0xbcc] ss:$16 sps:$4 sm:$0xff]  }
 0x13f   :  { %5143 = vmatpush1.bf16.msra.mxu0 %v7862_v25  ;;  %5676 = vmatpush1.bf16.msra.mxu1 %v7865_v32  ;;  %v8598_v25 = vld [vmem:[%s11310_s0 + $0x8] sm:$0xff] }
 0x140   :  { %5153 = vmatprep.subr.bf16.mxu0 %v7870_v33  ;;  %5686 = vmatprep.subr.bf16.mxu1 %v7873_v26  ;;  %v888_v32 = vcombine.high %v8598_v25, %v8598_v25  ;;  %v7952_v33 = vld [vmem:[%s11311_s1 + $0xbc0] ss:$16 sps:$4 sm:$0xff]   ;;  %v7955_v26 = vld [vmem:[%s11311_s1 + $0xbc8] ss:$16 sps:$4 sm:$0xff]  }
 0x141   :  { %v8036_v25 = vld [vmem:[%s11311_s1 + $0xd80] ss:$16 sps:$4 sm:$0xff]  }
 0x142   :  { %5145 = vmatmul.mubr.bf16.vlgmr.msra.gmra.mrb[0].mxu0 %v9710_v35  ;;  %5678 = vmatmul.mubr.bf16.vlgmr.msra.gmra.mrb[0].mxu1 %v9710_v35 }
 0x143   :  { %5154 = vmatpush1.bf16.msra.mxu0 %v7868_v36  ;;  %5687 = vmatpush1.bf16.msra.mxu1 %v7871_v37  ;;  %v7960_v36 = vld [vmem:[%s11311_s1 + $0xbe4] ss:$16 sps:$4 sm:$0xff]   ;;  %v7963_v37 = vld [vmem:[%s11311_s1 + $0xbec] ss:$16 sps:$4 sm:$0xff]  }
 0x144   :  { %5155 = vmatprep.subr.bf16.mxu0 %v7876_v38  ;;  %5688 = vmatprep.subr.bf16.mxu1 %v7879_v21  ;;  %v9900_v38 = vrot.slane %v888_v32, %v8823_v49  ;;  %v7958_v21 = vld [vmem:[%s11311_s1 + $0xbe0] ss:$16 sps:$4 sm:$0xff]   ;;  %v8039_v32 = vld [vmem:[%s11311_s1 + $0xd88] ss:$16 sps:$4 sm:$0xff]  }
 0x145   :  { %5185 = vmatprep.mubr.bf16.mxu0 %v935_v39  ;;  %5718 = vmatprep.mubr.bf16.mxu1 %v935_v39  ;;  %v7961_v39 = vld [vmem:[%s11311_s1 + $0xbe8] ss:$16 sps:$4 sm:$0xff]  }
 0x147   :  { %5156 = vmatpush1.bf16.msra.mxu0 %v7874_v40  ;;  %5689 = vmatpush1.bf16.msra.mxu1 %v7877_v41  ;;  %v7966_v40 = vld [vmem:[%s11311_s1 + $0xc04] ss:$16 sps:$4 sm:$0xff]   ;;  %v7969_v41 = vld [vmem:[%s11311_s1 + $0xc0c] ss:$16 sps:$4 sm:$0xff]  }
 0x148   :  { %5157 = vmatprep.subr.bf16.mxu0 %v7882_v34  ;;  %5690 = vmatprep.subr.bf16.mxu1 %v7885_v43  ;;  %v904_v34 = vcombine.high %v9900_v38, %v9900_v38  ;;  %v933_v43 = vcombine.high %v9710_v35, %v9710_v35  ;;  %v7975_v35 = vld [vmem:[%s11311_s1 + $0xc2c] ss:$16 sps:$4 sm:$0xff]  }
 0x14b   :  { %5158 = vmatpush1.bf16.msra.mxu0 %v7880_v44  ;;  %5691 = vmatpush1.bf16.msra.mxu1 %v7883_v45  ;;  %v7964_v44 = vld [vmem:[%s11311_s1 + $0xc00] ss:$16 sps:$4 sm:$0xff]   ;;  %v7967_v45 = vld [vmem:[%s11311_s1 + $0xc08] ss:$16 sps:$4 sm:$0xff]  }
 0x14c   :  { %5159 = vmatprep.subr.bf16.mxu0 %v7888_v46  ;;  %5692 = vmatprep.subr.bf16.mxu1 %v7891_v47  ;;  %v7972_v46 = vld [vmem:[%s11311_s1 + $0xc24] ss:$16 sps:$4 sm:$0xff]   ;;  %v9931_v47 = vrot.slane %v904_v34, %v8823_v49 }
 0x14d   :  { %v8056_v34 = vld [vmem:[%s11311_s1 + $0xde4] ss:$16 sps:$4 sm:$0xff]  }
 0x14f   :  { %5160 = vmatpush1.bf16.msra.mxu0 %v7886_v48  ;;  %5693 = vmatpush1.bf16.msra.mxu1 %v7889_v50  ;;  %v7970_v48 = vld [vmem:[%s11311_s1 + $0xc20] ss:$16 sps:$4 sm:$0xff]   ;;  %v7973_v50 = vld [vmem:[%s11311_s1 + $0xc28] ss:$16 sps:$4 sm:$0xff]  }
 0x150   :  { %5161 = vmatprep.subr.bf16.mxu0 %v7894_v51  ;;  %5694 = vmatprep.subr.bf16.mxu1 %v7897_v53  ;;  %v7978_v51 = vld [vmem:[%s11311_s1 + $0xc44] ss:$16 sps:$4 sm:$0xff]   ;;  %v7981_v53 = vld [vmem:[%s11311_s1 + $0xc4c] ss:$16 sps:$4 sm:$0xff]  }
 0x153   :  { %5162 = vmatpush1.bf16.msra.mxu0 %v7892_v54  ;;  %5695 = vmatpush1.bf16.msra.mxu1 %v7895_v55  ;;  %v7976_v54 = vld [vmem:[%s11311_s1 + $0xc40] ss:$16 sps:$4 sm:$0xff]   ;;  %v7979_v55 = vld [vmem:[%s11311_s1 + $0xc48] ss:$16 sps:$4 sm:$0xff]  }
 0x154   :  { %5163 = vmatprep.subr.bf16.mxu0 %v7900_v56  ;;  %5696 = vmatprep.subr.bf16.mxu1 %v7903_v57  ;;  %v7984_v56 = vld [vmem:[%s11311_s1 + $0xc64] ss:$16 sps:$4 sm:$0xff]   ;;  %v7987_v57 = vld [vmem:[%s11311_s1 + $0xc6c] ss:$16 sps:$4 sm:$0xff]  }
 0x157   :  { %5164 = vmatpush1.bf16.msra.mxu0 %v7898_v58  ;;  %5697 = vmatpush1.bf16.msra.mxu1 %v7901_v59  ;;  %v7982_v58 = vld [vmem:[%s11311_s1 + $0xc60] ss:$16 sps:$4 sm:$0xff]   ;;  %v7985_v59 = vld [vmem:[%s11311_s1 + $0xc68] ss:$16 sps:$4 sm:$0xff]  }
 0x158   :  { %5165 = vmatprep.subr.bf16.mxu0 %v7906_v60  ;;  %5698 = vmatprep.subr.bf16.mxu1 %v7909_v61  ;;  %v7990_v60 = vld [vmem:[%s11311_s1 + $0xc84] ss:$16 sps:$4 sm:$0xff]   ;;  %v7993_v61 = vld [vmem:[%s11311_s1 + $0xc8c] ss:$16 sps:$4 sm:$0xff]  }
 0x15b   :  { %5166 = vmatpush1.bf16.msra.mxu0 %v7904_v62  ;;  %5699 = vmatpush1.bf16.msra.mxu1 %v7907_v63  ;;  %v7988_v62 = vld [vmem:[%s11311_s1 + $0xc80] ss:$16 sps:$4 sm:$0xff]   ;;  %v7991_v63 = vld [vmem:[%s11311_s1 + $0xc88] ss:$16 sps:$4 sm:$0xff]  }
 0x15c   :  { %5167 = vmatprep.subr.bf16.mxu0 %v7912_v0  ;;  %5700 = vmatprep.subr.bf16.mxu1 %v7915_v1  ;;  %v7996_v0 = vld [vmem:[%s11311_s1 + $0xca4] ss:$16 sps:$4 sm:$0xff]   ;;  %v7999_v1 = vld [vmem:[%s11311_s1 + $0xcac] ss:$16 sps:$4 sm:$0xff]  }
 0x15f   :  { %5168 = vmatpush1.bf16.msra.mxu0 %v7910_v2  ;;  %5701 = vmatpush1.bf16.msra.mxu1 %v7913_v3  ;;  %v7994_v2 = vld [vmem:[%s11311_s1 + $0xca0] ss:$16 sps:$4 sm:$0xff]   ;;  %v7997_v3 = vld [vmem:[%s11311_s1 + $0xca8] ss:$16 sps:$4 sm:$0xff]  }
 0x160   :  { %5169 = vmatprep.subr.bf16.mxu0 %v7918_v4  ;;  %5702 = vmatprep.subr.bf16.mxu1 %v7921_v5  ;;  %v8002_v4 = vld [vmem:[%s11311_s1 + $0xcc4] ss:$16 sps:$4 sm:$0xff]   ;;  %v8005_v5 = vld [vmem:[%s11311_s1 + $0xccc] ss:$16 sps:$4 sm:$0xff]  }
 0x163   :  { %5170 = vmatpush1.bf16.msra.mxu0 %v7916_v6  ;;  %5703 = vmatpush1.bf16.msra.mxu1 %v7919_v7  ;;  %v8000_v6 = vld [vmem:[%s11311_s1 + $0xcc0] ss:$16 sps:$4 sm:$0xff]   ;;  %v8003_v7 = vld [vmem:[%s11311_s1 + $0xcc8] ss:$16 sps:$4 sm:$0xff]  }
 0x164   :  { %5171 = vmatprep.subr.bf16.mxu0 %v7924_v8  ;;  %5704 = vmatprep.subr.bf16.mxu1 %v7927_v9  ;;  %v8008_v8 = vld [vmem:[%s11311_s1 + $0xce4] ss:$16 sps:$4 sm:$0xff]   ;;  %v8011_v9 = vld [vmem:[%s11311_s1 + $0xcec] ss:$16 sps:$4 sm:$0xff]  }
 0x167   :  { %5172 = vmatpush1.bf16.msra.mxu0 %v7922_v10  ;;  %5705 = vmatpush1.bf16.msra.mxu1 %v7925_v11  ;;  %v8006_v10 = vld [vmem:[%s11311_s1 + $0xce0] ss:$16 sps:$4 sm:$0xff]   ;;  %v8009_v11 = vld [vmem:[%s11311_s1 + $0xce8] ss:$16 sps:$4 sm:$0xff]  }
 0x168   :  { %5173 = vmatprep.subr.bf16.mxu0 %v7930_v12  ;;  %5706 = vmatprep.subr.bf16.mxu1 %v7933_v52  ;;  %v8014_v12 = vld [vmem:[%s11311_s1 + $0xd04] ss:$16 sps:$4 sm:$0xff]   ;;  %v8017_v52 = vld [vmem:[%s11311_s1 + $0xd0c] ss:$16 sps:$4 sm:$0xff]  }
 0x16b   :  { %5174 = vmatpush1.bf16.msra.mxu0 %v7928_v15  ;;  %5707 = vmatpush1.bf16.msra.mxu1 %v7931_v16  ;;  %v8012_v15 = vld [vmem:[%s11311_s1 + $0xd00] ss:$16 sps:$4 sm:$0xff]   ;;  %v8015_v16 = vld [vmem:[%s11311_s1 + $0xd08] ss:$16 sps:$4 sm:$0xff]  }
 0x16c   :  { %5175 = vmatprep.subr.bf16.mxu0 %v7936_v17  ;;  %5708 = vmatprep.subr.bf16.mxu1 %v7939_v18  ;;  %v8020_v17 = vld [vmem:[%s11311_s1 + $0xd24] ss:$16 sps:$4 sm:$0xff]   ;;  %v8023_v18 = vld [vmem:[%s11311_s1 + $0xd2c] ss:$16 sps:$4 sm:$0xff]  }
 0x16f   :  { %5176 = vmatpush1.bf16.msra.mxu0 %v7934_v19  ;;  %5709 = vmatpush1.bf16.msra.mxu1 %v7937_v20  ;;  %v8018_v19 = vld [vmem:[%s11311_s1 + $0xd20] ss:$16 sps:$4 sm:$0xff]   ;;  %v8021_v20 = vld [vmem:[%s11311_s1 + $0xd28] ss:$16 sps:$4 sm:$0xff]  }
 0x170   :  { %5177 = vmatprep.subr.bf16.mxu0 %v7942_v22  ;;  %5710 = vmatprep.subr.bf16.mxu1 %v7945_v23  ;;  %v8026_v22 = vld [vmem:[%s11311_s1 + $0xd44] ss:$16 sps:$4 sm:$0xff]   ;;  %v8029_v23 = vld [vmem:[%s11311_s1 + $0xd4c] ss:$16 sps:$4 sm:$0xff]  }
 0x173   :  { %5178 = vmatpush1.bf16.msra.mxu0 %v7940_v24  ;;  %5711 = vmatpush1.bf16.msra.mxu1 %v7943_v13  ;;  %v8024_v24 = vld [vmem:[%s11311_s1 + $0xd40] ss:$16 sps:$4 sm:$0xff]   ;;  %v8027_v13 = vld [vmem:[%s11311_s1 + $0xd48] ss:$16 sps:$4 sm:$0xff]  }
 0x174   :  { %5179 = vmatprep.subr.bf16.mxu0 %v7948_v27  ;;  %5712 = vmatprep.subr.bf16.mxu1 %v7951_v28  ;;  %v8032_v27 = vld [vmem:[%s11311_s1 + $0xd64] ss:$16 sps:$4 sm:$0xff]   ;;  %v8035_v28 = vld [vmem:[%s11311_s1 + $0xd6c] ss:$16 sps:$4 sm:$0xff]  }
 0x177   :  { %5180 = vmatpush1.bf16.msra.mxu0 %v7946_v29  ;;  %5713 = vmatpush1.bf16.msra.mxu1 %v7949_v14  ;;  %v8030_v29 = vld [vmem:[%s11311_s1 + $0xd60] ss:$16 sps:$4 sm:$0xff]   ;;  %v8033_v14 = vld [vmem:[%s11311_s1 + $0xd68] ss:$16 sps:$4 sm:$0xff]  }
 0x178   :  { %5181 = vmatprep.subr.bf16.mxu0 %v7954_v30  ;;  %5714 = vmatprep.subr.bf16.mxu1 %v7957_v31  ;;  %v8038_v30 = vld [vmem:[%s11311_s1 + $0xd84] ss:$16 sps:$4 sm:$0xff]   ;;  %v8041_v31 = vld [vmem:[%s11311_s1 + $0xd8c] ss:$16 sps:$4 sm:$0xff]  }
 0x17b   :  { %5182 = vmatpush1.bf16.msra.mxu0 %v7952_v33  ;;  %5715 = vmatpush1.bf16.msra.mxu1 %v7955_v26  ;;  %v8044_v33 = vld [vmem:[%s11311_s1 + $0xda4] ss:$16 sps:$4 sm:$0xff]   ;;  %v8047_v26 = vld [vmem:[%s11311_s1 + $0xdac] ss:$16 sps:$4 sm:$0xff]  }
 0x17c   :  { %5183 = vmatprep.subr.bf16.mxu0 %v7960_v36  ;;  %5716 = vmatprep.subr.bf16.mxu1 %v7963_v37  ;;  %v8042_v36 = vld [vmem:[%s11311_s1 + $0xda0] ss:$16 sps:$4 sm:$0xff]   ;;  %v8045_v37 = vld [vmem:[%s11311_s1 + $0xda8] ss:$16 sps:$4 sm:$0xff]  }
 0x17f   :  { %5184 = vmatpush1.bf16.msra.mxu0 %v7958_v21  ;;  %5717 = vmatpush1.bf16.msra.mxu1 %v7961_v39  ;;  %v8050_v21 = vld [vmem:[%s11311_s1 + $0xdc4] ss:$16 sps:$4 sm:$0xff]   ;;  %v8053_v39 = vld [vmem:[%s11311_s1 + $0xdcc] ss:$16 sps:$4 sm:$0xff]  }
 0x180   :  { %5194 = vmatprep.subr.bf16.mxu0 %v7966_v40  ;;  %5727 = vmatprep.subr.bf16.mxu1 %v7969_v41  ;;  %v8048_v40 = vld [vmem:[%s11311_s1 + $0xdc0] ss:$16 sps:$4 sm:$0xff]   ;;  %v8051_v41 = vld [vmem:[%s11311_s1 + $0xdc8] ss:$16 sps:$4 sm:$0xff]  }
 0x182   :  { %5186 = vmatmul.mubr.bf16.vlgmr.msra.gmra.mrb[0].mxu0 %v933_v43  ;;  %5719 = vmatmul.mubr.bf16.vlgmr.msra.gmra.mrb[0].mxu1 %v933_v43  ;;  %v8059_v43 = vld [vmem:[%s11311_s1 + $0xdec] ss:$16 sps:$4 sm:$0xff]  }
 0x183   :  { %5195 = vmatpush1.bf16.msra.mxu0 %v7964_v44  ;;  %5728 = vmatpush1.bf16.msra.mxu1 %v7967_v45  ;;  %v8054_v44 = vld [vmem:[%s11311_s1 + $0xde0] ss:$16 sps:$4 sm:$0xff]   ;;  %v8057_v45 = vld [vmem:[%s11311_s1 + $0xde8] ss:$16 sps:$4 sm:$0xff]  }
 0x184   :  { %5196 = vmatprep.subr.bf16.mxu0 %v7972_v46  ;;  %5729 = vmatprep.subr.bf16.mxu1 %v7975_v35  ;;  %v8063_v46 = vld [vmem:[%s11311_s1 + $0xe04] ss:$16 sps:$4 sm:$0xff]   ;;  %v8066_v35 = vld [vmem:[%s11311_s1 + $0xe0c] ss:$16 sps:$4 sm:$0xff]  }
 0x185   :  { %5226 = vmatprep.mubr.bf16.mxu0 %v9931_v47  ;;  %5759 = vmatprep.mubr.bf16.mxu1 %v9931_v47 }
 0x187   :  { %5197 = vmatpush1.bf16.msra.mxu0 %v7970_v48  ;;  %5730 = vmatpush1.bf16.msra.mxu1 %v7973_v50  ;;  %v10117_v48 = vrot.slane %v9900_v38, %v8823_v49  ;;  %v8061_v50 = vld [vmem:[%s11311_s1 + $0xe00] ss:$16 sps:$4 sm:$0xff]   ;;  %v8072_v38 = vld [vmem:[%s11311_s1 + $0xe2c] ss:$16 sps:$4 sm:$0xff]  }
 0x188   :  { %5198 = vmatprep.subr.bf16.mxu0 %v7978_v51  ;;  %5731 = vmatprep.subr.bf16.mxu1 %v7981_v53  ;;  %v8064_v51 = vld [vmem:[%s11311_s1 + $0xe08] ss:$16 sps:$4 sm:$0xff]   ;;  %v8069_v53 = vld [vmem:[%s11311_s1 + $0xe24] ss:$16 sps:$4 sm:$0xff]  }
 0x18b   :  { %5199 = vmatpush1.bf16.msra.mxu0 %v7976_v54  ;;  %5732 = vmatpush1.bf16.msra.mxu1 %v7979_v55  ;;  %v936_v54 = vcombine.high %v9931_v47, %v9931_v47  ;;  %v8067_v55 = vld [vmem:[%s11311_s1 + $0xe20] ss:$16 sps:$4 sm:$0xff]   ;;  %v8075_v47 = vld [vmem:[%s11311_s1 + $0xe44] ss:$16 sps:$4 sm:$0xff]  }
 0x18c   :  { %5200 = vmatprep.subr.bf16.mxu0 %v7984_v56  ;;  %5733 = vmatprep.subr.bf16.mxu1 %v7987_v57  ;;  %v8070_v56 = vld [vmem:[%s11311_s1 + $0xe28] ss:$16 sps:$4 sm:$0xff]   ;;  %v8078_v57 = vld [vmem:[%s11311_s1 + $0xe4c] ss:$16 sps:$4 sm:$0xff]  }
 0x18f   :  { %5201 = vmatpush1.bf16.msra.mxu0 %v7982_v58  ;;  %5734 = vmatpush1.bf16.msra.mxu1 %v7985_v59  ;;  %v8073_v58 = vld [vmem:[%s11311_s1 + $0xe40] ss:$16 sps:$4 sm:$0xff]   ;;  %v8076_v59 = vld [vmem:[%s11311_s1 + $0xe48] ss:$16 sps:$4 sm:$0xff]  }
 0x190   :  { %5202 = vmatprep.subr.bf16.mxu0 %v7990_v60  ;;  %5735 = vmatprep.subr.bf16.mxu1 %v7993_v61  ;;  %v8081_v60 = vld [vmem:[%s11311_s1 + $0xe64] ss:$16 sps:$4 sm:$0xff]   ;;  %v8084_v61 = vld [vmem:[%s11311_s1 + $0xe6c] ss:$16 sps:$4 sm:$0xff]  }
 0x193   :  { %5203 = vmatpush1.bf16.msra.mxu0 %v7988_v62  ;;  %5736 = vmatpush1.bf16.msra.mxu1 %v7991_v63  ;;  %v8079_v62 = vld [vmem:[%s11311_s1 + $0xe60] ss:$16 sps:$4 sm:$0xff]   ;;  %v8082_v63 = vld [vmem:[%s11311_s1 + $0xe68] ss:$16 sps:$4 sm:$0xff]  }
 0x194   :  { %5204 = vmatprep.subr.bf16.mxu0 %v7996_v0  ;;  %5737 = vmatprep.subr.bf16.mxu1 %v7999_v1  ;;  %v8087_v0 = vld [vmem:[%s11311_s1 + $0xe84] ss:$16 sps:$4 sm:$0xff]   ;;  %v8090_v1 = vld [vmem:[%s11311_s1 + $0xe8c] ss:$16 sps:$4 sm:$0xff]  }
 0x197   :  { %5205 = vmatpush1.bf16.msra.mxu0 %v7994_v2  ;;  %5738 = vmatpush1.bf16.msra.mxu1 %v7997_v3  ;;  %v8085_v2 = vld [vmem:[%s11311_s1 + $0xe80] ss:$16 sps:$4 sm:$0xff]   ;;  %v8088_v3 = vld [vmem:[%s11311_s1 + $0xe88] ss:$16 sps:$4 sm:$0xff]  }
 0x198   :  { %5206 = vmatprep.subr.bf16.mxu0 %v8002_v4  ;;  %5739 = vmatprep.subr.bf16.mxu1 %v8005_v5  ;;  %v8093_v4 = vld [vmem:[%s11311_s1 + $0xea4] ss:$16 sps:$4 sm:$0xff]   ;;  %v8096_v5 = vld [vmem:[%s11311_s1 + $0xeac] ss:$16 sps:$4 sm:$0xff]  }
 0x19b   :  { %5207 = vmatpush1.bf16.msra.mxu0 %v8000_v6  ;;  %5740 = vmatpush1.bf16.msra.mxu1 %v8003_v7  ;;  %v8091_v6 = vld [vmem:[%s11311_s1 + $0xea0] ss:$16 sps:$4 sm:$0xff]   ;;  %v8094_v7 = vld [vmem:[%s11311_s1 + $0xea8] ss:$16 sps:$4 sm:$0xff]  }
 0x19c   :  { %5208 = vmatprep.subr.bf16.mxu0 %v8008_v8  ;;  %5741 = vmatprep.subr.bf16.mxu1 %v8011_v9  ;;  %v8099_v8 = vld [vmem:[%s11311_s1 + $0xec4] ss:$16 sps:$4 sm:$0xff]   ;;  %v8102_v9 = vld [vmem:[%s11311_s1 + $0xecc] ss:$16 sps:$4 sm:$0xff]  }
 0x19f   :  { %5209 = vmatpush1.bf16.msra.mxu0 %v8006_v10  ;;  %5742 = vmatpush1.bf16.msra.mxu1 %v8009_v11  ;;  %v8097_v10 = vld [vmem:[%s11311_s1 + $0xec0] ss:$16 sps:$4 sm:$0xff]   ;;  %v8100_v11 = vld [vmem:[%s11311_s1 + $0xec8] ss:$16 sps:$4 sm:$0xff]  }
 0x1a0   :  { %5210 = vmatprep.subr.bf16.mxu0 %v8014_v12  ;;  %5743 = vmatprep.subr.bf16.mxu1 %v8017_v52  ;;  %v8105_v12 = vld [vmem:[%s11311_s1 + $0xee4] ss:$16 sps:$4 sm:$0xff]   ;;  %v8108_v52 = vld [vmem:[%s11311_s1 + $0xeec] ss:$16 sps:$4 sm:$0xff]  }
 0x1a3   :  { %5211 = vmatpush1.bf16.msra.mxu0 %v8012_v15  ;;  %5744 = vmatpush1.bf16.msra.mxu1 %v8015_v16  ;;  %v8103_v15 = vld [vmem:[%s11311_s1 + $0xee0] ss:$16 sps:$4 sm:$0xff]   ;;  %v8106_v16 = vld [vmem:[%s11311_s1 + $0xee8] ss:$16 sps:$4 sm:$0xff]  }
 0x1a4   :  { %5212 = vmatprep.subr.bf16.mxu0 %v8020_v17  ;;  %5745 = vmatprep.subr.bf16.mxu1 %v8023_v18  ;;  %v8111_v17 = vld [vmem:[%s11311_s1 + $0xf04] ss:$16 sps:$4 sm:$0xff]   ;;  %v8114_v18 = vld [vmem:[%s11311_s1 + $0xf0c] ss:$16 sps:$4 sm:$0xff]  }
 0x1a7   :  { %5213 = vmatpush1.bf16.msra.mxu0 %v8018_v19  ;;  %5746 = vmatpush1.bf16.msra.mxu1 %v8021_v20  ;;  %v8109_v19 = vld [vmem:[%s11311_s1 + $0xf00] ss:$16 sps:$4 sm:$0xff]   ;;  %v8112_v20 = vld [vmem:[%s11311_s1 + $0xf08] ss:$16 sps:$4 sm:$0xff]  }
 0x1a8   :  { %5214 = vmatprep.subr.bf16.mxu0 %v8026_v22  ;;  %5747 = vmatprep.subr.bf16.mxu1 %v8029_v23  ;;  %v8117_v22 = vld [vmem:[%s11311_s1 + $0xf24] ss:$16 sps:$4 sm:$0xff]   ;;  %v8120_v23 = vld [vmem:[%s11311_s1 + $0xf2c] ss:$16 sps:$4 sm:$0xff]  }
 0x1ab   :  { %5215 = vmatpush1.bf16.msra.mxu0 %v8024_v24  ;;  %5748 = vmatpush1.bf16.msra.mxu1 %v8027_v13  ;;  %v8115_v24 = vld [vmem:[%s11311_s1 + $0xf20] ss:$16 sps:$4 sm:$0xff]   ;;  %v8118_v13 = vld [vmem:[%s11311_s1 + $0xf28] ss:$16 sps:$4 sm:$0xff]  }
 0x1ac   :  { %5216 = vmatprep.subr.bf16.mxu0 %v8032_v27  ;;  %5749 = vmatprep.subr.bf16.mxu1 %v8035_v28  ;;  %v8123_v27 = vld [vmem:[%s11311_s1 + $0xf44] ss:$16 sps:$4 sm:$0xff]   ;;  %v8126_v28 = vld [vmem:[%s11311_s1 + $0xf4c] ss:$16 sps:$4 sm:$0xff]  }
 0x1af   :  { %5217 = vmatpush1.bf16.msra.mxu0 %v8030_v29  ;;  %5750 = vmatpush1.bf16.msra.mxu1 %v8033_v14  ;;  %v8121_v29 = vld [vmem:[%s11311_s1 + $0xf40] ss:$16 sps:$4 sm:$0xff]   ;;  %v8124_v14 = vld [vmem:[%s11311_s1 + $0xf48] ss:$16 sps:$4 sm:$0xff]  }
 0x1b0   :  { %5218 = vmatprep.subr.bf16.mxu0 %v8038_v30  ;;  %5751 = vmatprep.subr.bf16.mxu1 %v8041_v31  ;;  %v8129_v30 = vld [vmem:[%s11311_s1 + $0xf64] ss:$16 sps:$4 sm:$0xff]   ;;  %v8132_v31 = vld [vmem:[%s11311_s1 + $0xf6c] ss:$16 sps:$4 sm:$0xff]  }
 0x1b3   :  { %5219 = vmatpush1.bf16.msra.mxu0 %v8036_v25  ;;  %5752 = vmatpush1.bf16.msra.mxu1 %v8039_v32 }
 0x1b4   :  { %5220 = vmatprep.subr.bf16.mxu0 %v8044_v33  ;;  %5753 = vmatprep.subr.bf16.mxu1 %v8047_v26 }
 0x1b7   :  { %5221 = vmatpush1.bf16.msra.mxu0 %v8042_v36  ;;  %5754 = vmatpush1.bf16.msra.mxu1 %v8045_v37 }
 0x1b8   :  { %5222 = vmatprep.subr.bf16.mxu0 %v8050_v21  ;;  %5755 = vmatprep.subr.bf16.mxu1 %v8053_v39 }
 0x1bb   :  { %5223 = vmatpush1.bf16.msra.mxu0 %v8048_v40  ;;  %5756 = vmatpush1.bf16.msra.mxu1 %v8051_v41 }
 0x1bc   :  { %5224 = vmatprep.subr.bf16.mxu0 %v8056_v34  ;;  %5757 = vmatprep.subr.bf16.mxu1 %v8059_v43 }
 0x1bf   :  { %5225 = vmatpush1.bf16.msra.mxu0 %v8054_v44  ;;  %5758 = vmatpush1.bf16.msra.mxu1 %v8057_v45 }
 0x1c0   :  { %5235 = vmatprep.subr.bf16.mxu0 %v8063_v46  ;;  %5768 = vmatprep.subr.bf16.mxu1 %v8066_v35 }
 0x1c2   :  { %5227 = vmatmul.mubr.bf16.vlgmr.msra.gmra.mrb[0].mxu0 %v10117_v48  ;;  %5760 = vmatmul.mubr.bf16.vlgmr.msra.gmra.mrb[0].mxu1 %v10117_v48 }
 0x1c3   :  { %5236 = vmatpush1.bf16.msra.mxu0 %v8061_v50  ;;  %5769 = vmatpush1.bf16.msra.mxu1 %v8064_v51 }
 0x1c4   :  { %5237 = vmatprep.subr.bf16.mxu0 %v8069_v53  ;;  %5770 = vmatprep.subr.bf16.mxu1 %v8072_v38 }
 0x1c5   :  { %5267 = vmatprep.mubr.bf16.mxu0 %v936_v54  ;;  %5800 = vmatprep.mubr.bf16.mxu1 %v936_v54 }
 0x1c7   :  { %5238 = vmatpush1.bf16.msra.mxu0 %v8067_v55  ;;  %5771 = vmatpush1.bf16.msra.mxu1 %v8070_v56 }
 0x1c8   :  { %5239 = vmatprep.subr.bf16.mxu0 %v8075_v47  ;;  %5772 = vmatprep.subr.bf16.mxu1 %v8078_v57 }
 0x1cb   :  { %5240 = vmatpush1.bf16.msra.mxu0 %v8073_v58  ;;  %5773 = vmatpush1.bf16.msra.mxu1 %v8076_v59 }
 0x1cc   :  { %5241 = vmatprep.subr.bf16.mxu0 %v8081_v60  ;;  %5774 = vmatprep.subr.bf16.mxu1 %v8084_v61 }
 0x1cf   :  { %5242 = vmatpush1.bf16.msra.mxu0 %v8079_v62  ;;  %5775 = vmatpush1.bf16.msra.mxu1 %v8082_v63 }
 0x1d0   :  { %5243 = vmatprep.subr.bf16.mxu0 %v8087_v0  ;;  %5776 = vmatprep.subr.bf16.mxu1 %v8090_v1 }
 0x1d3   :  { %5244 = vmatpush1.bf16.msra.mxu0 %v8085_v2  ;;  %5777 = vmatpush1.bf16.msra.mxu1 %v8088_v3 }
 0x1d4   :  { %5245 = vmatprep.subr.bf16.mxu0 %v8093_v4  ;;  %5778 = vmatprep.subr.bf16.mxu1 %v8096_v5 }
 0x1d7   :  { %5246 = vmatpush1.bf16.msra.mxu0 %v8091_v6  ;;  %5779 = vmatpush1.bf16.msra.mxu1 %v8094_v7 }
 0x1d8   :  { %5247 = vmatprep.subr.bf16.mxu0 %v8099_v8  ;;  %5780 = vmatprep.subr.bf16.mxu1 %v8102_v9 }
 0x1db   :  { %5248 = vmatpush1.bf16.msra.mxu0 %v8097_v10  ;;  %5781 = vmatpush1.bf16.msra.mxu1 %v8100_v11 }
 0x1dc   :  { %5249 = vmatprep.subr.bf16.mxu0 %v8105_v12  ;;  %5782 = vmatprep.subr.bf16.mxu1 %v8108_v52 }
 0x1df   :  { %5250 = vmatpush1.bf16.msra.mxu0 %v8103_v15  ;;  %5783 = vmatpush1.bf16.msra.mxu1 %v8106_v16 }
 0x1e0   :  { %5251 = vmatprep.subr.bf16.mxu0 %v8111_v17  ;;  %5784 = vmatprep.subr.bf16.mxu1 %v8114_v18 }
 0x1e3   :  { %5252 = vmatpush1.bf16.msra.mxu0 %v8109_v19  ;;  %5785 = vmatpush1.bf16.msra.mxu1 %v8112_v20 }
 0x1e4   :  { %5253 = vmatprep.subr.bf16.mxu0 %v8117_v22  ;;  %5786 = vmatprep.subr.bf16.mxu1 %v8120_v23 }
 0x1e7   :  { %5254 = vmatpush1.bf16.msra.mxu0 %v8115_v24  ;;  %5787 = vmatpush1.bf16.msra.mxu1 %v8118_v13 }
 0x1e8   :  { %5255 = vmatprep.subr.bf16.mxu0 %v8123_v27  ;;  %5788 = vmatprep.subr.bf16.mxu1 %v8126_v28 }
 0x1e9   :  { %13 = vsyncpa [#allocation5], 0  ;;  %v8127_v25 = vld [vmem:[%s11311_s1 + $0xf60] ss:$16 sps:$4 sm:$0xff]   ;;  %v8130_v32 = vld [vmem:[%s11311_s1 + $0xf68] ss:$16 sps:$4 sm:$0xff]   ;;  %v934_v47 = vcombine.high %v10117_v48, %v10117_v48 }
 0x1ea   :  { %v8135_v33 = vld [vmem:[%s11311_s1 + $0xf84] ss:$16 sps:$4 sm:$0xff]   ;;  %v8138_v26 = vld [vmem:[%s11311_s1 + $0xf8c] ss:$16 sps:$4 sm:$0xff]   ;;  %v8133_v36 = vld [vmem:[%s11311_s1 + $0xf80] ss:$16 sps:$4 sm:$0xff]  }
 0x1eb   :  { %5256 = vmatpush1.bf16.msra.mxu0 %v8121_v29  ;;  %5789 = vmatpush1.bf16.msra.mxu1 %v8124_v14  ;;  %v8136_v37 = vld [vmem:[%s11311_s1 + $0xf88] ss:$16 sps:$4 sm:$0xff]   ;;  %v8141_v21 = vld [vmem:[%s11311_s1 + $0xfa4] ss:$16 sps:$4 sm:$0xff]   ;;  %v8144_v39 = vld [vmem:[%s11311_s1 + $0xfac] ss:$16 sps:$4 sm:$0xff]  }
 0x1ec   :  { %5257 = vmatprep.subr.bf16.mxu0 %v8129_v30  ;;  %5790 = vmatprep.subr.bf16.mxu1 %v8132_v31  ;;  %v8139_v40 = vld [vmem:[%s11311_s1 + $0xfa0] ss:$16 sps:$4 sm:$0xff]   ;;  %v8142_v41 = vld [vmem:[%s11311_s1 + $0xfa8] ss:$16 sps:$4 sm:$0xff]   ;;  %v8147_v34 = vld [vmem:[%s11311_s1 + $0xfc4] ss:$16 sps:$4 sm:$0xff]  }
 0x1ed   :  { %v8150_v43 = vld [vmem:[%s11311_s1 + $0xfcc] ss:$16 sps:$4 sm:$0xff]   ;;  %v10294_v44 = vld [vmem:[%s11310_s0 + $0x10] sm:$0xff]  ;;  %v8148_v46 = vld [vmem:[%s11311_s1 + $0xfc8] ss:$16 sps:$4 sm:$0xff]   ;;  %vm4944_vm0 = vcmask 523264  }
 0x1ee   :  { %v8145_v45 = vld [vmem:[%s11311_s1 + $0xfc0] ss:$16 sps:$4 sm:$0xff]   ;;  %v8153_v35 = vld [vmem:[%s11311_s1 + $0xfe4] ss:$16 sps:$4 sm:$0xff]   ;;  %v8156_v50 = vld [vmem:[%s11311_s1 + $0xfec] ss:$16 sps:$4 sm:$0xff]   ;;  %v10310_v51 = vrot.slane %v10294_v44, %v8823_v49 }
 0x1ef   :  { %5258 = vmatpush1.bf16.msra.mxu0 %v8127_v25  ;;  %5791 = vmatpush1.bf16.msra.mxu1 %v8130_v32  ;;  %v8151_v53 = vld [vmem:[%s11311_s1 + $0xfe0] ss:$16 sps:$4 sm:$0xff]   ;;  %v8154_v38 = vld [vmem:[%s11311_s1 + $0xfe8] ss:$16 sps:$4 sm:$0xff]   ;;  %v8159_v54 = vld [vmem:[%s11311_s1 + $0x1004] ss:$16 sps:$4 sm:$0xff]  }
 0x1f0   :  { %5259 = vmatprep.subr.bf16.mxu0 %v8135_v33  ;;  %5792 = vmatprep.subr.bf16.mxu1 %v8138_v26  ;;  %v8162_v55 = vld [vmem:[%s11311_s1 + $0x100c] ss:$16 sps:$4 sm:$0xff]   ;;  %v952_v56 = vcombine.high %v10310_v51, %v10310_v51  ;;  %v8157_v57 = vld [vmem:[%s11311_s1 + $0x1000] ss:$16 sps:$4 sm:$0xff]   ;;  %v8160_v58 = vld [vmem:[%s11311_s1 + $0x1008] ss:$16 sps:$4 sm:$0xff]  }
 0x1f1   :  { %v8165_v59 = vld [vmem:[%s11311_s1 + $0x1024] ss:$16 sps:$4 sm:$0xff]   ;;  %v8168_v48 = vld [vmem:[%s11311_s1 + $0x102c] ss:$16 sps:$4 sm:$0xff]   ;;  %v8163_v61 = vld [vmem:[%s11311_s1 + $0x1020] ss:$16 sps:$4 sm:$0xff]  }
 0x1f2   :  { %v10341_v60 = vrot.slane %v952_v56, %v8823_v49  ;;  %v8166_v62 = vld [vmem:[%s11311_s1 + $0x1028] ss:$16 sps:$4 sm:$0xff]   ;;  %v8171_v63 = vld [vmem:[%s11311_s1 + $0x1044] ss:$16 sps:$4 sm:$0xff]   ;;  %v8174_v0 = vld [vmem:[%s11311_s1 + $0x104c] ss:$16 sps:$4 sm:$0xff]  }
 0x1f3   :  { %5260 = vmatpush1.bf16.msra.mxu0 %v8133_v36  ;;  %5793 = vmatpush1.bf16.msra.mxu1 %v8136_v37  ;;  %v8169_v1 = vld [vmem:[%s11311_s1 + $0x1040] ss:$16 sps:$4 sm:$0xff]   ;;  %v8172_v2 = vld [vmem:[%s11311_s1 + $0x1048] ss:$16 sps:$4 sm:$0xff]   ;;  %v8177_v3 = vld [vmem:[%s11311_s1 + $0x1064] ss:$16 sps:$4 sm:$0xff]  }
 0x1f4   :  { %5261 = vmatprep.subr.bf16.mxu0 %v8141_v21  ;;  %5794 = vmatprep.subr.bf16.mxu1 %v8144_v39  ;;  %v8180_v4 = vld [vmem:[%s11311_s1 + $0x106c] ss:$16 sps:$4 sm:$0xff]   ;;  %v8175_v5 = vld [vmem:[%s11311_s1 + $0x1060] ss:$16 sps:$4 sm:$0xff]   ;;  %v8178_v6 = vld [vmem:[%s11311_s1 + $0x1068] ss:$16 sps:$4 sm:$0xff]  }
 0x1f5   :  { %v8183_v7 = vld [vmem:[%s11311_s1 + $0x1084] ss:$16 sps:$4 sm:$0xff]   ;;  %v8186_v8 = vld [vmem:[%s11311_s1 + $0x108c] ss:$16 sps:$4 sm:$0xff]   ;;  %v8181_v9 = vld [vmem:[%s11311_s1 + $0x1080] ss:$16 sps:$4 sm:$0xff]  }
 0x1f6   :  { %v8184_v10 = vld [vmem:[%s11311_s1 + $0x1088] ss:$16 sps:$4 sm:$0xff]   ;;  %v8189_v11 = vld [vmem:[%s11311_s1 + $0x10a4] ss:$16 sps:$4 sm:$0xff]   ;;  %v8192_v12 = vld [vmem:[%s11311_s1 + $0x10ac] ss:$16 sps:$4 sm:$0xff]  }
 0x1f7   :  { %5262 = vmatpush1.bf16.msra.mxu0 %v8139_v40  ;;  %5795 = vmatpush1.bf16.msra.mxu1 %v8142_v41  ;;  %v8187_v52 = vld [vmem:[%s11311_s1 + $0x10a0] ss:$16 sps:$4 sm:$0xff]   ;;  %v8190_v15 = vld [vmem:[%s11311_s1 + $0x10a8] ss:$16 sps:$4 sm:$0xff]   ;;  %v8195_v16 = vld [vmem:[%s11311_s1 + $0x10c4] ss:$16 sps:$4 sm:$0xff]  }
 0x1f8   :  { %5263 = vmatprep.subr.bf16.mxu0 %v8147_v34  ;;  %5796 = vmatprep.subr.bf16.mxu1 %v8150_v43  ;;  %v8198_v17 = vld [vmem:[%s11311_s1 + $0x10cc] ss:$16 sps:$4 sm:$0xff]   ;;  %v8193_v18 = vld [vmem:[%s11311_s1 + $0x10c0] ss:$16 sps:$4 sm:$0xff]   ;;  %v8196_v19 = vld [vmem:[%s11311_s1 + $0x10c8] ss:$16 sps:$4 sm:$0xff]  }
 0x1f9   :  { %v8201_v20 = vld [vmem:[%s11311_s1 + $0x10e4] ss:$16 sps:$4 sm:$0xff]   ;;  %v8204_v22 = vld [vmem:[%s11311_s1 + $0x10ec] ss:$16 sps:$4 sm:$0xff]   ;;  %v8199_v23 = vld [vmem:[%s11311_s1 + $0x10e0] ss:$16 sps:$4 sm:$0xff]  }
 0x1fa   :  { %v8202_v24 = vld [vmem:[%s11311_s1 + $0x10e8] ss:$16 sps:$4 sm:$0xff]   ;;  %v8207_v13 = vld [vmem:[%s11311_s1 + $0x1104] ss:$16 sps:$4 sm:$0xff]   ;;  %v8210_v27 = vld [vmem:[%s11311_s1 + $0x110c] ss:$16 sps:$4 sm:$0xff]  }
 0x1fb   :  { %5264 = vmatpush1.bf16.msra.mxu0 %v8145_v45  ;;  %5797 = vmatpush1.bf16.msra.mxu1 %v8148_v46  ;;  %v8205_v28 = vld [vmem:[%s11311_s1 + $0x1100] ss:$16 sps:$4 sm:$0xff]   ;;  %v8208_v29 = vld [vmem:[%s11311_s1 + $0x1108] ss:$16 sps:$4 sm:$0xff]   ;;  %v8213_v14 = vld [vmem:[%s11311_s1 + $0x1124] ss:$16 sps:$4 sm:$0xff]  }
 0x1fc   :  { %5265 = vmatprep.subr.bf16.mxu0 %v8153_v35  ;;  %5798 = vmatprep.subr.bf16.mxu1 %v8156_v50  ;;  %v8216_v30 = vld [vmem:[%s11311_s1 + $0x112c] ss:$16 sps:$4 sm:$0xff]   ;;  %v8211_v31 = vld [vmem:[%s11311_s1 + $0x1120] ss:$16 sps:$4 sm:$0xff]   ;;  %v8214_v25 = vld [vmem:[%s11311_s1 + $0x1128] ss:$16 sps:$4 sm:$0xff]  }
 0x1fd   :  { %v8219_v32 = vld [vmem:[%s11311_s1 + $0x1144] ss:$16 sps:$4 sm:$0xff]   ;;  %v8222_v33 = vld [vmem:[%s11311_s1 + $0x114c] ss:$16 sps:$4 sm:$0xff]   ;;  %v8217_v26 = vld [vmem:[%s11311_s1 + $0x1140] ss:$16 sps:$4 sm:$0xff]  }
 0x1fe   :  { %v8220_v36 = vld [vmem:[%s11311_s1 + $0x1148] ss:$16 sps:$4 sm:$0xff]   ;;  %v8225_v37 = vld [vmem:[%s11311_s1 + $0x1164] ss:$16 sps:$4 sm:$0xff]   ;;  %v8228_v21 = vld [vmem:[%s11311_s1 + $0x116c] ss:$16 sps:$4 sm:$0xff]  }
 0x1ff   :  { %5266 = vmatpush1.bf16.msra.mxu0 %v8151_v53  ;;  %5799 = vmatpush1.bf16.msra.mxu1 %v8154_v38  ;;  %v8223_v39 = vld [vmem:[%s11311_s1 + $0x1160] ss:$16 sps:$4 sm:$0xff]   ;;  %v8226_v40 = vld [vmem:[%s11311_s1 + $0x1168] ss:$16 sps:$4 sm:$0xff]   ;;  %v8231_v41 = vld [vmem:[%s11311_s1 + $0x1184] ss:$16 sps:$4 sm:$0xff]  }
 0x200   :  { %5276 = vmatprep.subr.bf16.mxu0 %v8159_v54  ;;  %5809 = vmatprep.subr.bf16.mxu1 %v8162_v55  ;;  %v8234_v34 = vld [vmem:[%s11311_s1 + $0x118c] ss:$16 sps:$4 sm:$0xff]   ;;  %v8229_v43 = vld [vmem:[%s11311_s1 + $0x1180] ss:$16 sps:$4 sm:$0xff]   ;;  %v8232_v45 = vld [vmem:[%s11311_s1 + $0x1188] ss:$16 sps:$4 sm:$0xff]  }
 0x201   :  { %v8237_v46 = vld [vmem:[%s11311_s1 + $0x11a4] ss:$16 sps:$4 sm:$0xff]   ;;  %v8240_v35 = vld [vmem:[%s11311_s1 + $0x11ac] ss:$16 sps:$4 sm:$0xff]   ;;  %v8235_v50 = vld [vmem:[%s11311_s1 + $0x11a0] ss:$16 sps:$4 sm:$0xff]  }
 0x202   :  { %5268 = vmatmul.mubr.bf16.vlgmr.msra.gmra.mrb[0].mxu0 %v934_v47  ;;  %5801 = vmatmul.mubr.bf16.vlgmr.msra.gmra.mrb[0].mxu1 %v934_v47  ;;  %v8238_v53 = vld [vmem:[%s11311_s1 + $0x11a8] ss:$16 sps:$4 sm:$0xff]   ;;  %v8243_v38 = vld [vmem:[%s11311_s1 + $0x11c4] ss:$16 sps:$4 sm:$0xff]   ;;  %v8246_v54 = vld [vmem:[%s11311_s1 + $0x11cc] ss:$16 sps:$4 sm:$0xff]  }
 0x203   :  { %5277 = vmatpush1.bf16.msra.mxu0 %v8157_v57  ;;  %5810 = vmatpush1.bf16.msra.mxu1 %v8160_v58  ;;  %v8241_v55 = vld [vmem:[%s11311_s1 + $0x11c0] ss:$16 sps:$4 sm:$0xff]   ;;  %v8244_v56 = vld [vmem:[%s11311_s1 + $0x11c8] ss:$16 sps:$4 sm:$0xff]   ;;  %v8249_v47 = vld [vmem:[%s11311_s1 + $0x11e4] ss:$16 sps:$4 sm:$0xff]  }
 0x204   :  { %5278 = vmatprep.subr.bf16.mxu0 %v8165_v59  ;;  %5811 = vmatprep.subr.bf16.mxu1 %v8168_v48  ;;  %v8252_v57 = vld [vmem:[%s11311_s1 + $0x11ec] ss:$16 sps:$4 sm:$0xff]   ;;  %v8247_v58 = vld [vmem:[%s11311_s1 + $0x11e0] ss:$16 sps:$4 sm:$0xff]   ;;  %v8250_v59 = vld [vmem:[%s11311_s1 + $0x11e8] ss:$16 sps:$4 sm:$0xff]  }
 0x205   :  { %5308 = vmatprep.mubr.bf16.mxu0 %v10341_v60  ;;  %5841 = vmatprep.mubr.bf16.mxu1 %v10341_v60  ;;  %v8255_v48 = vld [vmem:[%s11311_s1 + $0x1204] ss:$16 sps:$4 sm:$0xff]  }
 0x207   :  { %5279 = vmatpush1.bf16.msra.mxu0 %v8163_v61  ;;  %5812 = vmatpush1.bf16.msra.mxu1 %v8166_v62  ;;  %v8258_v61 = vld [vmem:[%s11311_s1 + $0x120c] ss:$16 sps:$4 sm:$0xff]   ;;  %v10527_v62 = vrot.slane %v10310_v51, %v8823_v49 }
 0x208   :  { %5280 = vmatprep.subr.bf16.mxu0 %v8171_v63  ;;  %5813 = vmatprep.subr.bf16.mxu1 %v8174_v0  ;;  %v8253_v63 = vld [vmem:[%s11311_s1 + $0x1200] ss:$16 sps:$4 sm:$0xff]   ;;  %v8256_v0 = vld [vmem:[%s11311_s1 + $0x1208] ss:$16 sps:$4 sm:$0xff]   ;;  %v8264_v51 = vld [vmem:[%s11311_s1 + $0x122c] ss:$16 sps:$4 sm:$0xff]  }
 0x20b   :  { %5281 = vmatpush1.bf16.msra.mxu0 %v8169_v1  ;;  %5814 = vmatpush1.bf16.msra.mxu1 %v8172_v2  ;;  %v8261_v1 = vld [vmem:[%s11311_s1 + $0x1224] ss:$16 sps:$4 sm:$0xff]   ;;  %v984_v2 = vcombine.high %v10341_v60, %v10341_v60 }
 0x20c   :  { %5282 = vmatprep.subr.bf16.mxu0 %v8177_v3  ;;  %5815 = vmatprep.subr.bf16.mxu1 %v8180_v4  ;;  %v8259_v3 = vld [vmem:[%s11311_s1 + $0x1220] ss:$16 sps:$4 sm:$0xff]   ;;  %v8262_v4 = vld [vmem:[%s11311_s1 + $0x1228] ss:$16 sps:$4 sm:$0xff]   ;;  %v8267_v60 = vld [vmem:[%s11311_s1 + $0x1244] ss:$16 sps:$4 sm:$0xff]  }
 0x20f   :  { %5283 = vmatpush1.bf16.msra.mxu0 %v8175_v5  ;;  %5816 = vmatpush1.bf16.msra.mxu1 %v8178_v6  ;;  %v8270_v5 = vld [vmem:[%s11311_s1 + $0x124c] ss:$16 sps:$4 sm:$0xff]   ;;  %v8265_v6 = vld [vmem:[%s11311_s1 + $0x1240] ss:$16 sps:$4 sm:$0xff]  }
 0x210   :  { %5284 = vmatprep.subr.bf16.mxu0 %v8183_v7  ;;  %5817 = vmatprep.subr.bf16.mxu1 %v8186_v8  ;;  %v8268_v7 = vld [vmem:[%s11311_s1 + $0x1248] ss:$16 sps:$4 sm:$0xff]   ;;  %v8273_v8 = vld [vmem:[%s11311_s1 + $0x1264] ss:$16 sps:$4 sm:$0xff]  }
 0x213   :  { %5285 = vmatpush1.bf16.msra.mxu0 %v8181_v9  ;;  %5818 = vmatpush1.bf16.msra.mxu1 %v8184_v10  ;;  %v8276_v9 = vld [vmem:[%s11311_s1 + $0x126c] ss:$16 sps:$4 sm:$0xff]   ;;  %v8271_v10 = vld [vmem:[%s11311_s1 + $0x1260] ss:$16 sps:$4 sm:$0xff]  }
 0x214   :  { %5286 = vmatprep.subr.bf16.mxu0 %v8189_v11  ;;  %5819 = vmatprep.subr.bf16.mxu1 %v8192_v12  ;;  %v8274_v11 = vld [vmem:[%s11311_s1 + $0x1268] ss:$16 sps:$4 sm:$0xff]   ;;  %v8279_v12 = vld [vmem:[%s11311_s1 + $0x1284] ss:$16 sps:$4 sm:$0xff]  }
 0x217   :  { %5287 = vmatpush1.bf16.msra.mxu0 %v8187_v52  ;;  %5820 = vmatpush1.bf16.msra.mxu1 %v8190_v15  ;;  %v8282_v52 = vld [vmem:[%s11311_s1 + $0x128c] ss:$16 sps:$4 sm:$0xff]   ;;  %v8277_v15 = vld [vmem:[%s11311_s1 + $0x1280] ss:$16 sps:$4 sm:$0xff]  }
 0x218   :  { %5288 = vmatprep.subr.bf16.mxu0 %v8195_v16  ;;  %5821 = vmatprep.subr.bf16.mxu1 %v8198_v17  ;;  %v8280_v16 = vld [vmem:[%s11311_s1 + $0x1288] ss:$16 sps:$4 sm:$0xff]   ;;  %v8285_v17 = vld [vmem:[%s11311_s1 + $0x12a4] ss:$16 sps:$4 sm:$0xff]  }
 0x21b   :  { %5289 = vmatpush1.bf16.msra.mxu0 %v8193_v18  ;;  %5822 = vmatpush1.bf16.msra.mxu1 %v8196_v19  ;;  %v8288_v18 = vld [vmem:[%s11311_s1 + $0x12ac] ss:$16 sps:$4 sm:$0xff]   ;;  %v8283_v19 = vld [vmem:[%s11311_s1 + $0x12a0] ss:$16 sps:$4 sm:$0xff]  }
 0x21c   :  { %5290 = vmatprep.subr.bf16.mxu0 %v8201_v20  ;;  %5823 = vmatprep.subr.bf16.mxu1 %v8204_v22  ;;  %v8286_v20 = vld [vmem:[%s11311_s1 + $0x12a8] ss:$16 sps:$4 sm:$0xff]   ;;  %v8291_v22 = vld [vmem:[%s11311_s1 + $0x12c4] ss:$16 sps:$4 sm:$0xff]  }
 0x21f   :  { %5291 = vmatpush1.bf16.msra.mxu0 %v8199_v23  ;;  %5824 = vmatpush1.bf16.msra.mxu1 %v8202_v24  ;;  %v8294_v23 = vld [vmem:[%s11311_s1 + $0x12cc] ss:$16 sps:$4 sm:$0xff]   ;;  %v8289_v24 = vld [vmem:[%s11311_s1 + $0x12c0] ss:$16 sps:$4 sm:$0xff]  }
 0x220   :  { %5292 = vmatprep.subr.bf16.mxu0 %v8207_v13  ;;  %5825 = vmatprep.subr.bf16.mxu1 %v8210_v27  ;;  %v8292_v13 = vld [vmem:[%s11311_s1 + $0x12c8] ss:$16 sps:$4 sm:$0xff]   ;;  %v8297_v27 = vld [vmem:[%s11311_s1 + $0x12e4] ss:$16 sps:$4 sm:$0xff]  }
 0x223   :  { %5293 = vmatpush1.bf16.msra.mxu0 %v8205_v28  ;;  %5826 = vmatpush1.bf16.msra.mxu1 %v8208_v29  ;;  %v8300_v28 = vld [vmem:[%s11311_s1 + $0x12ec] ss:$16 sps:$4 sm:$0xff]   ;;  %v8295_v29 = vld [vmem:[%s11311_s1 + $0x12e0] ss:$16 sps:$4 sm:$0xff]  }
 0x224   :  { %5294 = vmatprep.subr.bf16.mxu0 %v8213_v14  ;;  %5827 = vmatprep.subr.bf16.mxu1 %v8216_v30  ;;  %v8298_v14 = vld [vmem:[%s11311_s1 + $0x12e8] ss:$16 sps:$4 sm:$0xff]   ;;  %v8303_v30 = vld [vmem:[%s11311_s1 + $0x1304] ss:$16 sps:$4 sm:$0xff]  }
 0x227   :  { %5295 = vmatpush1.bf16.msra.mxu0 %v8211_v31  ;;  %5828 = vmatpush1.bf16.msra.mxu1 %v8214_v25  ;;  %v8306_v31 = vld [vmem:[%s11311_s1 + $0x130c] ss:$16 sps:$4 sm:$0xff]   ;;  %v8301_v25 = vld [vmem:[%s11311_s1 + $0x1300] ss:$16 sps:$4 sm:$0xff]  }
 0x228   :  { %5296 = vmatprep.subr.bf16.mxu0 %v8219_v32  ;;  %5829 = vmatprep.subr.bf16.mxu1 %v8222_v33  ;;  %v8304_v32 = vld [vmem:[%s11311_s1 + $0x1308] ss:$16 sps:$4 sm:$0xff]   ;;  %v8309_v33 = vld [vmem:[%s11311_s1 + $0x1324] ss:$16 sps:$4 sm:$0xff]  }
 0x22b   :  { %5297 = vmatpush1.bf16.msra.mxu0 %v8217_v26  ;;  %5830 = vmatpush1.bf16.msra.mxu1 %v8220_v36  ;;  %v8312_v26 = vld [vmem:[%s11311_s1 + $0x132c] ss:$16 sps:$4 sm:$0xff]   ;;  %v8307_v36 = vld [vmem:[%s11311_s1 + $0x1320] ss:$16 sps:$4 sm:$0xff]  }
 0x22c   :  { %5298 = vmatprep.subr.bf16.mxu0 %v8225_v37  ;;  %5831 = vmatprep.subr.bf16.mxu1 %v8228_v21  ;;  %v8310_v37 = vld [vmem:[%s11311_s1 + $0x1328] ss:$16 sps:$4 sm:$0xff]   ;;  %v8315_v21 = vld [vmem:[%s11311_s1 + $0x1344] ss:$16 sps:$4 sm:$0xff]  }
 0x22f   :  { %5299 = vmatpush1.bf16.msra.mxu0 %v8223_v39  ;;  %5832 = vmatpush1.bf16.msra.mxu1 %v8226_v40  ;;  %v8318_v39 = vld [vmem:[%s11311_s1 + $0x134c] ss:$16 sps:$4 sm:$0xff]   ;;  %v8313_v40 = vld [vmem:[%s11311_s1 + $0x1340] ss:$16 sps:$4 sm:$0xff]  }
 0x230   :  { %5300 = vmatprep.subr.bf16.mxu0 %v8231_v41  ;;  %5833 = vmatprep.subr.bf16.mxu1 %v8234_v34  ;;  %v8316_v41 = vld [vmem:[%s11311_s1 + $0x1348] ss:$16 sps:$4 sm:$0xff]   ;;  %v8321_v34 = vld [vmem:[%s11311_s1 + $0x1364] ss:$16 sps:$4 sm:$0xff]  }
 0x233   :  { %5301 = vmatpush1.bf16.msra.mxu0 %v8229_v43  ;;  %5834 = vmatpush1.bf16.msra.mxu1 %v8232_v45  ;;  %v8324_v43 = vld [vmem:[%s11311_s1 + $0x136c] ss:$16 sps:$4 sm:$0xff]   ;;  %v8319_v45 = vld [vmem:[%s11311_s1 + $0x1360] ss:$16 sps:$4 sm:$0xff]  }
 0x234   :  { %5302 = vmatprep.subr.bf16.mxu0 %v8237_v46  ;;  %5835 = vmatprep.subr.bf16.mxu1 %v8240_v35  ;;  %v8322_v46 = vld [vmem:[%s11311_s1 + $0x1368] ss:$16 sps:$4 sm:$0xff]   ;;  %v8327_v35 = vld [vmem:[%s11311_s1 + $0x1384] ss:$16 sps:$4 sm:$0xff]  }
 0x237   :  { %5303 = vmatpush1.bf16.msra.mxu0 %v8235_v50  ;;  %5836 = vmatpush1.bf16.msra.mxu1 %v8238_v53  ;;  %v8330_v50 = vld [vmem:[%s11311_s1 + $0x138c] ss:$16 sps:$4 sm:$0xff]   ;;  %v8325_v53 = vld [vmem:[%s11311_s1 + $0x1380] ss:$16 sps:$4 sm:$0xff]  }
 0x238   :  { %5304 = vmatprep.subr.bf16.mxu0 %v8243_v38  ;;  %5837 = vmatprep.subr.bf16.mxu1 %v8246_v54  ;;  %v8328_v38 = vld [vmem:[%s11311_s1 + $0x1388] ss:$16 sps:$4 sm:$0xff]   ;;  %v8333_v54 = vld [vmem:[%s11311_s1 + $0x13a4] ss:$16 sps:$4 sm:$0xff]  }
 0x23b   :  { %5305 = vmatpush1.bf16.msra.mxu0 %v8241_v55  ;;  %5838 = vmatpush1.bf16.msra.mxu1 %v8244_v56  ;;  %v8336_v55 = vld [vmem:[%s11311_s1 + $0x13ac] ss:$16 sps:$4 sm:$0xff]   ;;  %v8331_v56 = vld [vmem:[%s11311_s1 + $0x13a0] ss:$16 sps:$4 sm:$0xff]  }
 0x23c   :  { %5306 = vmatprep.subr.bf16.mxu0 %v8249_v47  ;;  %5839 = vmatprep.subr.bf16.mxu1 %v8252_v57  ;;  %v8334_v47 = vld [vmem:[%s11311_s1 + $0x13a8] ss:$16 sps:$4 sm:$0xff]   ;;  %v8339_v57 = vld [vmem:[%s11311_s1 + $0x13c4] ss:$16 sps:$4 sm:$0xff]  }
 0x23f   :  { %5307 = vmatpush1.bf16.msra.mxu0 %v8247_v58  ;;  %5840 = vmatpush1.bf16.msra.mxu1 %v8250_v59  ;;  %v8342_v58 = vld [vmem:[%s11311_s1 + $0x13cc] ss:$16 sps:$4 sm:$0xff]   ;;  %v937_v59 = vcombine.high %v10294_v44, %v10294_v44 }
 0x240   :  { %5317 = vmatprep.subr.bf16.mxu0 %v8255_v48  ;;  %5850 = vmatprep.subr.bf16.mxu1 %v8258_v61  ;;  %v8337_v48 = vld [vmem:[%s11311_s1 + $0x13c0] ss:$16 sps:$4 sm:$0xff]   ;;  %v8340_v61 = vld [vmem:[%s11311_s1 + $0x13c8] ss:$16 sps:$4 sm:$0xff]   ;;  %v8348_v44 = vld [vmem:[%s11311_s1 + $0x13ec] ss:$16 sps:$4 sm:$0xff]  }
 0x242   :  { %5309 = vmatmul.mubr.bf16.vlgmr.msra.gmra.mrb[0].mxu0 %v10527_v62  ;;  %5842 = vmatmul.mubr.bf16.vlgmr.msra.gmra.mrb[0].mxu1 %v10527_v62 }
 0x243   :  { %5318 = vmatpush1.bf16.msra.mxu0 %v8253_v63  ;;  %5851 = vmatpush1.bf16.msra.mxu1 %v8256_v0  ;;  %v8345_v63 = vld [vmem:[%s11311_s1 + $0x13e4] ss:$16 sps:$4 sm:$0xff]   ;;  %v10716_v0 = vrot.slane %v937_v59, %v8823_v49  ;;  %v8424_v59 = vld [vmem:[%s11311_s1 + $0x1588] ss:$16 sps:$4 sm:$0xff]  }
 0x244   :  { %5319 = vmatprep.subr.bf16.mxu0 %v8261_v1  ;;  %5852 = vmatprep.subr.bf16.mxu1 %v8264_v51  ;;  %v8343_v1 = vld [vmem:[%s11311_s1 + $0x13e0] ss:$16 sps:$4 sm:$0xff]   ;;  %v8346_v51 = vld [vmem:[%s11311_s1 + $0x13e8] ss:$16 sps:$4 sm:$0xff]  }
 0x245   :  { %5349 = vmatprep.mubr.bf16.mxu0 %v984_v2  ;;  %5882 = vmatprep.mubr.bf16.mxu1 %v984_v2  ;;  %v8351_v2 = vld [vmem:[%s11311_s1 + $0x1404] ss:$16 sps:$4 sm:$0xff]  }
 0x247   :  { %5320 = vmatpush1.bf16.msra.mxu0 %v8259_v3  ;;  %5853 = vmatpush1.bf16.msra.mxu1 %v8262_v4  ;;  %v8354_v3 = vld [vmem:[%s11311_s1 + $0x140c] ss:$16 sps:$4 sm:$0xff]   ;;  %v953_v4 = vcombine.high %v10716_v0, %v10716_v0 }
 0x248   :  { %5321 = vmatprep.subr.bf16.mxu0 %v8267_v60  ;;  %5854 = vmatprep.subr.bf16.mxu1 %v8270_v5  ;;  %v982_v60 = vcombine.high %v10527_v62, %v10527_v62  ;;  %v8349_v5 = vld [vmem:[%s11311_s1 + $0x1400] ss:$16 sps:$4 sm:$0xff]   ;;  %v8360_v62 = vld [vmem:[%s11311_s1 + $0x142c] ss:$16 sps:$4 sm:$0xff]  }
 0x24b   :  { %5322 = vmatpush1.bf16.msra.mxu0 %v8265_v6  ;;  %5855 = vmatpush1.bf16.msra.mxu1 %v8268_v7  ;;  %v8352_v6 = vld [vmem:[%s11311_s1 + $0x1408] ss:$16 sps:$4 sm:$0xff]   ;;  %v8357_v7 = vld [vmem:[%s11311_s1 + $0x1424] ss:$16 sps:$4 sm:$0xff]  }
 0x24c   :  { %5323 = vmatprep.subr.bf16.mxu0 %v8273_v8  ;;  %5856 = vmatprep.subr.bf16.mxu1 %v8276_v9  ;;  %v10747_v8 = vrot.slane %v953_v4, %v8823_v49  ;;  %v8355_v9 = vld [vmem:[%s11311_s1 + $0x1420] ss:$16 sps:$4 sm:$0xff]   ;;  %v8441_v4 = vld [vmem:[%s11311_s1 + $0x15e4] ss:$16 sps:$4 sm:$0xff]  }
 0x24f   :  { %5324 = vmatpush1.bf16.msra.mxu0 %v8271_v10  ;;  %5857 = vmatpush1.bf16.msra.mxu1 %v8274_v11  ;;  %v8358_v10 = vld [vmem:[%s11311_s1 + $0x1428] ss:$16 sps:$4 sm:$0xff]   ;;  %v8363_v11 = vld [vmem:[%s11311_s1 + $0x1444] ss:$16 sps:$4 sm:$0xff]  }
 0x250   :  { %5325 = vmatprep.subr.bf16.mxu0 %v8279_v12  ;;  %5858 = vmatprep.subr.bf16.mxu1 %v8282_v52  ;;  %v8366_v12 = vld [vmem:[%s11311_s1 + $0x144c] ss:$16 sps:$4 sm:$0xff]   ;;  %v8361_v52 = vld [vmem:[%s11311_s1 + $0x1440] ss:$16 sps:$4 sm:$0xff]  }
 0x253   :  { %5326 = vmatpush1.bf16.msra.mxu0 %v8277_v15  ;;  %5859 = vmatpush1.bf16.msra.mxu1 %v8280_v16  ;;  %v8364_v15 = vld [vmem:[%s11311_s1 + $0x1448] ss:$16 sps:$4 sm:$0xff]   ;;  %v8369_v16 = vld [vmem:[%s11311_s1 + $0x1464] ss:$16 sps:$4 sm:$0xff]  }
 0x254   :  { %5327 = vmatprep.subr.bf16.mxu0 %v8285_v17  ;;  %5860 = vmatprep.subr.bf16.mxu1 %v8288_v18  ;;  %v8372_v17 = vld [vmem:[%s11311_s1 + $0x146c] ss:$16 sps:$4 sm:$0xff]   ;;  %v8367_v18 = vld [vmem:[%s11311_s1 + $0x1460] ss:$16 sps:$4 sm:$0xff]  }
 0x257   :  { %5328 = vmatpush1.bf16.msra.mxu0 %v8283_v19  ;;  %5861 = vmatpush1.bf16.msra.mxu1 %v8286_v20  ;;  %v8370_v19 = vld [vmem:[%s11311_s1 + $0x1468] ss:$16 sps:$4 sm:$0xff]   ;;  %v8375_v20 = vld [vmem:[%s11311_s1 + $0x1484] ss:$16 sps:$4 sm:$0xff]  }
 0x258   :  { %5329 = vmatprep.subr.bf16.mxu0 %v8291_v22  ;;  %5862 = vmatprep.subr.bf16.mxu1 %v8294_v23  ;;  %v8378_v22 = vld [vmem:[%s11311_s1 + $0x148c] ss:$16 sps:$4 sm:$0xff]   ;;  %v8373_v23 = vld [vmem:[%s11311_s1 + $0x1480] ss:$16 sps:$4 sm:$0xff]  }
 0x25b   :  { %5330 = vmatpush1.bf16.msra.mxu0 %v8289_v24  ;;  %5863 = vmatpush1.bf16.msra.mxu1 %v8292_v13  ;;  %v8376_v24 = vld [vmem:[%s11311_s1 + $0x1488] ss:$16 sps:$4 sm:$0xff]   ;;  %v8381_v13 = vld [vmem:[%s11311_s1 + $0x14a4] ss:$16 sps:$4 sm:$0xff]  }
 0x25c   :  { %5331 = vmatprep.subr.bf16.mxu0 %v8297_v27  ;;  %5864 = vmatprep.subr.bf16.mxu1 %v8300_v28  ;;  %v8384_v27 = vld [vmem:[%s11311_s1 + $0x14ac] ss:$16 sps:$4 sm:$0xff]   ;;  %v8379_v28 = vld [vmem:[%s11311_s1 + $0x14a0] ss:$16 sps:$4 sm:$0xff]  }
 0x25f   :  { %5332 = vmatpush1.bf16.msra.mxu0 %v8295_v29  ;;  %5865 = vmatpush1.bf16.msra.mxu1 %v8298_v14  ;;  %v8382_v29 = vld [vmem:[%s11311_s1 + $0x14a8] ss:$16 sps:$4 sm:$0xff]   ;;  %v8387_v14 = vld [vmem:[%s11311_s1 + $0x14c4] ss:$16 sps:$4 sm:$0xff]  }
 0x260   :  { %5333 = vmatprep.subr.bf16.mxu0 %v8303_v30  ;;  %5866 = vmatprep.subr.bf16.mxu1 %v8306_v31  ;;  %v8390_v30 = vld [vmem:[%s11311_s1 + $0x14cc] ss:$16 sps:$4 sm:$0xff]   ;;  %v8385_v31 = vld [vmem:[%s11311_s1 + $0x14c0] ss:$16 sps:$4 sm:$0xff]  }
 0x263   :  { %5334 = vmatpush1.bf16.msra.mxu0 %v8301_v25  ;;  %5867 = vmatpush1.bf16.msra.mxu1 %v8304_v32  ;;  %v8388_v25 = vld [vmem:[%s11311_s1 + $0x14c8] ss:$16 sps:$4 sm:$0xff]   ;;  %v8393_v32 = vld [vmem:[%s11311_s1 + $0x14e4] ss:$16 sps:$4 sm:$0xff]  }
 0x264   :  { %5335 = vmatprep.subr.bf16.mxu0 %v8309_v33  ;;  %5868 = vmatprep.subr.bf16.mxu1 %v8312_v26  ;;  %v8396_v33 = vld [vmem:[%s11311_s1 + $0x14ec] ss:$16 sps:$4 sm:$0xff]   ;;  %v8391_v26 = vld [vmem:[%s11311_s1 + $0x14e0] ss:$16 sps:$4 sm:$0xff]  }
 0x267   :  { %5336 = vmatpush1.bf16.msra.mxu0 %v8307_v36  ;;  %5869 = vmatpush1.bf16.msra.mxu1 %v8310_v37  ;;  %v8394_v36 = vld [vmem:[%s11311_s1 + $0x14e8] ss:$16 sps:$4 sm:$0xff]   ;;  %v8399_v37 = vld [vmem:[%s11311_s1 + $0x1504] ss:$16 sps:$4 sm:$0xff]  }
 0x268   :  { %5337 = vmatprep.subr.bf16.mxu0 %v8315_v21  ;;  %5870 = vmatprep.subr.bf16.mxu1 %v8318_v39  ;;  %v8402_v21 = vld [vmem:[%s11311_s1 + $0x150c] ss:$16 sps:$4 sm:$0xff]   ;;  %v8397_v39 = vld [vmem:[%s11311_s1 + $0x1500] ss:$16 sps:$4 sm:$0xff]  }
 0x26b   :  { %5338 = vmatpush1.bf16.msra.mxu0 %v8313_v40  ;;  %5871 = vmatpush1.bf16.msra.mxu1 %v8316_v41  ;;  %v8400_v40 = vld [vmem:[%s11311_s1 + $0x1508] ss:$16 sps:$4 sm:$0xff]   ;;  %v8405_v41 = vld [vmem:[%s11311_s1 + $0x1524] ss:$16 sps:$4 sm:$0xff]  }
 0x26c   :  { %5339 = vmatprep.subr.bf16.mxu0 %v8321_v34  ;;  %5872 = vmatprep.subr.bf16.mxu1 %v8324_v43  ;;  %v8408_v34 = vld [vmem:[%s11311_s1 + $0x152c] ss:$16 sps:$4 sm:$0xff]   ;;  %v8403_v43 = vld [vmem:[%s11311_s1 + $0x1520] ss:$16 sps:$4 sm:$0xff]  }
 0x26f   :  { %5340 = vmatpush1.bf16.msra.mxu0 %v8319_v45  ;;  %5873 = vmatpush1.bf16.msra.mxu1 %v8322_v46  ;;  %v8406_v45 = vld [vmem:[%s11311_s1 + $0x1528] ss:$16 sps:$4 sm:$0xff]   ;;  %v8411_v46 = vld [vmem:[%s11311_s1 + $0x1544] ss:$16 sps:$4 sm:$0xff]  }
 0x270   :  { %5341 = vmatprep.subr.bf16.mxu0 %v8327_v35  ;;  %5874 = vmatprep.subr.bf16.mxu1 %v8330_v50  ;;  %v8414_v35 = vld [vmem:[%s11311_s1 + $0x154c] ss:$16 sps:$4 sm:$0xff]   ;;  %v8409_v50 = vld [vmem:[%s11311_s1 + $0x1540] ss:$16 sps:$4 sm:$0xff]  }
 0x273   :  { %5342 = vmatpush1.bf16.msra.mxu0 %v8325_v53  ;;  %5875 = vmatpush1.bf16.msra.mxu1 %v8328_v38  ;;  %v8412_v53 = vld [vmem:[%s11311_s1 + $0x1548] ss:$16 sps:$4 sm:$0xff]   ;;  %v8417_v38 = vld [vmem:[%s11311_s1 + $0x1564] ss:$16 sps:$4 sm:$0xff]  }
 0x274   :  { %5343 = vmatprep.subr.bf16.mxu0 %v8333_v54  ;;  %5876 = vmatprep.subr.bf16.mxu1 %v8336_v55  ;;  %v8420_v54 = vld [vmem:[%s11311_s1 + $0x156c] ss:$16 sps:$4 sm:$0xff]   ;;  %v8415_v55 = vld [vmem:[%s11311_s1 + $0x1560] ss:$16 sps:$4 sm:$0xff]  }
 0x277   :  { %5344 = vmatpush1.bf16.msra.mxu0 %v8331_v56  ;;  %5877 = vmatpush1.bf16.msra.mxu1 %v8334_v47  ;;  %v8418_v56 = vld [vmem:[%s11311_s1 + $0x1568] ss:$16 sps:$4 sm:$0xff]   ;;  %v8423_v47 = vld [vmem:[%s11311_s1 + $0x1584] ss:$16 sps:$4 sm:$0xff]  }
 0x278   :  { %5345 = vmatprep.subr.bf16.mxu0 %v8339_v57  ;;  %5878 = vmatprep.subr.bf16.mxu1 %v8342_v58  ;;  %v8426_v57 = vld [vmem:[%s11311_s1 + $0x158c] ss:$16 sps:$4 sm:$0xff]   ;;  %v8421_v58 = vld [vmem:[%s11311_s1 + $0x1580] ss:$16 sps:$4 sm:$0xff]  }
 0x27b   :  { %5346 = vmatpush1.bf16.msra.mxu0 %v8337_v48  ;;  %5879 = vmatpush1.bf16.msra.mxu1 %v8340_v61  ;;  %v8429_v48 = vld [vmem:[%s11311_s1 + $0x15a4] ss:$16 sps:$4 sm:$0xff]   ;;  %v8432_v61 = vld [vmem:[%s11311_s1 + $0x15ac] ss:$16 sps:$4 sm:$0xff]  }
 0x27c   :  { %5347 = vmatprep.subr.bf16.mxu0 %v8345_v63  ;;  %5880 = vmatprep.subr.bf16.mxu1 %v8348_v44  ;;  %v8427_v63 = vld [vmem:[%s11311_s1 + $0x15a0] ss:$16 sps:$4 sm:$0xff]   ;;  %v8430_v44 = vld [vmem:[%s11311_s1 + $0x15a8] ss:$16 sps:$4 sm:$0xff]  }
 0x27f   :  { %5348 = vmatpush1.bf16.msra.mxu0 %v8343_v1  ;;  %5881 = vmatpush1.bf16.msra.mxu1 %v8346_v51  ;;  %v8435_v1 = vld [vmem:[%s11311_s1 + $0x15c4] ss:$16 sps:$4 sm:$0xff]   ;;  %v8438_v51 = vld [vmem:[%s11311_s1 + $0x15cc] ss:$16 sps:$4 sm:$0xff]  }
 0x280   :  { %5358 = vmatprep.subr.bf16.mxu0 %v8351_v2  ;;  %5891 = vmatprep.subr.bf16.mxu1 %v8354_v3  ;;  %v8433_v2 = vld [vmem:[%s11311_s1 + $0x15c0] ss:$16 sps:$4 sm:$0xff]   ;;  %v8436_v3 = vld [vmem:[%s11311_s1 + $0x15c8] ss:$16 sps:$4 sm:$0xff]  }
 0x282   :  { %5350 = vmatmul.mubr.bf16.vlgmr.msra.gmra.mrb[0].mxu0 %v982_v60  ;;  %5883 = vmatmul.mubr.bf16.vlgmr.msra.gmra.mrb[0].mxu1 %v982_v60  ;;  %v8444_v60 = vld [vmem:[%s11311_s1 + $0x15ec] ss:$16 sps:$4 sm:$0xff]  }
 0x283   :  { %5359 = vmatpush1.bf16.msra.mxu0 %v8349_v5  ;;  %5892 = vmatpush1.bf16.msra.mxu1 %v8352_v6  ;;  %v8439_v5 = vld [vmem:[%s11311_s1 + $0x15e0] ss:$16 sps:$4 sm:$0xff]   ;;  %v8442_v6 = vld [vmem:[%s11311_s1 + $0x15e8] ss:$16 sps:$4 sm:$0xff]  }
 0x284   :  { %5360 = vmatprep.subr.bf16.mxu0 %v8357_v7  ;;  %5893 = vmatprep.subr.bf16.mxu1 %v8360_v62  ;;  %v8448_v7 = vld [vmem:[%s11311_s1 + $0x1604] ss:$16 sps:$4 sm:$0xff]   ;;  %v8451_v62 = vld [vmem:[%s11311_s1 + $0x160c] ss:$16 sps:$4 sm:$0xff]  }
 0x285   :  { %5390 = vmatprep.mubr.bf16.mxu0 %v10747_v8  ;;  %5923 = vmatprep.mubr.bf16.mxu1 %v10747_v8 }
 0x287   :  { %5361 = vmatpush1.bf16.msra.mxu0 %v8355_v9  ;;  %5894 = vmatpush1.bf16.msra.mxu1 %v8358_v10  ;;  %v10933_v9 = vrot.slane %v10716_v0, %v8823_v49  ;;  %v8446_v10 = vld [vmem:[%s11311_s1 + $0x1600] ss:$16 sps:$4 sm:$0xff]   ;;  %v8457_v0 = vld [vmem:[%s11311_s1 + $0x162c] ss:$16 sps:$4 sm:$0xff]  }
 0x288   :  { %5362 = vmatprep.subr.bf16.mxu0 %v8363_v11  ;;  %5895 = vmatprep.subr.bf16.mxu1 %v8366_v12  ;;  %v8449_v11 = vld [vmem:[%s11311_s1 + $0x1608] ss:$16 sps:$4 sm:$0xff]   ;;  %v8454_v12 = vld [vmem:[%s11311_s1 + $0x1624] ss:$16 sps:$4 sm:$0xff]  }
 0x28b   :  { %5363 = vmatpush1.bf16.msra.mxu0 %v8361_v52  ;;  %5896 = vmatpush1.bf16.msra.mxu1 %v8364_v15  ;;  %v985_v52 = vcombine.high %v10747_v8, %v10747_v8  ;;  %v8452_v15 = vld [vmem:[%s11311_s1 + $0x1620] ss:$16 sps:$4 sm:$0xff]   ;;  %v8460_v8 = vld [vmem:[%s11311_s1 + $0x1644] ss:$16 sps:$4 sm:$0xff]  }
 0x28c   :  { %5364 = vmatprep.subr.bf16.mxu0 %v8369_v16  ;;  %5897 = vmatprep.subr.bf16.mxu1 %v8372_v17  ;;  %v8455_v16 = vld [vmem:[%s11311_s1 + $0x1628] ss:$16 sps:$4 sm:$0xff]   ;;  %v8463_v17 = vld [vmem:[%s11311_s1 + $0x164c] ss:$16 sps:$4 sm:$0xff]  }
 0x28f   :  { %5365 = vmatpush1.bf16.msra.mxu0 %v8367_v18  ;;  %5898 = vmatpush1.bf16.msra.mxu1 %v8370_v19  ;;  %v8458_v18 = vld [vmem:[%s11311_s1 + $0x1640] ss:$16 sps:$4 sm:$0xff]   ;;  %v8461_v19 = vld [vmem:[%s11311_s1 + $0x1648] ss:$16 sps:$4 sm:$0xff]  }
 0x290   :  { %5366 = vmatprep.subr.bf16.mxu0 %v8375_v20  ;;  %5899 = vmatprep.subr.bf16.mxu1 %v8378_v22  ;;  %v8466_v20 = vld [vmem:[%s11311_s1 + $0x1664] ss:$16 sps:$4 sm:$0xff]   ;;  %v8469_v22 = vld [vmem:[%s11311_s1 + $0x166c] ss:$16 sps:$4 sm:$0xff]  }
 0x293   :  { %5367 = vmatpush1.bf16.msra.mxu0 %v8373_v23  ;;  %5900 = vmatpush1.bf16.msra.mxu1 %v8376_v24  ;;  %v8464_v23 = vld [vmem:[%s11311_s1 + $0x1660] ss:$16 sps:$4 sm:$0xff]   ;;  %v8467_v24 = vld [vmem:[%s11311_s1 + $0x1668] ss:$16 sps:$4 sm:$0xff]  }
 0x294   :  { %5368 = vmatprep.subr.bf16.mxu0 %v8381_v13  ;;  %5901 = vmatprep.subr.bf16.mxu1 %v8384_v27  ;;  %v8472_v13 = vld [vmem:[%s11311_s1 + $0x1684] ss:$16 sps:$4 sm:$0xff]   ;;  %v8475_v27 = vld [vmem:[%s11311_s1 + $0x168c] ss:$16 sps:$4 sm:$0xff]  }
 0x297   :  { %5369 = vmatpush1.bf16.msra.mxu0 %v8379_v28  ;;  %5902 = vmatpush1.bf16.msra.mxu1 %v8382_v29  ;;  %v8470_v28 = vld [vmem:[%s11311_s1 + $0x1680] ss:$16 sps:$4 sm:$0xff]   ;;  %v8473_v29 = vld [vmem:[%s11311_s1 + $0x1688] ss:$16 sps:$4 sm:$0xff]  }
 0x298   :  { %5370 = vmatprep.subr.bf16.mxu0 %v8387_v14  ;;  %5903 = vmatprep.subr.bf16.mxu1 %v8390_v30  ;;  %v8478_v14 = vld [vmem:[%s11311_s1 + $0x16a4] ss:$16 sps:$4 sm:$0xff]   ;;  %v8481_v30 = vld [vmem:[%s11311_s1 + $0x16ac] ss:$16 sps:$4 sm:$0xff]  }
 0x29b   :  { %5371 = vmatpush1.bf16.msra.mxu0 %v8385_v31  ;;  %5904 = vmatpush1.bf16.msra.mxu1 %v8388_v25  ;;  %v8476_v31 = vld [vmem:[%s11311_s1 + $0x16a0] ss:$16 sps:$4 sm:$0xff]   ;;  %v8479_v25 = vld [vmem:[%s11311_s1 + $0x16a8] ss:$16 sps:$4 sm:$0xff]  }
 0x29c   :  { %5372 = vmatprep.subr.bf16.mxu0 %v8393_v32  ;;  %5905 = vmatprep.subr.bf16.mxu1 %v8396_v33  ;;  %v8484_v32 = vld [vmem:[%s11311_s1 + $0x16c4] ss:$16 sps:$4 sm:$0xff]   ;;  %v8487_v33 = vld [vmem:[%s11311_s1 + $0x16cc] ss:$16 sps:$4 sm:$0xff]  }
 0x29f   :  { %5373 = vmatpush1.bf16.msra.mxu0 %v8391_v26  ;;  %5906 = vmatpush1.bf16.msra.mxu1 %v8394_v36  ;;  %v8482_v26 = vld [vmem:[%s11311_s1 + $0x16c0] ss:$16 sps:$4 sm:$0xff]   ;;  %v8485_v36 = vld [vmem:[%s11311_s1 + $0x16c8] ss:$16 sps:$4 sm:$0xff]  }
 0x2a0   :  { %5374 = vmatprep.subr.bf16.mxu0 %v8399_v37  ;;  %5907 = vmatprep.subr.bf16.mxu1 %v8402_v21  ;;  %v8490_v37 = vld [vmem:[%s11311_s1 + $0x16e4] ss:$16 sps:$4 sm:$0xff]   ;;  %v8493_v21 = vld [vmem:[%s11311_s1 + $0x16ec] ss:$16 sps:$4 sm:$0xff]  }
 0x2a3   :  { %5375 = vmatpush1.bf16.msra.mxu0 %v8397_v39  ;;  %5908 = vmatpush1.bf16.msra.mxu1 %v8400_v40  ;;  %v8488_v39 = vld [vmem:[%s11311_s1 + $0x16e0] ss:$16 sps:$4 sm:$0xff]   ;;  %v8491_v40 = vld [vmem:[%s11311_s1 + $0x16e8] ss:$16 sps:$4 sm:$0xff]  }
 0x2a4   :  { %5376 = vmatprep.subr.bf16.mxu0 %v8405_v41  ;;  %5909 = vmatprep.subr.bf16.mxu1 %v8408_v34  ;;  %v8496_v41 = vld [vmem:[%s11311_s1 + $0x1704] ss:$16 sps:$4 sm:$0xff]   ;;  %v8499_v34 = vld [vmem:[%s11311_s1 + $0x170c] ss:$16 sps:$4 sm:$0xff]  }
 0x2a7   :  { %5377 = vmatpush1.bf16.msra.mxu0 %v8403_v43  ;;  %5910 = vmatpush1.bf16.msra.mxu1 %v8406_v45  ;;  %v8494_v43 = vld [vmem:[%s11311_s1 + $0x1700] ss:$16 sps:$4 sm:$0xff]   ;;  %v8497_v45 = vld [vmem:[%s11311_s1 + $0x1708] ss:$16 sps:$4 sm:$0xff]  }
 0x2a8   :  { %5378 = vmatprep.subr.bf16.mxu0 %v8411_v46  ;;  %5911 = vmatprep.subr.bf16.mxu1 %v8414_v35  ;;  %v8502_v46 = vld [vmem:[%s11311_s1 + $0x1724] ss:$16 sps:$4 sm:$0xff]   ;;  %v8505_v35 = vld [vmem:[%s11311_s1 + $0x172c] ss:$16 sps:$4 sm:$0xff]  }
 0x2ab   :  { %5379 = vmatpush1.bf16.msra.mxu0 %v8409_v50  ;;  %5912 = vmatpush1.bf16.msra.mxu1 %v8412_v53  ;;  %v8500_v50 = vld [vmem:[%s11311_s1 + $0x1720] ss:$16 sps:$4 sm:$0xff]   ;;  %v8503_v53 = vld [vmem:[%s11311_s1 + $0x1728] ss:$16 sps:$4 sm:$0xff]  }
 0x2ac   :  { %5380 = vmatprep.subr.bf16.mxu0 %v8417_v38  ;;  %5913 = vmatprep.subr.bf16.mxu1 %v8420_v54  ;;  %v8508_v38 = vld [vmem:[%s11311_s1 + $0x1744] ss:$16 sps:$4 sm:$0xff]   ;;  %v8511_v54 = vld [vmem:[%s11311_s1 + $0x174c] ss:$16 sps:$4 sm:$0xff]  }
 0x2af   :  { %5381 = vmatpush1.bf16.msra.mxu0 %v8415_v55  ;;  %5914 = vmatpush1.bf16.msra.mxu1 %v8418_v56  ;;  %v8506_v55 = vld [vmem:[%s11311_s1 + $0x1740] ss:$16 sps:$4 sm:$0xff]   ;;  %v8509_v56 = vld [vmem:[%s11311_s1 + $0x1748] ss:$16 sps:$4 sm:$0xff]  }
 0x2b0   :  { %5382 = vmatprep.subr.bf16.mxu0 %v8423_v47  ;;  %5915 = vmatprep.subr.bf16.mxu1 %v8426_v57  ;;  %v8514_v47 = vld [vmem:[%s11311_s1 + $0x1764] ss:$16 sps:$4 sm:$0xff]   ;;  %v8517_v57 = vld [vmem:[%s11311_s1 + $0x176c] ss:$16 sps:$4 sm:$0xff]  }
 0x2b3   :  { %5383 = vmatpush1.bf16.msra.mxu0 %v8421_v58  ;;  %5916 = vmatpush1.bf16.msra.mxu1 %v8424_v59  ;;  %v8512_v58 = vld [vmem:[%s11311_s1 + $0x1760] ss:$16 sps:$4 sm:$0xff]   ;;  %v8515_v59 = vld [vmem:[%s11311_s1 + $0x1768] ss:$16 sps:$4 sm:$0xff]  }
 0x2b4   :  { %5384 = vmatprep.subr.bf16.mxu0 %v8429_v48  ;;  %5917 = vmatprep.subr.bf16.mxu1 %v8432_v61  ;;  %v8520_v48 = vld [vmem:[%s11311_s1 + $0x1784] ss:$16 sps:$4 sm:$0xff]   ;;  %v8523_v61 = vld [vmem:[%s11311_s1 + $0x178c] ss:$16 sps:$4 sm:$0xff]  }
 0x2b7   :  { %5385 = vmatpush1.bf16.msra.mxu0 %v8427_v63  ;;  %5918 = vmatpush1.bf16.msra.mxu1 %v8430_v44  ;;  %v8518_v63 = vld [vmem:[%s11311_s1 + $0x1780] ss:$16 sps:$4 sm:$0xff]   ;;  %v8521_v44 = vld [vmem:[%s11311_s1 + $0x1788] ss:$16 sps:$4 sm:$0xff]  }
 0x2b8   :  { %5386 = vmatprep.subr.bf16.mxu0 %v8435_v1  ;;  %5919 = vmatprep.subr.bf16.mxu1 %v8438_v51  ;;  %v8526_v1 = vld [vmem:[%s11311_s1 + $0x17a4] ss:$16 sps:$4 sm:$0xff]   ;;  %v8529_v51 = vld [vmem:[%s11311_s1 + $0x17ac] ss:$16 sps:$4 sm:$0xff]  }
 0x2bb   :  { %5387 = vmatpush1.bf16.msra.mxu0 %v8433_v2  ;;  %5920 = vmatpush1.bf16.msra.mxu1 %v8436_v3  ;;  %v8524_v2 = vld [vmem:[%s11311_s1 + $0x17a0] ss:$16 sps:$4 sm:$0xff]   ;;  %v8527_v3 = vld [vmem:[%s11311_s1 + $0x17a8] ss:$16 sps:$4 sm:$0xff]  }
 0x2bc   :  { %5388 = vmatprep.subr.bf16.mxu0 %v8441_v4  ;;  %5921 = vmatprep.subr.bf16.mxu1 %v8444_v60  ;;  %v8532_v4 = vld [vmem:[%s11311_s1 + $0x17c4] ss:$16 sps:$4 sm:$0xff]   ;;  %v8535_v60 = vld [vmem:[%s11311_s1 + $0x17cc] ss:$16 sps:$4 sm:$0xff]  }
 0x2bf   :  { %5389 = vmatpush1.bf16.msra.mxu0 %v8439_v5  ;;  %5922 = vmatpush1.bf16.msra.mxu1 %v8442_v6  ;;  %v8530_v5 = vld [vmem:[%s11311_s1 + $0x17c0] ss:$16 sps:$4 sm:$0xff]   ;;  %v8533_v6 = vld [vmem:[%s11311_s1 + $0x17c8] ss:$16 sps:$4 sm:$0xff]  }
 0x2c0   :  { %5399 = vmatprep.subr.bf16.mxu0 %v8448_v7  ;;  %5932 = vmatprep.subr.bf16.mxu1 %v8451_v62  ;;  %v8538_v7 = vld [vmem:[%s11311_s1 + $0x17e4] ss:$16 sps:$4 sm:$0xff]   ;;  %v8541_v62 = vld [vmem:[%s11311_s1 + $0x17ec] ss:$16 sps:$4 sm:$0xff]  }
 0x2c2   :  { %5391 = vmatmul.mubr.bf16.vlgmr.msra.gmra.mrb[0].mxu0 %v10933_v9  ;;  %5924 = vmatmul.mubr.bf16.vlgmr.msra.gmra.mrb[0].mxu1 %v10933_v9 }
 0x2c3   :  { %5400 = vmatpush1.bf16.msra.mxu0 %v8446_v10  ;;  %5933 = vmatpush1.bf16.msra.mxu1 %v8449_v11  ;;  %v8536_v10 = vld [vmem:[%s11311_s1 + $0x17e0] ss:$16 sps:$4 sm:$0xff]   ;;  %v8539_v11 = vld [vmem:[%s11311_s1 + $0x17e8] ss:$16 sps:$4 sm:$0xff]  }
 0x2c4   :  { %5401 = vmatprep.subr.bf16.mxu0 %v8454_v12  ;;  %5934 = vmatprep.subr.bf16.mxu1 %v8457_v0  ;;  %v8544_v12 = vld [vmem:[%s11311_s1 + $0x1804] ss:$16 sps:$4 sm:$0xff]   ;;  %v8547_v0 = vld [vmem:[%s11311_s1 + $0x180c] ss:$16 sps:$4 sm:$0xff]  }
 0x2c5   :  { %5431 = vmatprep.mubr.bf16.mxu0 %v985_v52  ;;  %5964 = vmatprep.mubr.bf16.mxu1 %v985_v52  ;;  %v983_v52 = vcombine.high %v10933_v9, %v10933_v9  ;;  %v8553_v9 = vld [vmem:[%s11311_s1 + $0x182c] ss:$16 sps:$4 sm:$0xff]  }
 0x2c7   :  { %5402 = vmatpush1.bf16.msra.mxu0 %v8452_v15  ;;  %5935 = vmatpush1.bf16.msra.mxu1 %v8455_v16  ;;  %v8542_v15 = vld [vmem:[%s11311_s1 + $0x1800] ss:$16 sps:$4 sm:$0xff]   ;;  %v8545_v16 = vld [vmem:[%s11311_s1 + $0x1808] ss:$16 sps:$4 sm:$0xff]  }
 0x2c8   :  { %5403 = vmatprep.subr.bf16.mxu0 %v8460_v8  ;;  %5936 = vmatprep.subr.bf16.mxu1 %v8463_v17  ;;  %v8550_v8 = vld [vmem:[%s11311_s1 + $0x1824] ss:$16 sps:$4 sm:$0xff]   ;;  %v8548_v17 = vld [vmem:[%s11311_s1 + $0x1820] ss:$16 sps:$4 sm:$0xff]  }
 0x2cb   :  { %5404 = vmatpush1.bf16.msra.mxu0 %v8458_v18  ;;  %5937 = vmatpush1.bf16.msra.mxu1 %v8461_v19  ;;  %v8551_v18 = vld [vmem:[%s11311_s1 + $0x1828] ss:$16 sps:$4 sm:$0xff]   ;;  %v8556_v19 = vld [vmem:[%s11311_s1 + $0x1844] ss:$16 sps:$4 sm:$0xff]  }
 0x2cc   :  { %5405 = vmatprep.subr.bf16.mxu0 %v8466_v20  ;;  %5938 = vmatprep.subr.bf16.mxu1 %v8469_v22  ;;  %v8559_v20 = vld [vmem:[%s11311_s1 + $0x184c] ss:$16 sps:$4 sm:$0xff]   ;;  %v8649_v22 = vmov 0  }
 0x2cf   :  { %5406 = vmatpush1.bf16.msra.mxu0 %v8464_v23  ;;  %5939 = vmatpush1.bf16.msra.mxu1 %v8467_v24  ;;  %v8554_v23 = vld [vmem:[%s11311_s1 + $0x1840] ss:$16 sps:$4 sm:$0xff]   ;;  %v8557_v24 = vld [vmem:[%s11311_s1 + $0x1848] ss:$16 sps:$4 sm:$0xff]  }
 0x2d0   :  { %5407 = vmatprep.subr.bf16.mxu0 %v8472_v13  ;;  %5940 = vmatprep.subr.bf16.mxu1 %v8475_v27  ;;  %v8562_v13 = vld [vmem:[%s11311_s1 + $0x1864] ss:$16 sps:$4 sm:$0xff]   ;;  %v8565_v27 = vld [vmem:[%s11311_s1 + $0x186c] ss:$16 sps:$4 sm:$0xff]  }
 0x2d3   :  { %5408 = vmatpush1.bf16.msra.mxu0 %v8470_v28  ;;  %5941 = vmatpush1.bf16.msra.mxu1 %v8473_v29  ;;  %v8560_v28 = vld [vmem:[%s11311_s1 + $0x1860] ss:$16 sps:$4 sm:$0xff]   ;;  %v8563_v29 = vld [vmem:[%s11311_s1 + $0x1868] ss:$16 sps:$4 sm:$0xff]  }
 0x2d4   :  { %5409 = vmatprep.subr.bf16.mxu0 %v8478_v14  ;;  %5942 = vmatprep.subr.bf16.mxu1 %v8481_v30  ;;  %v6418_v14 = vld.sshfl [vmem:[%s11310_s0 + $0x18] sm:$0x1 pattern:$0x75316420]  ;;  %v8566_v30 = vld [vmem:[%s11313_s3 + $0x40] sm:$0xff]  }
 0x2d7   :  { %5410 = vmatpush1.bf16.msra.mxu0 %v8476_v31  ;;  %5943 = vmatpush1.bf16.msra.mxu1 %v8479_v25  ;;  %v8567_v31 = vld [vmem:[%s11313_s3 + $0xc0] sm:$0xff]   ;;  %v999_v25 = vrot.slane %v6418_v14, %v8823_v49  ;;  %v8571_v49 = vld [vmem:[%s11313_s3 + $0xc8] sm:$0xff]  }
 0x2d8   :  { %5411 = vmatprep.subr.bf16.mxu0 %v8484_v32  ;;  %5944 = vmatprep.subr.bf16.mxu1 %v8487_v33  ;;  %v8568_v32 = vld [vmem:[%s11313_s3] sm:$0xff]  }
 0x2d9   :  { %v8569_v33 = vld [vmem:[%s11313_s3 + $0x80] sm:$0xff]  }
 0x2db   :  { %5412 = vmatpush1.bf16.msra.mxu0 %v8482_v26  ;;  %5945 = vmatpush1.bf16.msra.mxu1 %v8485_v36  ;;  %v8570_v26 = vld [vmem:[%s11313_s3 + $0x48] sm:$0xff]  }
 0x2dc   :  { %5413 = vmatprep.subr.bf16.mxu0 %v8490_v37  ;;  %5946 = vmatprep.subr.bf16.mxu1 %v8493_v21  ;;  %v8572_v36 = vld [vmem:[%s11313_s3 + $0x8] sm:$0xff]   ;;  %v8574_v21 = vld [vmem:[%s11313_s3 + $0x50] sm:$0xff]  }
 0x2dd   :  { %v8573_v37 = vld [vmem:[%s11313_s3 + $0x88] sm:$0xff]  }
 0x2df   :  { %5414 = vmatpush1.bf16.msra.mxu0 %v8488_v39  ;;  %5947 = vmatpush1.bf16.msra.mxu1 %v8491_v40  ;;  %v8575_v39 = vld [vmem:[%s11313_s3 + $0xd0] sm:$0xff]  }
 0x2e0   :  { %5415 = vmatprep.subr.bf16.mxu0 %v8496_v41  ;;  %5948 = vmatprep.subr.bf16.mxu1 %v8499_v34  ;;  %v8576_v40 = vld [vmem:[%s11313_s3 + $0x10] sm:$0xff]   ;;  %v8578_v34 = vld [vmem:[%s11313_s3 + $0x58] sm:$0xff]  }
 0x2e1   :  { %v8577_v41 = vld [vmem:[%s11313_s3 + $0x90] sm:$0xff]  }
 0x2e3   :  { %5416 = vmatpush1.bf16.msra.mxu0 %v8494_v43  ;;  %5949 = vmatpush1.bf16.msra.mxu1 %v8497_v45  ;;  %v8579_v43 = vld [vmem:[%s11313_s3 + $0xd8] sm:$0xff]  }
 0x2e4   :  { %5417 = vmatprep.subr.bf16.mxu0 %v8502_v46  ;;  %5950 = vmatprep.subr.bf16.mxu1 %v8505_v35  ;;  %v8580_v45 = vld [vmem:[%s11313_s3 + $0x18] sm:$0xff]   ;;  %v8582_v35 = vld [vmem:[%s11313_s3 + $0x60] sm:$0xff]  }
 0x2e5   :  { %v8581_v46 = vld [vmem:[%s11313_s3 + $0x98] sm:$0xff]  }
 0x2e7   :  { %5418 = vmatpush1.bf16.msra.mxu0 %v8500_v50  ;;  %5951 = vmatpush1.bf16.msra.mxu1 %v8503_v53  ;;  %v8583_v50 = vld [vmem:[%s11313_s3 + $0xe0] sm:$0xff]  }
 0x2e8   :  { %5419 = vmatprep.subr.bf16.mxu0 %v8508_v38  ;;  %5952 = vmatprep.subr.bf16.mxu1 %v8511_v54  ;;  %v8584_v53 = vld [vmem:[%s11313_s3 + $0x20] sm:$0xff]   ;;  %v8586_v54 = vld [vmem:[%s11313_s3 + $0x68] sm:$0xff]  }
 0x2e9   :  { %v8585_v38 = vld [vmem:[%s11313_s3 + $0xa0] sm:$0xff]  }
 0x2eb   :  { %5420 = vmatpush1.bf16.msra.mxu0 %v8506_v55  ;;  %5953 = vmatpush1.bf16.msra.mxu1 %v8509_v56  ;;  %v8587_v55 = vld [vmem:[%s11313_s3 + $0xe8] sm:$0xff]  }
 0x2ec   :  { %5421 = vmatprep.subr.bf16.mxu0 %v8514_v47  ;;  %5954 = vmatprep.subr.bf16.mxu1 %v8517_v57  ;;  %v8588_v56 = vld [vmem:[%s11313_s3 + $0x28] sm:$0xff]   ;;  %v8590_v57 = vld [vmem:[%s11313_s3 + $0x70] sm:$0xff]  }
 0x2ed   :  { %v8589_v47 = vld [vmem:[%s11313_s3 + $0xa8] sm:$0xff]  }
 0x2ef   :  { %5422 = vmatpush1.bf16.msra.mxu0 %v8512_v58  ;;  %5955 = vmatpush1.bf16.msra.mxu1 %v8515_v59  ;;  %v8591_v58 = vld [vmem:[%s11313_s3 + $0xf0] sm:$0xff]  }
 0x2f0   :  { %5423 = vmatprep.subr.bf16.mxu0 %v8520_v48  ;;  %5956 = vmatprep.subr.bf16.mxu1 %v8523_v61  ;;  %v8592_v59 = vld [vmem:[%s11313_s3 + $0x30] sm:$0xff]   ;;  %v8594_v61 = vld [vmem:[%s11313_s3 + $0x78] sm:$0xff]  }
 0x2f1   :  { %v8593_v48 = vld [vmem:[%s11313_s3 + $0xb0] sm:$0xff]  }
 0x2f3   :  { %5424 = vmatpush1.bf16.msra.mxu0 %v8518_v63  ;;  %5957 = vmatpush1.bf16.msra.mxu1 %v8521_v44  ;;  %v8595_v63 = vld [vmem:[%s11313_s3 + $0xf8] sm:$0xff]  }
 0x2f4   :  { %5425 = vmatprep.subr.bf16.mxu0 %v8526_v1  ;;  %5958 = vmatprep.subr.bf16.mxu1 %v8529_v51  ;;  %v8596_v44 = vld [vmem:[%s11313_s3 + $0x38] sm:$0xff]   ;;  %v817_v51 = vsub.s32 0, %v8805_v42 }
 0x2f5   :  { %v8597_v1 = vld [vmem:[%s11313_s3 + $0xb8] sm:$0xff]  }
 0x2f7   :  { %5426 = vmatpush1.bf16.msra.mxu0 %v8524_v2  ;;  %5959 = vmatpush1.bf16.msra.mxu1 %v8527_v3  ;;  %v825_v2 = vsub.s32 2, %v8805_v42  ;;  %v813_v3 = vld [vmem:[%s11312_s2] sm:$0xf]  ;;  %s8651_s2 = smov [#allocation2]  }
 0x2f8   :  { %5427 = vmatprep.subr.bf16.mxu0 %v8532_v4  ;;  %5960 = vmatprep.subr.bf16.mxu1 %v8535_v60  ;;  %v821_v4 = vsub.s32 1, %v8805_v42  ;;  %v829_v60 = vsub.s32 3, %v8805_v42  ;;  %s6396_s3 = sshll.u32 %s8651_s2, 4  ;;  %s6397_s3 = int_to_ptr.vmem [resolvable:$true] %s6396_s3 }
 0x2f9   :  { %s8600_s27 = scalar_lea.vmem %s6397_s3, 128  ;;  %p8605_p1 = scmp.lt.s32.totalorder %s6397_s3, %s6397_s3 }
 0x2fa   :  { %p8601_p0 = scmp.ne.s32.totalorder %s6397_s3, %s8600_s27  ;;  %p8606_p2 = scmp.lt.s32.totalorder %s8600_s27, %s8600_s27 }
 0x2fb   :  { %5428 = vmatpush1.bf16.msra.mxu0 %v8530_v5  ;;  %5961 = vmatpush1.bf16.msra.mxu1 %v8533_v6  ;;  %v8650_v5 = vmov 1983009808  }
 0x2fc   :  { %5429 = vmatprep.subr.bf16.mxu0 %v8538_v7  ;;  %5962 = vmatprep.subr.bf16.mxu1 %v8541_v62  ;;  %v6025_v6 = vunpack.c.l.s4 %v8650_v5  ;;  %v818_v7 = vrot.slane %v813_v3, %v817_v51  ;;  %v826_v62 = vrot.slane %v813_v3, %v825_v2  ;;  %p8607_p3 = por %p8606_p2, %p8605_p1 }
 0x2fe   :  { %p8608_p4 = pnand %p8607_p3, %p8601_p0 }
 0x2ff   :  { %5430 = vmatpush1.bf16.msra.mxu0 %v8536_v10  ;;  %5963 = vmatpush1.bf16.msra.mxu1 %v8539_v11  ;;  %v822_v10 = vrot.slane %v813_v3, %v821_v4  ;;  %v830_v11 = vrot.slane %v813_v3, %v829_v60 }
 0x300   :  { %5440 = vmatprep.subr.bf16.mxu0 %v8544_v12  ;;  %5973 = vmatprep.subr.bf16.mxu1 %v8547_v0 }
 0x302   :  { %5432 = vmatmul.mubr.bf16.vlgmr.msra.gmra.mrb[0].mxu0 %v983_v52  ;;  %5965 = vmatmul.mubr.bf16.vlgmr.msra.gmra.mrb[0].mxu1 %v983_v52  ;;  %v6026_v52 = vunpack.c.0.s8 %v6025_v6 }
 0x303   :  { %5441 = vmatpush1.bf16.msra.mxu0 %v8542_v15  ;;  %5974 = vmatpush1.bf16.msra.mxu1 %v8545_v16 }
 0x304   :  { %5442 = vmatprep.subr.bf16.mxu0 %v8550_v8  ;;  %5975 = vmatprep.subr.bf16.mxu1 %v8553_v9 }
 0x305   :  { %5472 = vmatprep.mubr.bf16.mxu0 %v8649_v22  ;;  %6005 = vmatprep.mubr.bf16.mxu1 %v8649_v22 }
 0x307   :  { %5443 = vmatpush1.bf16.msra.mxu0 %v8548_v17  ;;  %5976 = vmatpush1.bf16.msra.mxu1 %v8551_v18 }
 0x308   :  { %5444 = vmatprep.subr.bf16.mxu0 %v8556_v19  ;;  %5977 = vmatprep.subr.bf16.mxu1 %v8559_v20 }
 0x30b   :  { %5445 = vmatpush1.bf16.msra.mxu0 %v8554_v23  ;;  %5978 = vmatpush1.bf16.msra.mxu1 %v8557_v24 }
 0x30c   :  { %5446 = vmatprep.subr.bf16.mxu0 %v8562_v13  ;;  %5979 = vmatprep.subr.bf16.mxu1 %v8565_v27 }
 0x30f   :  { %5447 = vmatpush1.bf16.msra.mxu0 %v8560_v28  ;;  %5980 = vmatpush1.bf16.msra.mxu1 %v8563_v29  ;;  %v6029_v29 = vsub.s32 %v6026_v52, %v8805_v42 }
 0x310   :  { %7238 = vmatprep.subr.bf16.mxu0 %v8566_v30  ;;  %7260 = vmatprep.subr.bf16.mxu1 %v8567_v31 }
 0x312   :  { %7203 = vmatmul.mubr.msk.bf16.vlgmr.msra.gmra.mrb[0].mxu0 %vm4944_vm0, %v999_v25  ;;  %7204 = vmatmul.mubr.msk.bf16.vlgmr.msra.gmra.mrb[0].mxu1 %vm4944_vm0, %v999_v25 }
 0x313   :  { %7239 = vmatpush3.bf16.msra.mxu0 %v8568_v32  ;;  %7261 = vmatpush3.bf16.msra.mxu1 %v8569_v33 }
 0x314   :  { %7240 = vmatprep.subr.bf16.mxu0 %v8570_v26  ;;  %7262 = vmatprep.subr.bf16.mxu1 %v8571_v49 }
 0x317   :  { %7241 = vmatpush3.bf16.msra.mxu0 %v8572_v36  ;;  %7263 = vmatpush3.bf16.msra.mxu1 %v8573_v37 }
 0x318   :  { %7242 = vmatprep.subr.bf16.mxu0 %v8574_v21  ;;  %7264 = vmatprep.subr.bf16.mxu1 %v8575_v39 }
 0x31b   :  { %7243 = vmatpush3.bf16.msra.mxu0 %v8576_v40  ;;  %7265 = vmatpush3.bf16.msra.mxu1 %v8577_v41 }
 0x31c   :  { %7244 = vmatprep.subr.bf16.mxu0 %v8578_v34  ;;  %7266 = vmatprep.subr.bf16.mxu1 %v8579_v43 }
 0x31f   :  { %7245 = vmatpush3.bf16.msra.mxu0 %v8580_v45  ;;  %7267 = vmatpush3.bf16.msra.mxu1 %v8581_v46 }
 0x320   :  { %7246 = vmatprep.subr.bf16.mxu0 %v8582_v35  ;;  %7268 = vmatprep.subr.bf16.mxu1 %v8583_v50 }
 0x323   :  { %7247 = vmatpush3.bf16.msra.mxu0 %v8584_v53  ;;  %7269 = vmatpush3.bf16.msra.mxu1 %v8585_v38 }
 0x324   :  { %7248 = vmatprep.subr.bf16.mxu0 %v8586_v54  ;;  %7270 = vmatprep.subr.bf16.mxu1 %v8587_v55 }
 0x327   :  { %7249 = vmatpush3.bf16.msra.mxu0 %v8588_v56  ;;  %7271 = vmatpush3.bf16.msra.mxu1 %v8589_v47 }
 0x328   :  { %7250 = vmatprep.subr.bf16.mxu0 %v8590_v57  ;;  %7272 = vmatprep.subr.bf16.mxu1 %v8591_v58 }
 0x32b   :  { %7251 = vmatpush3.bf16.msra.mxu0 %v8592_v59  ;;  %7273 = vmatpush3.bf16.msra.mxu1 %v8593_v48 }
 0x32c   :  { %7252 = vmatprep.subr.bf16.mxu0 %v8594_v61  ;;  %7274 = vmatprep.subr.bf16.mxu1 %v8595_v63 }
 0x32f   :  { %7253 = vmatpush3.bf16.msra.mxu0 %v8596_v44  ;;  %7275 = vmatpush3.bf16.msra.mxu1 %v8597_v1 }
 0x3e5   :  { %v5474_v12 = vpop.f32.mrb[0].mxu0  ;;  %v6007_v0 = vpop.f32.mrb[0].mxu1 }
 0x3e6   :  { %v7282_v15 = vadd.f32 %v5474_v12, %v818_v7  ;;  %v7284_v16 = vadd.f32 %v6007_v0, %v826_v62  ;;  %v5476_v8 = vpop.f32.mrb[1].mxu0  ;;  %v6009_v9 = vpop.f32.mrb[1].mxu1 }
 0x3e7   :  { %v7283_v17 = vadd.f32 %v5476_v8, %v822_v10  ;;  %v7285_v18 = vadd.f32 %v6009_v9, %v830_v11  ;;  %v5478_v19 = vpop.f32.mrb[2].mxu0  ;;  %v6011_v20 = vpop.f32.mrb[2].mxu1 }
 0x3e8   :  { %v6014_v22 = vmax.f32 %v7282_v15, 0.0  ;;  %v6016_v23 = vmax.f32 %v7284_v16, 0.0  ;;  %v5479_v24 = vpop.f32.mrb[3].mxu0  ;;  %v6012_v13 = vpop.f32.mrb[3].mxu1 }
 0x3e9   :  { %v6015_v27 = vmax.f32 %v7283_v17, 0.0  ;;  %v6017_v28 = vmax.f32 %v7285_v18, 0.0 }
 0x3ea   :  { %v6041_v32 = vpack.c.bf16 %v6014_v22, %v6014_v22  ;;  %v6043_v33 = vpack.c.bf16 %v6016_v23, %v6016_v23 }
 0x3eb   :  { %v6022_v14 = vcombine.low %v6014_v22, %v6015_v27  ;;  %v6042_v30 = vpack.c.bf16 %v6015_v27, %v6015_v27  ;;  %v6023_v31 = vcombine.low %v6016_v23, %v6017_v28  ;;  %v6044_v25 = vpack.c.bf16 %v6017_v28, %v6017_v28 }
 0x3ed   :  { %6340 = vmatprep.mubr.bf16.mxu0 %v6042_v30  ;;  %6380 = vmatprep.mubr.bf16.mxu1 %v6044_v25  ;;  %v6030_v26 = vrot.slane %v6022_v14, %v6029_v29  ;;  %v6037_v49 = vrot.slane %v6023_v31, %v6029_v29 }
 0x3ee   :  { %6341 = vmatmul.mubr.bf16.vlgmr.msra.gmra.mrb[4].mxu0 %v6041_v32  ;;  %6381 = vmatmul.mubr.bf16.vlgmr.msra.gmra.mrb[4].mxu1 %v6043_v33 }
 0x3ef   :  { %v6038_v36 = vcombine.low %v6030_v26, %v6037_v49 }
 0x3f1   :  { %6040 = vst [vmem:[#allocation2] sm:$0xff] %v6038_v36 }
 0x3f2   :  { %8611 = shalt.err (!%p8608_p4)
}
 0x3f3   :  { %s8612_s30 = scalar_lea.hbm %s11315_s5, 128 }
 0x3f4   :  { %p8613_p5 = scmp.ne.s32.totalorder %s11315_s5, %s8612_s30  ;;  %p8616_p6 = scmp.lt.u32.totalorder %s8612_s30, %s11315_s5 }
 0x3f6   :  { %p8618_p7 = pnand %p8616_p6, %p8613_p5 }
 0x3f8   :  { %8621 = shalt.err (!%p8618_p7)
}
 0x3f9   :  { %6399 = dma.vmem_to_hbm [thread:$0]  %s6397_s3, 128, %s11315_s5, [#allocation3]   ;;  %v7205_v21 = vld [vmem:[%s11314_s4] ss:$0 sm:$0xff]  ;;  %vm6388_vm1 = vcmask 41984  }
 0x3fa   :  { %s8652_s15 = smov [#allocation4]  }
 0x3fb   :  { %s6406_s16 = sshll.u32 %s8652_s15, 4  ;;  %s6407_s16 = int_to_ptr.vmem [resolvable:$true] %s6406_s16 }
 0x3fc   :  { %s8622_s5 = scalar_lea.vmem %s6407_s16, 32  ;;  %p8627_p9 = scmp.lt.s32.totalorder %s6407_s16, %s6407_s16 }
 0x3fd   :  { %p8623_p8 = scmp.ne.s32.totalorder %s6407_s16, %s8622_s5  ;;  %p8628_p10 = scmp.lt.s32.totalorder %s8622_s5, %s8622_s5 }
 0x3ff   :  { %p8629_p11 = por %p8628_p10, %p8627_p9 }
 0x401   :  { %p8630_p12 = pnand %p8629_p11, %p8623_p8 }
 0x4c1   :  { %v7254_v42 = vpop.f32.mrb[4].mxu0  ;;  %v7276_v37 = vpop.f32.mrb[4].mxu1 }
 0x4c2   :  { %v7255_v39 = vpop.f32.mrb[5].mxu0  ;;  %v7277_v40 = vpop.f32.mrb[5].mxu1 }
 0x4c3   :  { %v7256_v41 = vadd.f32 %v7255_v39, %v7254_v42  ;;  %v7278_v34 = vadd.f32 %v7277_v40, %v7276_v37  ;;  %v7257_v43 = vpop.f32.mrb[6].mxu0  ;;  %v7279_v45 = vpop.f32.mrb[6].mxu1 }
 0x4c4   :  { %v7258_v46 = vpop.f32.mrb[7].mxu0  ;;  %v7280_v35 = vpop.f32.mrb[7].mxu1 }
 0x4c5   :  { %v6343_v50 = vadd.f32 %v7256_v41, %v7205_v21 }
 0x4c7   :  { %v6383_v53 = vadd.f32 %v7278_v34, %v6343_v50 }
 0x4c9   :  { %6389 = vst.msk [vmem:[#allocation4] sm:$0x3] %vm6388_vm1, %v6383_v53 }
 0x4ca   :  { %8633 = shalt.err (!%p8630_p12)
}
 0x4cb   :  { %s8634_s18 = scalar_lea.hbm %s11316_s6, 32 }
 0x4cc   :  { %p8635_p13 = scmp.ne.s32.totalorder %s11316_s6, %s8634_s18  ;;  %p8638_p0 = scmp.lt.u32.totalorder %s8634_s18, %s11316_s6 }
 0x4ce   :  { %p8640_p1 = pnand %p8638_p0, %p8635_p13 }
 0x4d0   :  { %8643 = shalt.err (!%p8640_p1)
}
 0x4d1   :  { %6409 = dma.vmem_to_hbm [thread:$0]  %s6407_s16, 32, %s11316_s6, [#allocation5]  }
 0x4d2   :  { %8644 = dma.done.wait [#allocation3], 128  }
 0x4d3   :  { %8645 = vsyncadd [#allocation3], 4294967168 }
 0x4d4   :  { %8646 = dma.done.wait [#allocation5], 32  }
 0x4d5   :  { %8647 = vsyncadd [#allocation5], 4294967264 }
 0x4d6   :  { %6416 = vsyncpa [#allocation3], 1 }
 0x4d7   :  { %6417 = vsyncpa [#allocation5], 1 }

</bundles_post_ra>
